<compile_context>
chip_gen: v7x
topology: tpu7x:2x2x1
jax: 0.10.0
libtpu: 0.0.40
codegen_flags: <defaults>
</compile_context>

<pallas_src>
import jax
import jax.numpy as jnp
import numpy as np
from jax import lax
from jax.experimental import pallas as pl
from jax.experimental.pallas import tpu as pltpu


# Layout of the packed per-channel vector slab: (128, 16) f32, one vector per lane column,
# zero-padded below each vector's channel count.
_VEC_LAYOUT = (
    ("ne_b1", 64), ("ne_g1", 64), ("ne_be1", 64),
    ("ne_b2", 128), ("ne_g2", 128), ("ne_be2", 128),
    ("ne_b3", 128),
    ("ca_b1", 8), ("ca_b2", 128),
    ("pr_b1", 64), ("pr_g1", 64), ("pr_be1", 64),
    ("pr_b2", 128), ("pr_g2", 128), ("pr_be2", 128),
    ("pr_b3", 4),
)
_VCOL = {name: j for j, (name, _) in enumerate(_VEC_LAYOUT)}
_VDIM = dict(_VEC_LAYOUT)


# ---------------------------------------------------------------------------
# Pallas kernel: full forward pass for one batch element (channels-first)
# ---------------------------------------------------------------------------
def refine_kernel(sa_ref, temb_ref, noisy_ref, feat_ref,
                  vecs_ref, gr64_ref, ge64_ref, gr128_ref, ge128_ref,
                  ne_w1, ne_w2, ne_w3, ca_w1, ca_w2,
                  pr_w1, pr_w2, pr_w3,
                  out_ref, pool_ref):
    noisy = noisy_ref[0]                                           # (Cn, N) f32
    feat = feat_ref[0].astype(jnp.float32) + temb_ref[0]           # bf16 feat -> f32, + (Cf,1) temb
    vecs = vecs_ref[...]                                           # (128, 16) packed channel vectors
    cf, n = feat.shape
    ones_n = jnp.full((n, 1), 1.0, dtype=jnp.float32)              # MXU sum-reduction vector

    def vcol(name):
        j = _VCOL[name]
        c = _VDIM[name]
        return vecs[0:c, j:j + 1]                                  # (C, 1) slice of the slab

    def conv(w_ref, x, bias):
        # Conv1d(k=1), channels-first: (Cout, Cin) @ (Cin, N).  bf16 operands, f32 accumulation.
        return jnp.dot(w_ref[...], x.astype(jnp.bfloat16),
                       preferred_element_type=jnp.float32) + bias

    def group_norm(x, gr_ref, ge_ref, gamma, beta, eps=1e-5):
        # x: (C, N) f32.  gr: (G, C) one-hot scaled by 1/(cg*N); ge: (C, G) one-hot expand.
        # Centered two-pass stats; all sums are f32 MXU dots (keeps the XLU free).
        s = jnp.dot(x, ones_n, preferred_element_type=jnp.float32)            # (C, 1) raw sums
        mean = jnp.dot(ge_ref[...],
                       jnp.dot(gr_ref[...], s, preferred_element_type=jnp.float32),
                       preferred_element_type=jnp.float32)                    # (C, 1) per-group mean
        xc = x - mean
        ss = jnp.dot(xc * xc, ones_n, preferred_element_type=jnp.float32)     # (C, 1) centered sumsq
        var = jnp.dot(ge_ref[...],
                      jnp.dot(gr_ref[...], ss, preferred_element_type=jnp.float32),
                      preferred_element_type=jnp.float32)                     # (C, 1) biased variance
        scale = lax.rsqrt(var + eps) * gamma
        return xc * scale + beta

    # noise_embedding: Conv(Cn->64) -> GN(4,64) -> ReLU -> Conv(64->128) -> GN(4,128) -> ReLU -> Conv(128->Cf)
    h = conv(ne_w1, noisy, vcol("ne_b1"))
    h = jnp.maximum(group_norm(h, gr64_ref, ge64_ref, vcol("ne_g1"), vcol("ne_be1")), 0.0)
    h = conv(ne_w2, h, vcol("ne_b2"))
    h = jnp.maximum(group_norm(h, gr128_ref, ge128_ref, vcol("ne_g2"), vcol("ne_be2")), 0.0)
    h = conv(ne_w3, h, vcol("ne_b3"))
    feat = feat + h

    # ChannelAttention(128, ratio=16): avg (MXU dot) / max (XLU) pool over N, shared MLP run once
    # on the stacked (Cf, 2) [avg | max] matrix (built via a 2-wide VMEM scratch), sigmoid gate.
    pool_ref[:, 0:1] = jnp.dot(feat, ones_n, preferred_element_type=jnp.float32) * (1.0 / n)
    pool_ref[:, 1:2] = jnp.max(feat, axis=1, keepdims=True)
    pooled = pool_ref[...]                                                     # (Cf, 2)
    hid = jnp.maximum(jnp.dot(ca_w1[...], pooled,
                              preferred_element_type=jnp.float32) + vcol("ca_b1"), 0.0)   # (8, 2)
    gate = jnp.dot(ca_w2[...], hid,
                   preferred_element_type=jnp.float32) + vcol("ca_b2")                    # (Cf, 2)
    feat = feat * jax.nn.sigmoid(gate[:, 0:1] + gate[:, 1:2])

    # SpatialAttention: channel-mean via (1,Cf)@(Cf,N) MXU dot, channel-max on XLU,
    # Conv1d(2,1,1) as three SMEM scalars, sigmoid gate.
    inv_cf = jnp.full((1, cf), 1.0 / cf, dtype=jnp.float32)
    avg_c = jnp.dot(inv_cf, feat, preferred_element_type=jnp.float32)          # (1, N)
    max_c = jnp.max(feat, axis=0, keepdims=True)                               # (1, N)
    sa = jax.nn.sigmoid(avg_c * sa_ref[0] + max_c * sa_ref[1] + sa_ref[2])
    feat = feat * sa

    # pred: Conv(Cf->64) -> GN(4,64) -> ReLU -> Conv(64->128) -> GN(4,128) -> ReLU -> Conv(128->Cn)
    p = conv(pr_w1, feat, vcol("pr_b1"))
    p = jnp.maximum(group_norm(p, gr64_ref, ge64_ref, vcol("pr_g1"), vcol("pr_be1")), 0.0)
    p = conv(pr_w2, p, vcol("pr_b2"))
    p = jnp.maximum(group_norm(p, gr128_ref, ge128_ref, vcol("pr_g2"), vcol("pr_be2")), 0.0)
    p = conv(pr_w3, p, vcol("pr_b3"))

    out_ref[0] = p + noisy


# ---------------------------------------------------------------------------
# Host-side packing helpers
# ---------------------------------------------------------------------------
def _gn_matrices(c, groups, n_positions):
    """Factored GroupNorm projectors: gr (G,C) one-hot scaled 1/(cg*N), ge (C,G) one-hot expand."""
    cg = c // groups
    gid = np.arange(c) // cg
    gr = (np.arange(groups)[:, None] == gid[None, :]).astype(np.float32) / float(cg * n_positions)
    ge = (gid[:, None] == np.arange(groups)[None, :]).astype(np.float32)
    return jnp.asarray(gr), jnp.asarray(ge)


def _pack_channel_vectors(params):
    """All 16 per-channel (C,1) biases / GroupNorm affines into one (128, 16) f32 slab."""
    slab = np.zeros((128, len(_VEC_LAYOUT)), np.float32)
    for j, (name, c) in enumerate(_VEC_LAYOUT):
        slab[:c, j] = np.asarray(params[name], dtype=np.float32).reshape(-1)
    return jnp.asarray(slab)


# ---------------------------------------------------------------------------
# Wrapper (embedding gather, channels-first glue, pallas_call setup)
# ---------------------------------------------------------------------------
def scheduled_cnn_refine(noisy_image, t, feat, params):
    """noisy_image: (B, N, Cn) f32, t: () or (B,) int32, feat: (B, Cf, N) f32.
    Returns (B, Cn, N) — same layout as the PyTorch module."""
    B, N, Cn = noisy_image.shape
    Cf = feat.shape[1]

    # TODO(synk): nn.Embedding lookup (gather) is done in plain JAX glue, not inside the kernel.
    emb = params["embedding"][jnp.atleast_1d(t)]                              # (1 or B, Cf)
    temb = jnp.broadcast_to(emb, (B, Cf)).reshape(B, Cf, 1).astype(jnp.float32)

    noisy_cf = jnp.transpose(noisy_image, (0, 2, 1)).astype(jnp.float32)      # (B, Cn, N) — tiny
    feat_bf = feat.astype(jnp.bfloat16)                                       # halve the dominant HBM stream

    gr64, ge64 = _gn_matrices(64, 4, N)
    gr128, ge128 = _gn_matrices(128, 4, N)
    vecs = _pack_channel_vectors(params)

    consts = [vecs, gr64, ge64, gr128, ge128,
              params["ne_w1"].astype(jnp.bfloat16),
              params["ne_w2"].astype(jnp.bfloat16),
              params["ne_w3"].astype(jnp.bfloat16),
              params["ca_w1"].astype(jnp.float32),
              params["ca_w2"].astype(jnp.float32),
              params["pr_w1"].astype(jnp.bfloat16),
              params["pr_w2"].astype(jnp.bfloat16),
              params["pr_w3"].astype(jnp.bfloat16)]

    sa_params = params["sa"].astype(jnp.float32)                              # [w_avg, w_max, bias]

    in_specs = [
        pl.BlockSpec(memory_space=pltpu.MemorySpace.SMEM),                    # SpatialAttention scalars
        pl.BlockSpec((1, Cf, 1), lambda b: (b, 0, 0)),                        # time embedding
        pl.BlockSpec((1, Cn, N), lambda b: (b, 0, 0)),                        # noisy image (f32)
        pl.BlockSpec((1, Cf, N), lambda b: (b, 0, 0)),                        # feat (bf16)
    ] + [pl.BlockSpec(c.shape, lambda b: (0, 0)) for c in consts]             # constant-index weights

    conv_macs = 4 * 64 + 64 * 128 + 128 * 128 + 128 * 64 + 64 * 128 + 128 * 4  # per position
    cost = pl.CostEstimate(
        flops=int(2 * (conv_macs + 8 * 128) * N * B),
        transcendentals=int((2 * N + 1024) * B),
        bytes_accessed=int((2 * Cf + 8 * Cn) * N * B + 300_000),
    )

    out = pl.pallas_call(
        refine_kernel,
        out_shape=jax.ShapeDtypeStruct((B, Cn, N), jnp.float32),
        grid=(B,),
        in_specs=in_specs,
        out_specs=pl.BlockSpec((1, Cn, N), lambda b: (b, 0, 0)),
        scratch_shapes=[pltpu.VMEM((Cf, 2), jnp.float32)],                    # [avg|max] pooling stack
        compiler_params=pltpu.CompilerParams(
            dimension_semantics=("parallel",),
            vmem_limit_bytes=48 * 1024 * 1024,                                # safe on v5e/v6e/v7x
        ),
        cost_estimate=cost,
    )(sa_params, temb, noisy_cf, feat_bf, *consts)

    return out                                                                # (B, Cn, N)


# ---------------------------------------------------------------------------
# Deterministic synthetic parameters (shapes from the module's __init__, channels-first)
# ---------------------------------------------------------------------------
def init_params(key, channels_in=128, channels_noise=4):
    keys = jax.random.split(key, 32)
    kit = iter(keys)

    def nrm(shape, scale=0.05):
        return scale * jax.random.normal(next(kit), shape, dtype=jnp.float32)

    p = {}
    p["embedding"] = nrm((1280, channels_in), 0.02)
    # noise_embedding stack: Conv1d weights as (Cout, Cin); biases/affines as (C, 1)
    p["ne_w1"] = nrm((64, channels_noise)); p["ne_b1"] = nrm((64, 1))
    p["ne_g1"] = 1.0 + nrm((64, 1), 0.01);  p["ne_be1"] = nrm((64, 1), 0.01)
    p["ne_w2"] = nrm((128, 64));            p["ne_b2"] = nrm((128, 1))
    p["ne_g2"] = 1.0 + nrm((128, 1), 0.01); p["ne_be2"] = nrm((128, 1), 0.01)
    p["ne_w3"] = nrm((channels_in, 128));   p["ne_b3"] = nrm((channels_in, 1))
    # ChannelAttention(128, ratio=16)
    p["ca_w1"] = nrm((8, 128)); p["ca_b1"] = nrm((8, 1))
    p["ca_w2"] = nrm((128, 8)); p["ca_b2"] = nrm((128, 1))
    # SpatialAttention Conv1d(2, 1, 1): [w_avg, w_max, bias]
    p["sa"] = nrm((3,))
    # pred stack
    p["pr_w1"] = nrm((64, channels_in));    p["pr_b1"] = nrm((64, 1))
    p["pr_g1"] = 1.0 + nrm((64, 1), 0.01);  p["pr_be1"] = nrm((64, 1), 0.01)
    p["pr_w2"] = nrm((128, 64));            p["pr_b2"] = nrm((128, 1))
    p["pr_g2"] = 1.0 + nrm((128, 1), 0.01); p["pr_be2"] = nrm((128, 1), 0.01)
    p["pr_w3"] = nrm((channels_noise, 128)); p["pr_b3"] = nrm((channels_noise, 1))
    return p


# ---------------------------------------------------------------------------
# Pure-JAX reference (mirrors the kernel's deliberate bf16-at-the-conv / bf16-feat convention;
# GroupNorm, attention gates and residuals in f32)
# ---------------------------------------------------------------------------
def _gn_ref(x, gamma, beta, groups, eps=1e-5):
    b, c, n = x.shape
    cg = c // groups
    xr = x.reshape(b, groups, cg, n)
    mean = xr.mean(axis=(2, 3), keepdims=True)
    var = ((xr - mean) ** 2).mean(axis=(2, 3), keepdims=True)
    y = ((xr - mean) / jnp.sqrt(var + eps)).reshape(b, c, n)
    return y * gamma + beta


def _conv_ref(x, w, b, bf16=True):
    if bf16:
        x = x.astype(jnp.bfloat16)
        w = w.astype(jnp.bfloat16)
    y = jnp.einsum("oc,bcn->bon", w, x, preferred_element_type=jnp.float32)
    return y + b[None, :, :]


def ref_forward(noisy_image, t, feat, params):
    B, N, Cn = noisy_image.shape
    Cf = feat.shape[1]
    emb = params["embedding"][jnp.atleast_1d(t)]
    x = feat.astype(jnp.bfloat16).astype(jnp.float32) + jnp.broadcast_to(emb, (B, Cf))[:, :, None]
    noisy_cf = jnp.transpose(noisy_image, (0, 2, 1))

    h = _conv_ref(noisy_cf, params["ne_w1"], params["ne_b1"])
    h = jax.nn.relu(_gn_ref(h, params["ne_g1"], params["ne_be1"], 4))
    h = _conv_ref(h, params["ne_w2"], params["ne_b2"])
    h = jax.nn.relu(_gn_ref(h, params["ne_g2"], params["ne_be2"], 4))
    h = _conv_ref(h, params["ne_w3"], params["ne_b3"])
    x = x + h

    avg = x.mean(axis=2, keepdims=True)
    mx = x.max(axis=2, keepdims=True)

    def fc(v):
        hid = jax.nn.relu(_conv_ref(v, params["ca_w1"], params["ca_b1"], bf16=False))
        return _conv_ref(hid, params["ca_w2"], params["ca_b2"], bf16=False)

    x = x * jax.nn.sigmoid(fc(avg) + fc(mx))

    avg_c = x.mean(axis=1, keepdims=True)
    max_c = x.max(axis=1, keepdims=True)
    sa = jax.nn.sigmoid(avg_c * params["sa"][0] + max_c * params["sa"][1] + params["sa"][2])
    x = x * sa

    p = _conv_ref(x, params["pr_w1"], params["pr_b1"])
    p = jax.nn.relu(_gn_ref(p, params["pr_g1"], params["pr_be1"], 4))
    p = _conv_ref(p, params["pr_w2"], params["pr_b2"])
    p = jax.nn.relu(_gn_ref(p, params["pr_g2"], params["pr_be2"], 4))
    p = _conv_ref(p, params["pr_w3"], params["pr_b3"])
    return p + noisy_cf


if __name__ == "__main__":
    key = jax.random.PRNGKey(0)
    kp, kn, kf, kt = jax.random.split(key, 4)
    B, N, Cn, Cf = 2, 16, 4, 128

    params = init_params(kp, channels_in=Cf, channels_noise=Cn)
    noisy = jax.random.normal(kn, (B, N, Cn), dtype=jnp.float32)   # PyTorch noisy_image: (B, N, channels_noise)
    feat = jax.random.normal(kf, (B, Cf, N), dtype=jnp.float32)    # PyTorch feat: (B, channels_in, N)
    t = jax.random.randint(kt, (B,), 0, 1280, dtype=jnp.int32)

    out = scheduled_cnn_refine(noisy, t, feat, params)
    out = jax.block_until_ready(out)

    ref = ref_forward(noisy, t, feat, params)
    np.testing.assert_allclose(np.asarray(out), np.asarray(ref), rtol=5e-3, atol=5e-3)
    print("KERNEL_OK")
</pallas_src>

<mosaic_0001>
module attributes {stable_mosaic.version = 11 : i64} {
  func.func @refine_kernel(%arg0: i32, %arg1: memref<3xf32, #tpu.memory_space<smem>>, %arg2: memref<1x128x1xf32, #tpu.memory_space<vmem>>, %arg3: memref<1x4x16xf32, #tpu.memory_space<vmem>>, %arg4: memref<1x128x16xbf16, #tpu.memory_space<vmem>>, %arg5: memref<128x16xf32, #tpu.memory_space<vmem>>, %arg6: memref<4x64xf32, #tpu.memory_space<vmem>>, %arg7: memref<64x4xf32, #tpu.memory_space<vmem>>, %arg8: memref<4x128xf32, #tpu.memory_space<vmem>>, %arg9: memref<128x4xf32, #tpu.memory_space<vmem>>, %arg10: memref<64x4xbf16, #tpu.memory_space<vmem>>, %arg11: memref<128x64xbf16, #tpu.memory_space<vmem>>, %arg12: memref<128x128xbf16, #tpu.memory_space<vmem>>, %arg13: memref<8x128xf32, #tpu.memory_space<vmem>>, %arg14: memref<128x8xf32, #tpu.memory_space<vmem>>, %arg15: memref<64x128xbf16, #tpu.memory_space<vmem>>, %arg16: memref<128x64xbf16, #tpu.memory_space<vmem>>, %arg17: memref<4x128xbf16, #tpu.memory_space<vmem>>, %arg18: memref<1x4x16xf32, #tpu.memory_space<vmem>>, %arg19: memref<128x2xf32, #tpu.memory_space<vmem>>) attributes {dimension_semantics = [#tpu.dimension_semantics<parallel>], iteration_bounds = array<i64: 2>, scalar_prefetch = 0 : i64, scratch_operands = 1 : i64, tpu.core_type = #tpu.core_type<tc>, window_params = [{transform_indices = @transform_0, window_bounds = array<i64: 3>}, {transform_indices = @transform_1, window_bounds = array<i64: 1, 128, 1>}, {transform_indices = @transform_2, window_bounds = array<i64: 1, 4, 16>}, {transform_indices = @transform_3, window_bounds = array<i64: 1, 128, 16>}, {pipeline_mode = #tpu.pipeline_mode<synchronous>, transform_indices = @transform_4, window_bounds = array<i64: 128, 16>}, {pipeline_mode = #tpu.pipeline_mode<synchronous>, transform_indices = @transform_5, window_bounds = array<i64: 4, 64>}, {pipeline_mode = #tpu.pipeline_mode<synchronous>, transform_indices = @transform_6, window_bounds = array<i64: 64, 4>}, {pipeline_mode = #tpu.pipeline_mode<synchronous>, transform_indices = @transform_7, window_bounds = array<i64: 4, 128>}, {pipeline_mode = #tpu.pipeline_mode<synchronous>, transform_indices = @transform_8, window_bounds = array<i64: 128, 4>}, {pipeline_mode = #tpu.pipeline_mode<synchronous>, transform_indices = @transform_9, window_bounds = array<i64: 64, 4>}, {pipeline_mode = #tpu.pipeline_mode<synchronous>, transform_indices = @transform_10, window_bounds = array<i64: 128, 64>}, {pipeline_mode = #tpu.pipeline_mode<synchronous>, transform_indices = @transform_11, window_bounds = array<i64: 128, 128>}, {pipeline_mode = #tpu.pipeline_mode<synchronous>, transform_indices = @transform_12, window_bounds = array<i64: 8, 128>}, {pipeline_mode = #tpu.pipeline_mode<synchronous>, transform_indices = @transform_13, window_bounds = array<i64: 128, 8>}, {pipeline_mode = #tpu.pipeline_mode<synchronous>, transform_indices = @transform_14, window_bounds = array<i64: 64, 128>}, {pipeline_mode = #tpu.pipeline_mode<synchronous>, transform_indices = @transform_15, window_bounds = array<i64: 128, 64>}, {pipeline_mode = #tpu.pipeline_mode<synchronous>, transform_indices = @transform_16, window_bounds = array<i64: 4, 128>}, {transform_indices = @transform_17, window_bounds = array<i64: 1, 4, 16>}]} {
    %c0 = arith.constant 0 : index
    %c0_0 = arith.constant 0 : index
    %c0_1 = arith.constant 0 : index
    %0 = vector.load %arg3[%c0, %c0_0, %c0_1] : memref<1x4x16xf32, #tpu.memory_space<vmem>>, vector<1x4x16xf32>
    %1 = vector.shape_cast %0 : vector<1x4x16xf32> to vector<4x16xf32>
    %c0_2 = arith.constant 0 : index
    %c0_3 = arith.constant 0 : index
    %c0_4 = arith.constant 0 : index
    %2 = vector.load %arg4[%c0_2, %c0_3, %c0_4] : memref<1x128x16xbf16, #tpu.memory_space<vmem>>, vector<1x128x16xbf16>
    %3 = vector.shape_cast %2 : vector<1x128x16xbf16> to vector<128x16xbf16>
    %4 = arith.extf %3 : vector<128x16xbf16> to vector<128x16xf32>
    %c0_5 = arith.constant 0 : index
    %c0_6 = arith.constant 0 : index
    %c0_7 = arith.constant 0 : index
    %5 = vector.load %arg2[%c0_5, %c0_6, %c0_7] : memref<1x128x1xf32, #tpu.memory_space<vmem>>, vector<1x128x1xf32>
    %6 = vector.shape_cast %5 : vector<1x128x1xf32> to vector<128x1xf32>
    %7 = vector.broadcast %6 : vector<128x1xf32> to vector<128x16xf32>
    %8 = arith.addf %4, %7 : vector<128x16xf32>
    %c0_8 = arith.constant 0 : index
    %c0_9 = arith.constant 0 : index
    %9 = vector.load %arg5[%c0_8, %c0_9] : memref<128x16xf32, #tpu.memory_space<vmem>>, vector<128x16xf32>
    %cst = arith.constant 1.000000e+00 : f32
    %10 = vector.broadcast %cst : f32 to vector<16x1xf32>
    %11 = vector.extract_strided_slice %9 {offsets = [0, 0], sizes = [64, 1], strides = [1, 1]} : vector<128x16xf32> to vector<64x1xf32>
    %c0_10 = arith.constant 0 : index
    %c0_11 = arith.constant 0 : index
    %12 = vector.load %arg10[%c0_10, %c0_11] : memref<64x4xbf16, #tpu.memory_space<vmem>>, vector<64x4xbf16>
    %13 = arith.truncf %1 : vector<4x16xf32> to vector<4x16xbf16>
    %cst_12 = arith.constant dense<0.000000e+00> : vector<64x16xf32>
    %14 = tpu.matmul %12, %13, %cst_12 {dimension_numbers = #tpu.dot_dimension_numbers<[1], [0], [0], [1], [0, 0, 1, 1], [], []>} : vector<64x4xbf16>, vector<4x16xbf16>, vector<64x16xf32> -> vector<64x16xf32>
    %15 = vector.broadcast %11 : vector<64x1xf32> to vector<64x16xf32>
    %16 = arith.addf %14, %15 : vector<64x16xf32>
    %17 = vector.extract_strided_slice %9 {offsets = [0, 1], sizes = [64, 1], strides = [1, 1]} : vector<128x16xf32> to vector<64x1xf32>
    %18 = vector.extract_strided_slice %9 {offsets = [0, 2], sizes = [64, 1], strides = [1, 1]} : vector<128x16xf32> to vector<64x1xf32>
    %cst_13 = arith.constant dense<0.000000e+00> : vector<64x1xf32>
    %19 = tpu.matmul %16, %10, %cst_13 {dimension_numbers = #tpu.dot_dimension_numbers<[1], [0], [0], [1], [0, 0, 1, 1], [], []>} : vector<64x16xf32>, vector<16x1xf32>, vector<64x1xf32> -> vector<64x1xf32>
    %c0_14 = arith.constant 0 : index
    %c0_15 = arith.constant 0 : index
    %20 = vector.load %arg7[%c0_14, %c0_15] : memref<64x4xf32, #tpu.memory_space<vmem>>, vector<64x4xf32>
    %c0_16 = arith.constant 0 : index
    %c0_17 = arith.constant 0 : index
    %21 = vector.load %arg6[%c0_16, %c0_17] : memref<4x64xf32, #tpu.memory_space<vmem>>, vector<4x64xf32>
    %cst_18 = arith.constant dense<0.000000e+00> : vector<4x1xf32>
    %22 = tpu.matmul %21, %19, %cst_18 {dimension_numbers = #tpu.dot_dimension_numbers<[1], [0], [0], [1], [0, 0, 1, 1], [], []>} : vector<4x64xf32>, vector<64x1xf32>, vector<4x1xf32> -> vector<4x1xf32>
    %cst_19 = arith.constant dense<0.000000e+00> : vector<64x1xf32>
    %23 = tpu.matmul %20, %22, %cst_19 {dimension_numbers = #tpu.dot_dimension_numbers<[1], [0], [0], [1], [0, 0, 1, 1], [], []>} : vector<64x4xf32>, vector<4x1xf32>, vector<64x1xf32> -> vector<64x1xf32>
    %24 = vector.broadcast %23 : vector<64x1xf32> to vector<64x16xf32>
    %25 = arith.subf %16, %24 : vector<64x16xf32>
    %26 = arith.mulf %25, %25 : vector<64x16xf32>
    %cst_20 = arith.constant dense<0.000000e+00> : vector<64x1xf32>
    %27 = tpu.matmul %26, %10, %cst_20 {dimension_numbers = #tpu.dot_dimension_numbers<[1], [0], [0], [1], [0, 0, 1, 1], [], []>} : vector<64x16xf32>, vector<16x1xf32>, vector<64x1xf32> -> vector<64x1xf32>
    %c0_21 = arith.constant 0 : index
    %c0_22 = arith.constant 0 : index
    %28 = vector.load %arg7[%c0_21, %c0_22] : memref<64x4xf32, #tpu.memory_space<vmem>>, vector<64x4xf32>
    %c0_23 = arith.constant 0 : index
    %c0_24 = arith.constant 0 : index
    %29 = vector.load %arg6[%c0_23, %c0_24] : memref<4x64xf32, #tpu.memory_space<vmem>>, vector<4x64xf32>
    %cst_25 = arith.constant dense<0.000000e+00> : vector<4x1xf32>
    %30 = tpu.matmul %29, %27, %cst_25 {dimension_numbers = #tpu.dot_dimension_numbers<[1], [0], [0], [1], [0, 0, 1, 1], [], []>} : vector<4x64xf32>, vector<64x1xf32>, vector<4x1xf32> -> vector<4x1xf32>
    %cst_26 = arith.constant dense<0.000000e+00> : vector<64x1xf32>
    %31 = tpu.matmul %28, %30, %cst_26 {dimension_numbers = #tpu.dot_dimension_numbers<[1], [0], [0], [1], [0, 0, 1, 1], [], []>} : vector<64x4xf32>, vector<4x1xf32>, vector<64x1xf32> -> vector<64x1xf32>
    %cst_27 = arith.constant 9.99999974E-6 : f32
    %32 = vector.broadcast %cst_27 : f32 to vector<64x1xf32>
    %33 = arith.addf %31, %32 : vector<64x1xf32>
    %34 = math.rsqrt %33 : vector<64x1xf32>
    %35 = arith.mulf %34, %17 : vector<64x1xf32>
    %36 = vector.broadcast %35 : vector<64x1xf32> to vector<64x16xf32>
    %37 = arith.mulf %25, %36 : vector<64x16xf32>
    %38 = vector.broadcast %18 : vector<64x1xf32> to vector<64x16xf32>
    %39 = arith.addf %37, %38 : vector<64x16xf32>
    %cst_28 = arith.constant 0.000000e+00 : f32
    %40 = vector.broadcast %cst_28 : f32 to vector<64x16xf32>
    %41 = arith.maximumf %39, %40 : vector<64x16xf32>
    %42 = vector.extract_strided_slice %9 {offsets = [0, 3], sizes = [128, 1], strides = [1, 1]} : vector<128x16xf32> to vector<128x1xf32>
    %c0_29 = arith.constant 0 : index
    %c0_30 = arith.constant 0 : index
    %43 = vector.load %arg11[%c0_29, %c0_30] : memref<128x64xbf16, #tpu.memory_space<vmem>>, vector<128x64xbf16>
    %44 = arith.truncf %41 : vector<64x16xf32> to vector<64x16xbf16>
    %cst_31 = arith.constant dense<0.000000e+00> : vector<128x16xf32>
    %45 = tpu.matmul %43, %44, %cst_31 {dimension_numbers = #tpu.dot_dimension_numbers<[1], [0], [0], [1], [0, 0, 1, 1], [], []>} : vector<128x64xbf16>, vector<64x16xbf16>, vector<128x16xf32> -> vector<128x16xf32>
    %46 = vector.broadcast %42 : vector<128x1xf32> to vector<128x16xf32>
    %47 = arith.addf %45, %46 : vector<128x16xf32>
    %48 = vector.extract_strided_slice %9 {offsets = [0, 4], sizes = [128, 1], strides = [1, 1]} : vector<128x16xf32> to vector<128x1xf32>
    %49 = vector.extract_strided_slice %9 {offsets = [0, 5], sizes = [128, 1], strides = [1, 1]} : vector<128x16xf32> to vector<128x1xf32>
    %cst_32 = arith.constant dense<0.000000e+00> : vector<128x1xf32>
    %50 = tpu.matmul %47, %10, %cst_32 {dimension_numbers = #tpu.dot_dimension_numbers<[1], [0], [0], [1], [0, 0, 1, 1], [], []>} : vector<128x16xf32>, vector<16x1xf32>, vector<128x1xf32> -> vector<128x1xf32>
    %c0_33 = arith.constant 0 : index
    %c0_34 = arith.constant 0 : index
    %51 = vector.load %arg9[%c0_33, %c0_34] : memref<128x4xf32, #tpu.memory_space<vmem>>, vector<128x4xf32>
    %c0_35 = arith.constant 0 : index
    %c0_36 = arith.constant 0 : index
    %52 = vector.load %arg8[%c0_35, %c0_36] : memref<4x128xf32, #tpu.memory_space<vmem>>, vector<4x128xf32>
    %cst_37 = arith.constant dense<0.000000e+00> : vector<4x1xf32>
    %53 = tpu.matmul %52, %50, %cst_37 {dimension_numbers = #tpu.dot_dimension_numbers<[1], [0], [0], [1], [0, 0, 1, 1], [], []>} : vector<4x128xf32>, vector<128x1xf32>, vector<4x1xf32> -> vector<4x1xf32>
    %cst_38 = arith.constant dense<0.000000e+00> : vector<128x1xf32>
    %54 = tpu.matmul %51, %53, %cst_38 {dimension_numbers = #tpu.dot_dimension_numbers<[1], [0], [0], [1], [0, 0, 1, 1], [], []>} : vector<128x4xf32>, vector<4x1xf32>, vector<128x1xf32> -> vector<128x1xf32>
    %55 = vector.broadcast %54 : vector<128x1xf32> to vector<128x16xf32>
    %56 = arith.subf %47, %55 : vector<128x16xf32>
    %57 = arith.mulf %56, %56 : vector<128x16xf32>
    %cst_39 = arith.constant dense<0.000000e+00> : vector<128x1xf32>
    %58 = tpu.matmul %57, %10, %cst_39 {dimension_numbers = #tpu.dot_dimension_numbers<[1], [0], [0], [1], [0, 0, 1, 1], [], []>} : vector<128x16xf32>, vector<16x1xf32>, vector<128x1xf32> -> vector<128x1xf32>
    %c0_40 = arith.constant 0 : index
    %c0_41 = arith.constant 0 : index
    %59 = vector.load %arg9[%c0_40, %c0_41] : memref<128x4xf32, #tpu.memory_space<vmem>>, vector<128x4xf32>
    %c0_42 = arith.constant 0 : index
    %c0_43 = arith.constant 0 : index
    %60 = vector.load %arg8[%c0_42, %c0_43] : memref<4x128xf32, #tpu.memory_space<vmem>>, vector<4x128xf32>
    %cst_44 = arith.constant dense<0.000000e+00> : vector<4x1xf32>
    %61 = tpu.matmul %60, %58, %cst_44 {dimension_numbers = #tpu.dot_dimension_numbers<[1], [0], [0], [1], [0, 0, 1, 1], [], []>} : vector<4x128xf32>, vector<128x1xf32>, vector<4x1xf32> -> vector<4x1xf32>
    %cst_45 = arith.constant dense<0.000000e+00> : vector<128x1xf32>
    %62 = tpu.matmul %59, %61, %cst_45 {dimension_numbers = #tpu.dot_dimension_numbers<[1], [0], [0], [1], [0, 0, 1, 1], [], []>} : vector<128x4xf32>, vector<4x1xf32>, vector<128x1xf32> -> vector<128x1xf32>
    %cst_46 = arith.constant 9.99999974E-6 : f32
    %63 = vector.broadcast %cst_46 : f32 to vector<128x1xf32>
    %64 = arith.addf %62, %63 : vector<128x1xf32>
    %65 = math.rsqrt %64 : vector<128x1xf32>
    %66 = arith.mulf %65, %48 : vector<128x1xf32>
    %67 = vector.broadcast %66 : vector<128x1xf32> to vector<128x16xf32>
    %68 = arith.mulf %56, %67 : vector<128x16xf32>
    %69 = vector.broadcast %49 : vector<128x1xf32> to vector<128x16xf32>
    %70 = arith.addf %68, %69 : vector<128x16xf32>
    %cst_47 = arith.constant 0.000000e+00 : f32
    %71 = vector.broadcast %cst_47 : f32 to vector<128x16xf32>
    %72 = arith.maximumf %70, %71 : vector<128x16xf32>
    %73 = vector.extract_strided_slice %9 {offsets = [0, 6], sizes = [128, 1], strides = [1, 1]} : vector<128x16xf32> to vector<128x1xf32>
    %c0_48 = arith.constant 0 : index
    %c0_49 = arith.constant 0 : index
    %74 = vector.load %arg12[%c0_48, %c0_49] : memref<128x128xbf16, #tpu.memory_space<vmem>>, vector<128x128xbf16>
    %75 = arith.truncf %72 : vector<128x16xf32> to vector<128x16xbf16>
    %cst_50 = arith.constant dense<0.000000e+00> : vector<128x16xf32>
    %76 = tpu.matmul %74, %75, %cst_50 {dimension_numbers = #tpu.dot_dimension_numbers<[1], [0], [0], [1], [0, 0, 1, 1], [], []>} : vector<128x128xbf16>, vector<128x16xbf16>, vector<128x16xf32> -> vector<128x16xf32>
    %77 = vector.broadcast %73 : vector<128x1xf32> to vector<128x16xf32>
    %78 = arith.addf %76, %77 : vector<128x16xf32>
    %79 = arith.addf %8, %78 : vector<128x16xf32>
    %cst_51 = arith.constant dense<0.000000e+00> : vector<128x1xf32>
    %80 = tpu.matmul %79, %10, %cst_51 {dimension_numbers = #tpu.dot_dimension_numbers<[1], [0], [0], [1], [0, 0, 1, 1], [], []>} : vector<128x16xf32>, vector<16x1xf32>, vector<128x1xf32> -> vector<128x1xf32>
    %cst_52 = arith.constant 6.250000e-02 : f32
    %81 = vector.broadcast %cst_52 : f32 to vector<128x1xf32>
    %82 = arith.mulf %80, %81 : vector<128x1xf32>
    %c0_53 = arith.constant 0 : index
    %c0_54 = arith.constant 0 : index
    %83 = vector.load %arg19[%c0_53, %c0_54] : memref<128x2xf32, #tpu.memory_space<vmem>>, vector<128x1xf32>
    tpu.vector_store %arg19[%c0_53, %c0_54], %82 {strides = array<i32>} : memref<128x2xf32, #tpu.memory_space<vmem>>, vector<128x1xf32>,
    %cst_55 = arith.constant dense<0xFF800000> : vector<128xf32>
    %84 = vector.multi_reduction <maximumf>, %79, %cst_55 [1] : vector<128x16xf32> to vector<128xf32>
    %85 = vector.shape_cast %84 : vector<128xf32> to vector<128x1xf32>
    %c0_56 = arith.constant 0 : index
    %c1 = arith.constant 1 : index
    %86 = vector.load %arg19[%c0_56, %c1] : memref<128x2xf32, #tpu.memory_space<vmem>>, vector<128x1xf32>
    tpu.vector_store %arg19[%c0_56, %c1], %85 {strides = array<i32>} : memref<128x2xf32, #tpu.memory_space<vmem>>, vector<128x1xf32>,
    %c0_57 = arith.constant 0 : index
    %c0_58 = arith.constant 0 : index
    %87 = vector.load %arg19[%c0_57, %c0_58] : memref<128x2xf32, #tpu.memory_space<vmem>>, vector<128x2xf32>
    %c0_59 = arith.constant 0 : index
    %c0_60 = arith.constant 0 : index
    %88 = vector.load %arg13[%c0_59, %c0_60] : memref<8x128xf32, #tpu.memory_space<vmem>>, vector<8x128xf32>
    %cst_61 = arith.constant dense<0.000000e+00> : vector<8x2xf32>
    %89 = tpu.matmul %88, %87, %cst_61 {dimension_numbers = #tpu.dot_dimension_numbers<[1], [0], [0], [1], [0, 0, 1, 1], [], []>} : vector<8x128xf32>, vector<128x2xf32>, vector<8x2xf32> -> vector<8x2xf32>
    %90 = vector.extract_strided_slice %9 {offsets = [0, 7], sizes = [8, 1], strides = [1, 1]} : vector<128x16xf32> to vector<8x1xf32>
    %91 = vector.broadcast %90 : vector<8x1xf32> to vector<8x2xf32>
    %92 = arith.addf %89, %91 : vector<8x2xf32>
    %cst_62 = arith.constant 0.000000e+00 : f32
    %93 = vector.broadcast %cst_62 : f32 to vector<8x2xf32>
    %94 = arith.maximumf %92, %93 : vector<8x2xf32>
    %c0_63 = arith.constant 0 : index
    %c0_64 = arith.constant 0 : index
    %95 = vector.load %arg14[%c0_63, %c0_64] : memref<128x8xf32, #tpu.memory_space<vmem>>, vector<128x8xf32>
    %cst_65 = arith.constant dense<0.000000e+00> : vector<128x2xf32>
    %96 = tpu.matmul %95, %94, %cst_65 {dimension_numbers = #tpu.dot_dimension_numbers<[1], [0], [0], [1], [0, 0, 1, 1], [], []>} : vector<128x8xf32>, vector<8x2xf32>, vector<128x2xf32> -> vector<128x2xf32>
    %97 = vector.extract_strided_slice %9 {offsets = [0, 8], sizes = [128, 1], strides = [1, 1]} : vector<128x16xf32> to vector<128x1xf32>
    %98 = vector.broadcast %97 : vector<128x1xf32> to vector<128x2xf32>
    %99 = arith.addf %96, %98 : vector<128x2xf32>
    %100 = vector.extract_strided_slice %99 {offsets = [0, 0], sizes = [128, 1], strides = [1, 1]} : vector<128x2xf32> to vector<128x1xf32>
    %101 = vector.extract_strided_slice %99 {offsets = [0, 1], sizes = [128, 1], strides = [1, 1]} : vector<128x2xf32> to vector<128x1xf32>
    %102 = arith.addf %100, %101 : vector<128x1xf32>
    %103 = arith.negf %102 : vector<128x1xf32>
    %104 = math.exp %103 : vector<128x1xf32>
    %cst_66 = arith.constant 1.000000e+00 : f32
    %105 = vector.broadcast %cst_66 : f32 to vector<128x1xf32>
    %106 = arith.addf %105, %104 : vector<128x1xf32>
    %107 = arith.divf %105, %106 : vector<128x1xf32>
    %108 = vector.broadcast %107 : vector<128x1xf32> to vector<128x16xf32>
    %109 = arith.mulf %79, %108 : vector<128x16xf32>
    %cst_67 = arith.constant 7.812500e-03 : f32
    %110 = vector.broadcast %cst_67 : f32 to vector<1x128xf32>
    %cst_68 = arith.constant dense<0.000000e+00> : vector<1x16xf32>
    %111 = tpu.matmul %110, %109, %cst_68 {dimension_numbers = #tpu.dot_dimension_numbers<[1], [0], [0], [1], [0, 0, 1, 1], [], []>} : vector<1x128xf32>, vector<128x16xf32>, vector<1x16xf32> -> vector<1x16xf32>
    %cst_69 = arith.constant dense<0xFF800000> : vector<16xf32>
    %112 = vector.multi_reduction <maximumf>, %109, %cst_69 [0] : vector<128x16xf32> to vector<16xf32>
    %113 = vector.shape_cast %112 : vector<16xf32> to vector<1x16xf32>
    %c0_70 = arith.constant 0 : index
    %114 = memref.load %arg1[%c0_70] : memref<3xf32, #tpu.memory_space<smem>>
    %115 = vector.broadcast %114 : f32 to vector<1x16xf32>
    %116 = arith.mulf %111, %115 : vector<1x16xf32>
    %c1_71 = arith.constant 1 : index
    %117 = memref.load %arg1[%c1_71] : memref<3xf32, #tpu.memory_space<smem>>
    %118 = vector.broadcast %117 : f32 to vector<1x16xf32>
    %119 = arith.mulf %113, %118 : vector<1x16xf32>
    %120 = arith.addf %116, %119 : vector<1x16xf32>
    %c2 = arith.constant 2 : index
    %121 = memref.load %arg1[%c2] : memref<3xf32, #tpu.memory_space<smem>>
    %122 = vector.broadcast %121 : f32 to vector<1x16xf32>
    %123 = arith.addf %120, %122 : vector<1x16xf32>
    %124 = arith.negf %123 : vector<1x16xf32>
    %125 = math.exp %124 : vector<1x16xf32>
    %cst_72 = arith.constant 1.000000e+00 : f32
    %126 = vector.broadcast %cst_72 : f32 to vector<1x16xf32>
    %127 = arith.addf %126, %125 : vector<1x16xf32>
    %128 = arith.divf %126, %127 : vector<1x16xf32>
    %129 = vector.broadcast %128 : vector<1x16xf32> to vector<128x16xf32>
    %130 = arith.mulf %109, %129 : vector<128x16xf32>
    %131 = vector.extract_strided_slice %9 {offsets = [0, 9], sizes = [64, 1], strides = [1, 1]} : vector<128x16xf32> to vector<64x1xf32>
    %c0_73 = arith.constant 0 : index
    %c0_74 = arith.constant 0 : index
    %132 = vector.load %arg15[%c0_73, %c0_74] : memref<64x128xbf16, #tpu.memory_space<vmem>>, vector<64x128xbf16>
    %133 = arith.truncf %130 : vector<128x16xf32> to vector<128x16xbf16>
    %cst_75 = arith.constant dense<0.000000e+00> : vector<64x16xf32>
    %134 = tpu.matmul %132, %133, %cst_75 {dimension_numbers = #tpu.dot_dimension_numbers<[1], [0], [0], [1], [0, 0, 1, 1], [], []>} : vector<64x128xbf16>, vector<128x16xbf16>, vector<64x16xf32> -> vector<64x16xf32>
    %135 = vector.broadcast %131 : vector<64x1xf32> to vector<64x16xf32>
    %136 = arith.addf %134, %135 : vector<64x16xf32>
    %137 = vector.extract_strided_slice %9 {offsets = [0, 10], sizes = [64, 1], strides = [1, 1]} : vector<128x16xf32> to vector<64x1xf32>
    %138 = vector.extract_strided_slice %9 {offsets = [0, 11], sizes = [64, 1], strides = [1, 1]} : vector<128x16xf32> to vector<64x1xf32>
    %cst_76 = arith.constant dense<0.000000e+00> : vector<64x1xf32>
    %139 = tpu.matmul %136, %10, %cst_76 {dimension_numbers = #tpu.dot_dimension_numbers<[1], [0], [0], [1], [0, 0, 1, 1], [], []>} : vector<64x16xf32>, vector<16x1xf32>, vector<64x1xf32> -> vector<64x1xf32>
    %c0_77 = arith.constant 0 : index
    %c0_78 = arith.constant 0 : index
    %140 = vector.load %arg7[%c0_77, %c0_78] : memref<64x4xf32, #tpu.memory_space<vmem>>, vector<64x4xf32>
    %c0_79 = arith.constant 0 : index
    %c0_80 = arith.constant 0 : index
    %141 = vector.load %arg6[%c0_79, %c0_80] : memref<4x64xf32, #tpu.memory_space<vmem>>, vector<4x64xf32>
    %cst_81 = arith.constant dense<0.000000e+00> : vector<4x1xf32>
    %142 = tpu.matmul %141, %139, %cst_81 {dimension_numbers = #tpu.dot_dimension_numbers<[1], [0], [0], [1], [0, 0, 1, 1], [], []>} : vector<4x64xf32>, vector<64x1xf32>, vector<4x1xf32> -> vector<4x1xf32>
    %cst_82 = arith.constant dense<0.000000e+00> : vector<64x1xf32>
    %143 = tpu.matmul %140, %142, %cst_82 {dimension_numbers = #tpu.dot_dimension_numbers<[1], [0], [0], [1], [0, 0, 1, 1], [], []>} : vector<64x4xf32>, vector<4x1xf32>, vector<64x1xf32> -> vector<64x1xf32>
    %144 = vector.broadcast %143 : vector<64x1xf32> to vector<64x16xf32>
    %145 = arith.subf %136, %144 : vector<64x16xf32>
    %146 = arith.mulf %145, %145 : vector<64x16xf32>
    %cst_83 = arith.constant dense<0.000000e+00> : vector<64x1xf32>
    %147 = tpu.matmul %146, %10, %cst_83 {dimension_numbers = #tpu.dot_dimension_numbers<[1], [0], [0], [1], [0, 0, 1, 1], [], []>} : vector<64x16xf32>, vector<16x1xf32>, vector<64x1xf32> -> vector<64x1xf32>
    %c0_84 = arith.constant 0 : index
    %c0_85 = arith.constant 0 : index
    %148 = vector.load %arg7[%c0_84, %c0_85] : memref<64x4xf32, #tpu.memory_space<vmem>>, vector<64x4xf32>
    %c0_86 = arith.constant 0 : index
    %c0_87 = arith.constant 0 : index
    %149 = vector.load %arg6[%c0_86, %c0_87] : memref<4x64xf32, #tpu.memory_space<vmem>>, vector<4x64xf32>
    %cst_88 = arith.constant dense<0.000000e+00> : vector<4x1xf32>
    %150 = tpu.matmul %149, %147, %cst_88 {dimension_numbers = #tpu.dot_dimension_numbers<[1], [0], [0], [1], [0, 0, 1, 1], [], []>} : vector<4x64xf32>, vector<64x1xf32>, vector<4x1xf32> -> vector<4x1xf32>
    %cst_89 = arith.constant dense<0.000000e+00> : vector<64x1xf32>
    %151 = tpu.matmul %148, %150, %cst_89 {dimension_numbers = #tpu.dot_dimension_numbers<[1], [0], [0], [1], [0, 0, 1, 1], [], []>} : vector<64x4xf32>, vector<4x1xf32>, vector<64x1xf32> -> vector<64x1xf32>
    %cst_90 = arith.constant 9.99999974E-6 : f32
    %152 = vector.broadcast %cst_90 : f32 to vector<64x1xf32>
    %153 = arith.addf %151, %152 : vector<64x1xf32>
    %154 = math.rsqrt %153 : vector<64x1xf32>
    %155 = arith.mulf %154, %137 : vector<64x1xf32>
    %156 = vector.broadcast %155 : vector<64x1xf32> to vector<64x16xf32>
    %157 = arith.mulf %145, %156 : vector<64x16xf32>
    %158 = vector.broadcast %138 : vector<64x1xf32> to vector<64x16xf32>
    %159 = arith.addf %157, %158 : vector<64x16xf32>
    %cst_91 = arith.constant 0.000000e+00 : f32
    %160 = vector.broadcast %cst_91 : f32 to vector<64x16xf32>
    %161 = arith.maximumf %159, %160 : vector<64x16xf32>
    %162 = vector.extract_strided_slice %9 {offsets = [0, 12], sizes = [128, 1], strides = [1, 1]} : vector<128x16xf32> to vector<128x1xf32>
    %c0_92 = arith.constant 0 : index
    %c0_93 = arith.constant 0 : index
    %163 = vector.load %arg16[%c0_92, %c0_93] : memref<128x64xbf16, #tpu.memory_space<vmem>>, vector<128x64xbf16>
    %164 = arith.truncf %161 : vector<64x16xf32> to vector<64x16xbf16>
    %cst_94 = arith.constant dense<0.000000e+00> : vector<128x16xf32>
    %165 = tpu.matmul %163, %164, %cst_94 {dimension_numbers = #tpu.dot_dimension_numbers<[1], [0], [0], [1], [0, 0, 1, 1], [], []>} : vector<128x64xbf16>, vector<64x16xbf16>, vector<128x16xf32> -> vector<128x16xf32>
    %166 = vector.broadcast %162 : vector<128x1xf32> to vector<128x16xf32>
    %167 = arith.addf %165, %166 : vector<128x16xf32>
    %168 = vector.extract_strided_slice %9 {offsets = [0, 13], sizes = [128, 1], strides = [1, 1]} : vector<128x16xf32> to vector<128x1xf32>
    %169 = vector.extract_strided_slice %9 {offsets = [0, 14], sizes = [128, 1], strides = [1, 1]} : vector<128x16xf32> to vector<128x1xf32>
    %cst_95 = arith.constant dense<0.000000e+00> : vector<128x1xf32>
    %170 = tpu.matmul %167, %10, %cst_95 {dimension_numbers = #tpu.dot_dimension_numbers<[1], [0], [0], [1], [0, 0, 1, 1], [], []>} : vector<128x16xf32>, vector<16x1xf32>, vector<128x1xf32> -> vector<128x1xf32>
    %c0_96 = arith.constant 0 : index
    %c0_97 = arith.constant 0 : index
    %171 = vector.load %arg9[%c0_96, %c0_97] : memref<128x4xf32, #tpu.memory_space<vmem>>, vector<128x4xf32>
    %c0_98 = arith.constant 0 : index
    %c0_99 = arith.constant 0 : index
    %172 = vector.load %arg8[%c0_98, %c0_99] : memref<4x128xf32, #tpu.memory_space<vmem>>, vector<4x128xf32>
    %cst_100 = arith.constant dense<0.000000e+00> : vector<4x1xf32>
    %173 = tpu.matmul %172, %170, %cst_100 {dimension_numbers = #tpu.dot_dimension_numbers<[1], [0], [0], [1], [0, 0, 1, 1], [], []>} : vector<4x128xf32>, vector<128x1xf32>, vector<4x1xf32> -> vector<4x1xf32>
    %cst_101 = arith.constant dense<0.000000e+00> : vector<128x1xf32>
    %174 = tpu.matmul %171, %173, %cst_101 {dimension_numbers = #tpu.dot_dimension_numbers<[1], [0], [0], [1], [0, 0, 1, 1], [], []>} : vector<128x4xf32>, vector<4x1xf32>, vector<128x1xf32> -> vector<128x1xf32>
    %175 = vector.broadcast %174 : vector<128x1xf32> to vector<128x16xf32>
    %176 = arith.subf %167, %175 : vector<128x16xf32>
    %177 = arith.mulf %176, %176 : vector<128x16xf32>
    %cst_102 = arith.constant dense<0.000000e+00> : vector<128x1xf32>
    %178 = tpu.matmul %177, %10, %cst_102 {dimension_numbers = #tpu.dot_dimension_numbers<[1], [0], [0], [1], [0, 0, 1, 1], [], []>} : vector<128x16xf32>, vector<16x1xf32>, vector<128x1xf32> -> vector<128x1xf32>
    %c0_103 = arith.constant 0 : index
    %c0_104 = arith.constant 0 : index
    %179 = vector.load %arg9[%c0_103, %c0_104] : memref<128x4xf32, #tpu.memory_space<vmem>>, vector<128x4xf32>
    %c0_105 = arith.constant 0 : index
    %c0_106 = arith.constant 0 : index
    %180 = vector.load %arg8[%c0_105, %c0_106] : memref<4x128xf32, #tpu.memory_space<vmem>>, vector<4x128xf32>
    %cst_107 = arith.constant dense<0.000000e+00> : vector<4x1xf32>
    %181 = tpu.matmul %180, %178, %cst_107 {dimension_numbers = #tpu.dot_dimension_numbers<[1], [0], [0], [1], [0, 0, 1, 1], [], []>} : vector<4x128xf32>, vector<128x1xf32>, vector<4x1xf32> -> vector<4x1xf32>
    %cst_108 = arith.constant dense<0.000000e+00> : vector<128x1xf32>
    %182 = tpu.matmul %179, %181, %cst_108 {dimension_numbers = #tpu.dot_dimension_numbers<[1], [0], [0], [1], [0, 0, 1, 1], [], []>} : vector<128x4xf32>, vector<4x1xf32>, vector<128x1xf32> -> vector<128x1xf32>
    %cst_109 = arith.constant 9.99999974E-6 : f32
    %183 = vector.broadcast %cst_109 : f32 to vector<128x1xf32>
    %184 = arith.addf %182, %183 : vector<128x1xf32>
    %185 = math.rsqrt %184 : vector<128x1xf32>
    %186 = arith.mulf %185, %168 : vector<128x1xf32>
    %187 = vector.broadcast %186 : vector<128x1xf32> to vector<128x16xf32>
    %188 = arith.mulf %176, %187 : vector<128x16xf32>
    %189 = vector.broadcast %169 : vector<128x1xf32> to vector<128x16xf32>
    %190 = arith.addf %188, %189 : vector<128x16xf32>
    %cst_110 = arith.constant 0.000000e+00 : f32
    %191 = vector.broadcast %cst_110 : f32 to vector<128x16xf32>
    %192 = arith.maximumf %190, %191 : vector<128x16xf32>
    %193 = vector.extract_strided_slice %9 {offsets = [0, 15], sizes = [4, 1], strides = [1, 1]} : vector<128x16xf32> to vector<4x1xf32>
    %c0_111 = arith.constant 0 : index
    %c0_112 = arith.constant 0 : index
    %194 = vector.load %arg17[%c0_111, %c0_112] : memref<4x128xbf16, #tpu.memory_space<vmem>>, vector<4x128xbf16>
    %195 = arith.truncf %192 : vector<128x16xf32> to vector<128x16xbf16>
    %cst_113 = arith.constant dense<0.000000e+00> : vector<4x16xf32>
    %196 = tpu.matmul %194, %195, %cst_113 {dimension_numbers = #tpu.dot_dimension_numbers<[1], [0], [0], [1], [0, 0, 1, 1], [], []>} : vector<4x128xbf16>, vector<128x16xbf16>, vector<4x16xf32> -> vector<4x16xf32>
    %197 = vector.broadcast %193 : vector<4x1xf32> to vector<4x16xf32>
    %198 = arith.addf %196, %197 : vector<4x16xf32>
    %199 = arith.addf %198, %1 : vector<4x16xf32>
    %c0_114 = arith.constant 0 : index
    %c0_115 = arith.constant 0 : index
    %c0_116 = arith.constant 0 : index
    %200 = vector.load %arg18[%c0_114, %c0_115, %c0_116] : memref<1x4x16xf32, #tpu.memory_space<vmem>>, vector<1x4x16xf32>
    %201 = vector.shape_cast %200 : vector<1x4x16xf32> to vector<4x16xf32>
    %202 = vector.shape_cast %199 : vector<4x16xf32> to vector<1x4x16xf32>
    tpu.vector_store %arg18[%c0_114, %c0_115, %c0_116], %202 {strides = array<i32>} : memref<1x4x16xf32, #tpu.memory_space<vmem>>, vector<1x4x16xf32>,
    return
  }
  func.func @transform_0(%arg0: i32) -> i32 {
    %c0_i32 = arith.constant 0 : i32
    %c0_i32_0 = arith.constant 0 : i32
    return %c0_i32 : i32
  }
  func.func @transform_1(%arg0: i32) -> (i32, i32, i32) {
    %c0_i32 = arith.constant 0 : i32
    %c0_i32_0 = arith.constant 0 : i32
    %c0_i32_1 = arith.constant 0 : i32
    return %arg0, %c0_i32, %c0_i32_0 : i32, i32, i32
  }
  func.func @transform_2(%arg0: i32) -> (i32, i32, i32) {
    %c0_i32 = arith.constant 0 : i32
    %c0_i32_0 = arith.constant 0 : i32
    %c0_i32_1 = arith.constant 0 : i32
    return %arg0, %c0_i32, %c0_i32_0 : i32, i32, i32
  }
  func.func @transform_3(%arg0: i32) -> (i32, i32, i32) {
    %c0_i32 = arith.constant 0 : i32
    %c0_i32_0 = arith.constant 0 : i32
    %c0_i32_1 = arith.constant 0 : i32
    return %arg0, %c0_i32, %c0_i32_0 : i32, i32, i32
  }
  func.func @transform_4(%arg0: i32) -> (i32, i32) {
    %c0_i32 = arith.constant 0 : i32
    %c0_i32_0 = arith.constant 0 : i32
    %c0_i32_1 = arith.constant 0 : i32
    return %c0_i32, %c0_i32_0 : i32, i32
  }
  func.func @transform_5(%arg0: i32) -> (i32, i32) {
    %c0_i32 = arith.constant 0 : i32
    %c0_i32_0 = arith.constant 0 : i32
    %c0_i32_1 = arith.constant 0 : i32
    return %c0_i32, %c0_i32_0 : i32, i32
  }
  func.func @transform_6(%arg0: i32) -> (i32, i32) {
    %c0_i32 = arith.constant 0 : i32
    %c0_i32_0 = arith.constant 0 : i32
    %c0_i32_1 = arith.constant 0 : i32
    return %c0_i32, %c0_i32_0 : i32, i32
  }
  func.func @transform_7(%arg0: i32) -> (i32, i32) {
    %c0_i32 = arith.constant 0 : i32
    %c0_i32_0 = arith.constant 0 : i32
    %c0_i32_1 = arith.constant 0 : i32
    return %c0_i32, %c0_i32_0 : i32, i32
  }
  func.func @transform_8(%arg0: i32) -> (i32, i32) {
    %c0_i32 = arith.constant 0 : i32
    %c0_i32_0 = arith.constant 0 : i32
    %c0_i32_1 = arith.constant 0 : i32
    return %c0_i32, %c0_i32_0 : i32, i32
  }
  func.func @transform_9(%arg0: i32) -> (i32, i32) {
    %c0_i32 = arith.constant 0 : i32
    %c0_i32_0 = arith.constant 0 : i32
    %c0_i32_1 = arith.constant 0 : i32
    return %c0_i32, %c0_i32_0 : i32, i32
  }
  func.func @transform_10(%arg0: i32) -> (i32, i32) {
    %c0_i32 = arith.constant 0 : i32
    %c0_i32_0 = arith.constant 0 : i32
    %c0_i32_1 = arith.constant 0 : i32
    return %c0_i32, %c0_i32_0 : i32, i32
  }
  func.func @transform_11(%arg0: i32) -> (i32, i32) {
    %c0_i32 = arith.constant 0 : i32
    %c0_i32_0 = arith.constant 0 : i32
    %c0_i32_1 = arith.constant 0 : i32
    return %c0_i32, %c0_i32_0 : i32, i32
  }
  func.func @transform_12(%arg0: i32) -> (i32, i32) {
    %c0_i32 = arith.constant 0 : i32
    %c0_i32_0 = arith.constant 0 : i32
    %c0_i32_1 = arith.constant 0 : i32
    return %c0_i32, %c0_i32_0 : i32, i32
  }
  func.func @transform_13(%arg0: i32) -> (i32, i32) {
    %c0_i32 = arith.constant 0 : i32
    %c0_i32_0 = arith.constant 0 : i32
    %c0_i32_1 = arith.constant 0 : i32
    return %c0_i32, %c0_i32_0 : i32, i32
  }
  func.func @transform_14(%arg0: i32) -> (i32, i32) {
    %c0_i32 = arith.constant 0 : i32
    %c0_i32_0 = arith.constant 0 : i32
    %c0_i32_1 = arith.constant 0 : i32
    return %c0_i32, %c0_i32_0 : i32, i32
  }
  func.func @transform_15(%arg0: i32) -> (i32, i32) {
    %c0_i32 = arith.constant 0 : i32
    %c0_i32_0 = arith.constant 0 : i32
    %c0_i32_1 = arith.constant 0 : i32
    return %c0_i32, %c0_i32_0 : i32, i32
  }
  func.func @transform_16(%arg0: i32) -> (i32, i32) {
    %c0_i32 = arith.constant 0 : i32
    %c0_i32_0 = arith.constant 0 : i32
    %c0_i32_1 = arith.constant 0 : i32
    return %c0_i32, %c0_i32_0 : i32, i32
  }
  func.func @transform_17(%arg0: i32) -> (i32, i32, i32) {
    %c0_i32 = arith.constant 0 : i32
    %c0_i32_0 = arith.constant 0 : i32
    %c0_i32_1 = arith.constant 0 : i32
    return %arg0, %c0_i32, %c0_i32_0 : i32, i32, i32
  }
}

</mosaic_0001>

<bundles_post_ra>
// kernel: tpu_custom_call.1
= control target key start
LH: loop header
LB: loop body
LE: loop exit
PB: predicated region body
PF: predicated region fallthrough
CT: control target
= control target key end

     0   :  { %s11979_s0 = inlined_call_operand.vmem [shape: f32[3], index: 0, kind: input, shape index: {}]   ;;  %s11980_s1 = inlined_call_operand.vmem [shape: f32[2,128,1], index: 1, kind: input, shape index: {}]   ;;  %s11981_s2 = inlined_call_operand.vmem [shape: f32[2,4,16], index: 2, kind: input, shape index: {}]   ;;  %s11982_s3 = inlined_call_operand.vmem [shape: bf16[2,128,16], index: 3, kind: input, shape index: {}]   ;;  %s11983_s4 = inlined_call_operand.vmem [shape: f32[128,16], index: 4, kind: input, shape index: {}]   ;;  %s11984_s5 = inlined_call_operand.vmem [shape: f32[4,64], index: 5, kind: input, shape index: {}]   ;;  %s11985_s6 = inlined_call_operand.vmem [shape: f32[64,4], index: 6, kind: input, shape index: {}]   ;;  %s11986_s7 = inlined_call_operand.vmem [shape: f32[4,128], index: 7, kind: input, shape index: {}]   ;;  %s11987_s8 = inlined_call_operand.vmem [shape: f32[128,4], index: 8, kind: input, shape index: {}]   ;;  %s11988_s9 = inlined_call_operand.vmem [shape: bf16[64,4], index: 9, kind: input, shape index: {}]   ;;  %s11989_s10 = inlined_call_operand.vmem [shape: bf16[128,64], index: 10, kind: input, shape index: {}]   ;;  %s11990_s11 = inlined_call_operand.vmem [shape: bf16[128,128], index: 11, kind: input, shape index: {}]   ;;  %s11991_s12 = inlined_call_operand.vmem [shape: f32[8,128], index: 12, kind: input, shape index: {}]   ;;  %s11992_s13 = inlined_call_operand.vmem [shape: f32[128,8], index: 13, kind: input, shape index: {}]   ;;  %s11993_s14 = inlined_call_operand.vmem [shape: bf16[64,128], index: 14, kind: input, shape index: {}]   ;;  %s11994_s15 = inlined_call_operand.vmem [shape: bf16[128,64], index: 15, kind: input, shape index: {}]   ;;  %s11995_s16 = inlined_call_operand.vmem [shape: bf16[4,128], index: 16, kind: input, shape index: {}]   ;;  %s11996_s17 = inlined_call_operand.hbm [shape: f32[2,4,16], index: 17, kind: output, shape index: {}]  }
   0x1   :  { %12006 = sst [smem:[#allocation14_spill]] %s11979_s0 }
   0x2   :  { %12007 = sst [smem:[#allocation15_spill]] %s11980_s1 }
   0x3   :  { %12008 = sst [smem:[#allocation16_spill]] %s11981_s2 }
   0x4   :  { %22 = vsyncpa [#allocation5], 0 }
   0x5   :  { %23 = vsyncpa [#allocation4], 0 }
   0x6   :  { %25 = vsyncpa [#allocation4 + $0x1], 0  ;;  %s9657_s24 = smov 0   ;;  %s9659_s25 = smov 0  }
   0x7   :  { %s9661_s26 = smov 0   ;;  %s9663_s27 = smov 0  }
   0x8 LB: > { %12009 = sst [smem:[#allocation9_spill]] %s9530_s24  ;;  %s9678_s28 = sadd.s32 4294967295, %s9542_s27   ;;  %s9542_s27 = sphi %s9663_s27, %s12024_s27   ;;  %s9538_s26 = sphi %s9661_s26, %s12026_s26   ;;  %s9534_s25 = sphi %s9659_s25, %s12028_s25   ;;  %s9530_s24 = sphi %s9657_s24, %s12027_s24  }
   0x9   : > { %12010 = sst [smem:[#allocation10_spill]] %s9538_s26  ;;  %s7261_s29 = sadd.s32 4294967294, %s9542_s27  }
   0xa   : > { %s9682_s0 = sadd.s32 1, %s9542_s27   ;;  %s410_s30 = sadd.s32 1, %s9538_s26 }
   0xb   : > { %12011 = sst [smem:[#allocation11_spill]] %s9682_s0  ;;  %s407_s18 = ssub.s32 %s9542_s27, %s9682_s0 }
   0xc   : > { %p420_p0 = scmp.ne.s32.totalorder %s9538_s26, %s9534_s25  ;;  %p408_p1 = scmp.eq.s32.totalorder %s407_s18, 0 }
   0xd   : > { %p421_p2 = scmp.eq.s32.totalorder %s9678_s28, 1  ;;  %p426_p3 = scmp.ne.s32.totalorder %s9534_s25, %s9530_s24 }
   0xe   : > { %p427_p4 = scmp.eq.s32.totalorder %s7261_s29, 1  ;;  %p7262_p7 = scmp.ge.s32.totalorder %s9542_s27, 1 }
   0xf   : > { %s9693_s19 = scalar_select %p408_p1, %s9538_s26, %s410_s30  }
  0x10   : > { %p9695_p5 = por %p421_p2, %p420_p0  ;;  %p9699_p6 = por %p427_p4, %p426_p3 }
  0x11   : > { %12012 = sst [smem:[#allocation12_spill]] %s9693_s19  ;;  %p434_p8 = scmp.lt.s32.totalorder %s9542_s27, 3 }
  0x12   : > { %s12014_s20 = scalar_select %p9699_p6, 1, 0 }
  0x13   : > { %p9115_p9 = scmp.eq.s32.totalorder %s9678_s28, 0  ;;  %p9706_p10 = pnand %p7262_p7, %p434_p8 }
  0x14   : > { %12015 = sst [smem:[#allocation13_spill]] %s12014_s20  ;;  %s12017_s29 = sld [smem:[#allocation14_spill]] }
  0x15   : > { %p9107_p11 = pneg %p9706_p10 }
  0x17   : > { %p9108_p12 = pnand %p9115_p9, %p9107_p11 }
  0x19   : > { %p9463_p0 = pneg %p9108_p12 }
  0x1a   : > { %s447_s30 = sshll.u32 %s12017_s29, 4  ;;  %s448_s30 = int_to_ptr.vmem [resolvable:$true] %s447_s30 }
  0x1b   : > { %s9461_s18 = scalar_lea.vmem %s448_s30, 16  ;;  %p9469_p3 = scmp.lt.s32.totalorder %s448_s30, %s448_s30 }
  0x1c   : > { %p9462_p13 = scmp.ne.s32.totalorder %s448_s30, %s9461_s18  ;;  %p9470_p4 = scmp.lt.s32.totalorder %s9461_s18, %s9461_s18 }
  0x1e   : > { %p9464_p1 = pnand %p9463_p0, %p9462_p13  ;;  %p9471_p7 = por %p9470_p4, %p9469_p3 }
  0x20   : > { %p9465_p2 = pneg %p9464_p1 }
  0x22   : > { %p9472_p8 = pnand %p9471_p7, %p9465_p2 }
  0x24   : > { %9475 = shalt.err (!%p9472_p8)
}
  0x25   : > { %s9544_s19 = smov [#allocation3]   ;;  %522 = sbr.rel (%p9706_p10) target bundleno = 9257 (0x2429), region = 88 }
  0x26   : > { %9110 = dma.vmem_to_smem (!%p9108_p12), %s448_s30, 16, %s9544_s19, [#allocation5]  }
  0x2c   : > { %9521 = dma.done.wait (%p9115_p9), [#allocation5], 16  }
  0x2d   : > { %9523 = vsyncadd (%p9115_p9), [#allocation5], 4294967280 }
  0x2e   : > { %528 = sfence }
  0x2f   : > { %p584_p11 = scmp.lt.s32.totalorder %s9678_s28, 1  ;;  %v9221_v0 = vld [vmem:[%s11988_s9] sm:$0xff]   ;;  %vm829_vm0 = vcmask 31744   ;;  %v12004_v1 = vmov 0   ;;  %v9742_v3 = vld [vmem:[%s11983_s4 + $0x10] sm:$0xff]  ;;  %s12018_s2 = sld [smem:[#allocation16_spill]] }
  0x30   : > { %8082 = vmatprep.mubr.msk.bf16.mxu0 %vm829_vm0, %v9221_v0  ;;  %9172 = vset.pattern.permute.xlu0 %v12004_v1  ;;  %v9736_v2 = vld [vmem:[%s11983_s4] sm:$0xff]  ;;  %vm842_vm1 = vcmask 1041408   ;;  %v9755_v5 = vld [vmem:[%s11983_s4 + $0x8] sm:$0xff]  ;;  %v9763_v8 = vld [vmem:[%s11983_s4 + $0x18] sm:$0xff]  ;;  %v9546_v16 = vmov 1.0|1.0  }
  0x31   : > { %s9728_s29 = scalar_select %p584_p11, %s9678_s28, 1  ;;  %9173 = vset.pattern.permute.xlu1 %v12004_v1  ;;  %771 = vperm.xlu0 %9172, %v9736_v2   ;;  %v9222_v7 = vld [vmem:[%s11988_s9 + $0x8] sm:$0xff]   ;;  %v9223_v9 = vld [vmem:[%s11988_s9 + $0x10] sm:$0xff]   ;;  %v9771_v10 = vld [vmem:[%s11983_s4 + $0x20] sm:$0xff]  ;;  %vm911_vm2 = vcmask 130048   ;;  %v9547_v41 = vmov 0.0|0.0  }
  0x32   : > { %781 = vperm.xlu1 %9173, %v9742_v3   ;;  %v9777_v12 = vld [vmem:[%s11983_s4 + $0x28] sm:$0xff]  ;;  %v9783_v13 = vld [vmem:[%s11983_s4 + $0x30] sm:$0xff]  ;;  %v9790_v14 = vld [vmem:[%s11983_s4 + $0x38] sm:$0xff]  ;;  %8890 = vmatprep.subr.bf16.mxu1 %v9546_v16  ;;  %vm9548_vm3 = vmmov 0   ;;  %v9549_v42 = vmov 0.0   ;;  %vm1050_vm4 = vcmask 523264  }
  0x33   : > { %s7270_s19 = sshll.u32 %s9728_s29, 2  ;;  %v9224_v15 = vld [vmem:[%s11988_s9 + $0x18] sm:$0xff]   ;;  %8891 = vmatpush3.bf16.msra.mxu1 %v9546_v16  ;;  %v9843_v55 = vld [vmem:[%s11984_s5] sm:$0xf]  ;;  %vm1148_vm5 = vcmask 1043456   ;;  %v9859_v58 = vld [vmem:[%s11985_s6 + $0x8] sm:$0xff] }
  0x34   : > { %v9852_v56 = vld [vmem:[%s11985_s6] sm:$0xff]  ;;  %v9865_v60 = vld [vmem:[%s11985_s6 + $0x10] sm:$0xff]  ;;  %v9876_v61 = vld [vmem:[%s11985_s6 + $0x18] sm:$0xff]  ;;  %s12002_s22 = smov 127   ;;  %s9553_s18 = smov 124   ;;  %vm3738_vm6 = vcmask 7168  }
  0x35   : > { %s9747_s0 = scalar_lea.vmem %s12018_s2, %s7270_s19  ;;  %776 = vperm.xlu0 %9172, %v9755_v5   ;;  %v9881_v62 = vld [vmem:[%s11985_s6 + $0x20] sm:$0xff]  ;;  %v9890_v63 = vld [vmem:[%s11985_s6 + $0x28] sm:$0xff]  ;;  %v9895_v0 = vld [vmem:[%s11985_s6 + $0x30] sm:$0xff]  ;;  %s12019_s2 = sld [smem:[#allocation15_spill]]  ;;  %vm3803_vm7 = vcmask 15368   ;;  %vm3992_vm8 = vcmask 64512  }
  0x36   : > { %v599_v4 = vld [vmem:[%s9747_s0] sm:$0xf]  ;;  %786 = vperm.xlu1 %9173, %v9763_v8   ;;  %s4565_s30 = sld [smem:[#allocation3]]  ;;  %s9560_s23 = smov 118   ;;  %vm7150_vm9 = vcmask 125952  }
  0x37   : > { %v768_v6 = vpack.c.bf16 %v599_v4, %v599_v4  ;;  %v9904_v4 = vld [vmem:[%s11985_s6 + $0x38] sm:$0xff]  ;;  %s581_s21 = sand.u32 1, %s9534_s25  }
  0x39   : > { %9100 = vmatprep.subr.msk.bf16.mxu0 %vm842_vm1, %v768_v6  ;;  %v844_v11 = vsel %vm842_vm1, %v768_v6, 0  ;;  %791 = vperm.xlu0 %9172, %v9771_v10  }
  0x3a   : > { %8081 = vmatpush3.bf16.msra.mxu0 %v844_v11  ;;  %796 = vperm.xlu1 %9173, %v9777_v12  }
  0x3b   : > { %8892 = vmatprep.subr.bf16.mxu0 %v9547_v41 }
  0x3d   : > { %8083 = vmatmul.mubr.msk.bf16.vlgmr.msra.gmra.mrb[0].mxu0 %vm829_vm0, %v9222_v7  ;;  %801 = vperm.xlu0 %9172, %v9783_v13  }
  0x3e   : > { %8086 = vmatprep.mubr.msk.bf16.mxu0 %vm829_vm0, %v9223_v9  ;;  %806 = vperm.xlu1 %9173, %v9790_v14  }
  0x45   : > { %8087 = vmatmul.mubr.msk.bf16.gmra.mrb[4].mxu0 %vm829_vm0, %v9224_v15 }
  0x46   : > { %8122 = vmatprep.mubr.msk.f32.mxu0 %vm9548_vm3, %v9549_v42 }
  0xb0   : > { %v772_v17 = vpop.permute.xlu0 %771 }
  0xb1   : > { %v782_v18 = vpop.permute.xlu1 %781 }
  0xb4   : > { %v777_v19 = vpop.permute.xlu0 %776 }
  0xb5   : > { %v787_v24 = vpop.permute.xlu1 %786 }
  0xb8   : > { %v792_v28 = vpop.permute.xlu0 %791 }
  0xb9   : > { %v797_v31 = vpop.permute.xlu1 %796 }
  0xbc   : > { %v802_v36 = vpop.permute.xlu0 %801 }
  0xbd   : > { %v807_v39 = vpop.permute.xlu1 %806 }
 0x110   : > { %v8084_v20 = vpop.f32.mrb[0].mxu0 }
 0x111   : > { %v880_v21 = vpop.f32.mrb[1].mxu0  ;;  %v9808_v27 = vadd.f32 %v8084_v20, %v782_v18 }
 0x112   : > { %v9802_v22 = vadd.f32 %v880_v21, %v772_v17  ;;  %v8085_v23 = vpop.f32.mrb[2].mxu0 }
 0x113   : > { %v883_v25 = vpop.f32.mrb[3].mxu0  ;;  %v9814_v29 = vadd.f32 %v8085_v23, %v787_v24 }
 0x114   : > { %v9804_v26 = vadd.f32 %v883_v25, %v777_v19  ;;  %8094 = vmatprep.mubr.msk.f32.mxu1 %vm911_vm2, %v9802_v22 }
 0x116   : > { %8095 = vmatmul.mubr.msk.f32.vlgmr.msra.gmra.mrb[0].mxu1 %vm911_vm2, %v9804_v26 }
 0x117   : > { %8097 = vmatprep.mubr.msk.f32.mxu1 %vm911_vm2, %v9808_v27 }
 0x118   : > { %v8088_v30 = vpop.f32.mrb[4].mxu0 }
 0x119   : > { %v896_v32 = vpop.f32.mrb[5].mxu0  ;;  %v9824_v38 = vadd.f32 %v8088_v30, %v802_v36 }
 0x11a   : > { %v9816_v33 = vadd.f32 %v896_v32, %v792_v28  ;;  %v8089_v34 = vpop.f32.mrb[6].mxu0  ;;  %8098 = vmatmul.mubr.msk.f32.gmra.mrb[2].mxu1 %vm911_vm2, %v9814_v29 }
 0x11b   : > { %v899_v35 = vpop.f32.mrb[7].mxu0  ;;  %v9830_v40 = vadd.f32 %v8089_v34, %v807_v39 }
 0x11c   : > { %v9820_v37 = vadd.f32 %v899_v35, %v797_v31  ;;  %8100 = vmatprep.mubr.msk.f32.mxu1 %vm911_vm2, %v9816_v33 }
 0x11e   : > { %8101 = vmatmul.mubr.msk.f32.gmra.mrb[4].mxu1 %vm911_vm2, %v9820_v37 }
 0x11f   : > { %8103 = vmatprep.mubr.msk.f32.mxu1 %vm911_vm2, %v9824_v38 }
 0x122   : > { %8104 = vmatmul.mubr.msk.f32.gmra.mrb[6].mxu1 %vm911_vm2, %v9830_v40 }
 0x123   : > { %8127 = vmatprep.mubr.msk.f32.mxu1 %vm829_vm0, %v9852_v56 }
 0x1e9   : > { %v8096_v43 = vpop.f32.mrb[0].mxu1 }
 0x1ea   : > { %v1002_v44 = vpop.f32.mrb[1].mxu1 }
 0x1eb   : > { %v8893_v45 = vpack.c.bf16 %v8096_v43, %v1002_v44 }
 0x1ed   : > { %v8099_v46 = vpop.f32.mrb[2].mxu1  ;;  %8894 = vmatpush3.bf16.msra.mxu0 %v8893_v45 }
 0x1ee   : > { %v1012_v47 = vpop.f32.mrb[3].mxu1  ;;  %8895 = vmatprep.subr.bf16.mxu0 %v9547_v41 }
 0x1ef   : > { %v8896_v48 = vpack.c.bf16 %v8099_v46, %v1012_v47 }
 0x1f1   : > { %v8102_v49 = vpop.f32.mrb[4].mxu1  ;;  %8897 = vmatpush3.bf16.msra.mxu0 %v8896_v48 }
 0x1f2   : > { %v1022_v50 = vpop.f32.mrb[5].mxu1  ;;  %8898 = vmatprep.subr.bf16.mxu0 %v9547_v41 }
 0x1f3   : > { %v8899_v51 = vpack.c.bf16 %v8102_v49, %v1022_v50 }
 0x1f5   : > { %v8105_v52 = vpop.f32.mrb[6].mxu1  ;;  %8900 = vmatpush3.bf16.msra.mxu0 %v8899_v51 }
 0x1f6   : > { %v1032_v53 = vpop.f32.mrb[7].mxu1  ;;  %8901 = vmatprep.subr.bf16.mxu0 %v9547_v41 }
 0x1f7   : > { %v8902_v54 = vpack.c.bf16 %v8105_v52, %v1032_v53 }
 0x1f9   : > { %8903 = vmatpush3.bf16.msra.mxu0 %v8902_v54 }
 0x1fa   : > { %8904 = vmatprep.subr.bf16.mxu0 %v9546_v16 }
 0x1fc   : > { %8123 = vmatmul.mubr.msk.f32.vlgmr.msra.gmra.mrb[8].mxu0 %vm1050_vm4, %v9843_v55 }
 0x1fd   : > { %8905 = vmatpush3.bf16.msra.mxu0 %v9546_v16 }
 0x2cf   : > { %v1120_v57 = vpop.f32.mrb[8].mxu0 }
 0x2d0   : > { %v8124_v59 = vpop.f32.mrb[9].mxu0  ;;  %8125 = vmatprep.subr.msk.mxu1 %vm1148_vm5, %v1120_v57 }
 0x2d1   : > { %8126 = vmatpush3.msk.msra.mxu1 %vm1148_vm5, %v1120_v57 }
 0x2d2   : > { %8128 = vmatmul.mubr.msk.f32.vlgmr.msra.gmra.mrb[8].mxu1 %vm829_vm0, %v9859_v58  ;;  %8906 = vmatprep.subr.bf16.mxu1 %v9547_v41 }
 0x2d3   : > { %8130 = vmatprep.mubr.msk.f32.mxu1 %vm829_vm0, %v9865_v60 }
 0x2d6   : > { %8131 = vmatmul.mubr.msk.f32.gmra.mrb[10].mxu1 %vm829_vm0, %v9876_v61 }
 0x2d7   : > { %8133 = vmatprep.mubr.msk.f32.mxu1 %vm829_vm0, %v9881_v62 }
 0x2da   : > { %8134 = vmatmul.mubr.msk.f32.gmra.mrb[12].mxu1 %vm829_vm0, %v9890_v63 }
 0x2db   : > { %8136 = vmatprep.mubr.msk.f32.mxu1 %vm829_vm0, %v9895_v0 }
 0x2de   : > { %8137 = vmatmul.mubr.msk.f32.gmra.mrb[14].mxu1 %vm829_vm0, %v9904_v4 }
 0x2df   : > { %8171 = vmatprep.mubr.msk.f32.mxu1 %vm9548_vm3, %v9549_v42 }
 0x3a5   : > { %v8129_v6 = vpop.f32.mrb[8].mxu1 }
 0x3a6   : > { %1264 = vperm.xlu1 %9173, %v8129_v6   ;;  %v1218_v7 = vpop.f32.mrb[9].mxu1  ;;  %v9551_v6 = vmov 2  }
 0x3a7   : > { %1259 = vperm.xlu0 %9172, %v1218_v7  }
 0x3a9   : > { %v8132_v9 = vpop.f32.mrb[10].mxu1 }
 0x3aa   : > { %1274 = vperm.xlu1 %9173, %v8132_v9   ;;  %v1228_v11 = vpop.f32.mrb[11].mxu1 }
 0x3ab   : > { %1269 = vperm.xlu0 %9172, %v1228_v11  }
 0x3ad   : > { %v8135_v15 = vpop.f32.mrb[12].mxu1 }
 0x3ae   : > { %1284 = vperm.xlu1 %9173, %v8135_v15   ;;  %v1238_v17 = vpop.f32.mrb[13].mxu1 }
 0x3af   : > { %1279 = vperm.xlu0 %9172, %v1238_v17  }
 0x3b1   : > { %v8138_v18 = vpop.f32.mrb[14].mxu1 }
 0x3b2   : > { %1294 = vperm.xlu1 %9173, %v8138_v18   ;;  %v1248_v19 = vpop.f32.mrb[15].mxu1 }
 0x3b3   : > { %1289 = vperm.xlu0 %9172, %v1248_v19  }
 0x3b6   : > { %1630 = vrot.lane.b32.xlu1 %v9755_v5, %s12002_s22 }
 0x3b7   : > { %1628 = vrot.lane.b32.xlu0 %v9736_v2, %s12002_s22  ;;  %9175 = vset.pattern.permute.xlu1 %v9551_v6 }
 0x3b8   : > { %9174 = vset.pattern.permute.xlu0 %v9551_v6 }
 0x3ba   : > { %1634 = vrot.lane.b32.xlu1 %v9763_v8, %s12002_s22 }
 0x3bb   : > { %1632 = vrot.lane.b32.xlu0 %v9742_v3, %s12002_s22 }
 0x3be   : > { %1638 = vrot.lane.b32.xlu1 %v9777_v12, %s12002_s22 }
 0x3bf   : > { %1636 = vrot.lane.b32.xlu0 %v9771_v10, %s12002_s22 }
 0x3c2   : > { %1642 = vrot.lane.b32.xlu1 %v9790_v14, %s12002_s22 }
 0x3c3   : > { %1640 = vrot.lane.b32.xlu0 %v9783_v13, %s12002_s22  ;;  %s7585_s22 = sshll.u32 %s9728_s29, 6 }
 0x3c6   : > { %1713 = vperm.xlu1 %9175, %v9755_v5  }
 0x3c7   : > { %1709 = vperm.xlu0 %9174, %v9736_v2  }
 0x3ca   : > { %1717 = vperm.xlu1 %9175, %v9742_v3  }
 0x3cb   : > { %1725 = vperm.xlu0 %9174, %v9771_v10  }
 0x3ce   : > { %1721 = vperm.xlu1 %9175, %v9763_v8  }
 0x3cf   : > { %9177 = vset.pattern.permute.xlu0 %v12004_v1 }
 0x3d2   : > { %1729 = vperm.xlu1 %9175, %v9777_v12  }
 0x3d6   : > { %9176 = vset.pattern.permute.xlu1 %v12004_v1 }
 0x425   : > { %v1265_v20 = vpop.permute.xlu1 %1264 }
 0x426   : > { %v9911_v21 = vsub.f32 %v9804_v26, %v1265_v20  ;;  %v1260_v23 = vpop.permute.xlu0 %1259 }
 0x427   : > { %v9914_v24 = vsub.f32 %v9802_v22, %v1260_v23 }
 0x428   : > { %v1306_v30 = vmul.f32 %v9911_v21, %v9911_v21 }
 0x429   : > { %v1305_v25 = vmul.f32 %v9914_v24, %v9914_v24  ;;  %v1275_v28 = vpop.permute.xlu1 %1274 }
 0x42a   : > { %v9921_v31 = vsub.f32 %v9814_v29, %v1275_v28  ;;  %v1270_v32 = vpop.permute.xlu0 %1269 }
 0x42b   : > { %v9924_v34 = vsub.f32 %v9808_v27, %v1270_v32  ;;  %8143 = vmatprep.mubr.msk.f32.mxu0 %vm911_vm2, %v1305_v25 }
 0x42c   : > { %8144 = vmatmul.mubr.msk.f32.vlgmr.msra.gmra.mrb[10].mxu0 %vm911_vm2, %v1306_v30  ;;  %v1308_v35 = vmul.f32 %v9921_v31, %v9921_v31 }
 0x42d   : > { %v1307_v22 = vmul.f32 %v9924_v34, %v9924_v34  ;;  %v1285_v26 = vpop.permute.xlu1 %1284 }
 0x42e   : > { %v9933_v36 = vsub.f32 %v9820_v37, %v1285_v26  ;;  %v1280_v29 = vpop.permute.xlu0 %1279 }
 0x42f   : > { %v9936_v39 = vsub.f32 %v9816_v33, %v1280_v29  ;;  %8146 = vmatprep.mubr.msk.f32.mxu0 %vm911_vm2, %v1307_v22 }
 0x430   : > { %8147 = vmatmul.mubr.msk.f32.gmra.mrb[12].mxu0 %vm911_vm2, %v1308_v35  ;;  %v1310_v44 = vmul.f32 %v9933_v36, %v9933_v36 }
 0x431   : > { %v1309_v27 = vmul.f32 %v9936_v39, %v9936_v39  ;;  %v1295_v43 = vpop.permute.xlu1 %1294 }
 0x432   : > { %v9945_v45 = vsub.f32 %v9830_v40, %v1295_v43  ;;  %v1290_v37 = vpop.permute.xlu0 %1289 }
 0x433   : > { %v9948_v46 = vsub.f32 %v9824_v38, %v1290_v37  ;;  %8149 = vmatprep.mubr.msk.f32.mxu0 %vm911_vm2, %v1309_v27 }
 0x434   : > { %8150 = vmatmul.mubr.msk.f32.gmra.mrb[14].mxu0 %vm911_vm2, %v1310_v44  ;;  %v1312_v47 = vmul.f32 %v9945_v45, %v9945_v45 }
 0x435   : > { %v1311_v33 = vmul.f32 %v9948_v46, %v9948_v46  ;;  %v1631_v18 = vpop.permute.xlu1 %1630 }
 0x436   : > { %v1629_v19 = vpop.permute.xlu0 %1628 }
 0x437   : > { %8152 = vmatprep.mubr.msk.f32.mxu0 %vm911_vm2, %v1311_v33 }
 0x438   : > { %8153 = vmatmul.mubr.msk.f32.gmra.mrb[16].mxu0 %vm911_vm2, %v1312_v47 }
 0x439   : > { %8176 = vmatprep.mubr.msk.f32.mxu0 %vm829_vm0, %v9852_v56 }
 0x43a   : > { %v1633_v35 = vpop.permute.xlu0 %1632 }
 0x4ff   : > { %v8145_v40 = vpop.f32.mrb[10].mxu0 }
 0x500   : > { %v1403_v38 = vpop.f32.mrb[11].mxu0 }
 0x501   : > { %v8907_v48 = vpack.c.bf16 %v8145_v40, %v1403_v38  ;;  %v1637_v40 = vpop.permute.xlu0 %1636 }
 0x503   : > { %v8148_v49 = vpop.f32.mrb[12].mxu0  ;;  %8908 = vmatpush3.bf16.msra.mxu1 %v8907_v48 }
 0x504   : > { %v1413_v50 = vpop.f32.mrb[13].mxu0  ;;  %8909 = vmatprep.subr.bf16.mxu1 %v9547_v41 }
 0x505   : > { %v8910_v51 = vpack.c.bf16 %v8148_v49, %v1413_v50 }
 0x507   : > { %v8151_v52 = vpop.f32.mrb[14].mxu0  ;;  %8911 = vmatpush3.bf16.msra.mxu1 %v8910_v51 }
 0x508   : > { %v1423_v53 = vpop.f32.mrb[15].mxu0  ;;  %8912 = vmatprep.subr.bf16.mxu1 %v9547_v41 }
 0x509   : > { %v8913_v54 = vpack.c.bf16 %v8151_v52, %v1423_v53 }
 0x50b   : > { %v8154_v57 = vpop.f32.mrb[16].mxu0  ;;  %8914 = vmatpush3.bf16.msra.mxu1 %v8913_v54 }
 0x50c   : > { %v1433_v59 = vpop.f32.mrb[17].mxu0  ;;  %8915 = vmatprep.subr.bf16.mxu1 %v9547_v41 }
 0x50d   : > { %v8916_v56 = vpack.c.bf16 %v8154_v57, %v1433_v59  ;;  %v1641_v57 = vpop.permute.xlu0 %1640 }
 0x50f   : > { %8917 = vmatpush3.bf16.msra.mxu1 %v8916_v56  ;;  %v9225_v56 = vld [vmem:[%s11989_s10] sm:$0xff]  }
 0x512   : > { %8172 = vmatmul.mubr.msk.f32.vlgmr.msra.gmra.mrb[16].mxu1 %vm1050_vm4, %v9843_v55 }
 0x513   : > { %8196 = vmatprep.mubr.msk.bf16.mxu1 %vm1050_vm4, %v9225_v56  ;;  %v9232_v56 = vld [vmem:[%s11989_s10 + $0x38] sm:$0xff]  }
 0x5e5   : > { %v1508_v55 = vpop.f32.mrb[16].mxu1 }
 0x5e6   : > { %v8173_v7 = vpop.f32.mrb[17].mxu1  ;;  %8174 = vmatprep.subr.msk.mxu0 %vm1148_vm5, %v1508_v55 }
 0x5e7   : > { %8175 = vmatpush3.msk.msra.mxu0 %vm1148_vm5, %v1508_v55  ;;  %v9552_v55 = vmov 3  }
 0x5e8   : > { %8177 = vmatmul.mubr.msk.f32.vlgmr.msra.gmra.mrb[18].mxu0 %vm829_vm0, %v9859_v58  ;;  %8918 = vmatprep.subr.bf16.mxu0 %v9546_v16 }
 0x5e9   : > { %8179 = vmatprep.mubr.msk.f32.mxu0 %vm829_vm0, %v9865_v60  ;;  %8919 = vmatpush3.bf16.msra.mxu0 %v9546_v16 }
 0x5ec   : > { %8180 = vmatmul.mubr.msk.f32.gmra.mrb[20].mxu0 %vm829_vm0, %v9876_v61 }
 0x5ed   : > { %8182 = vmatprep.mubr.msk.f32.mxu0 %vm829_vm0, %v9881_v62 }
 0x5f0   : > { %8183 = vmatmul.mubr.msk.f32.gmra.mrb[22].mxu0 %vm829_vm0, %v9890_v63 }
 0x5f1   : > { %8185 = vmatprep.mubr.msk.f32.mxu0 %vm829_vm0, %v9895_v0 }
 0x5f4   : > { %8186 = vmatmul.mubr.msk.f32.gmra.mrb[24].mxu0 %vm829_vm0, %v9904_v4  ;;  %v1635_v4 = vpop.permute.xlu1 %1634 }
 0x5f8   : > { %v1639_v44 = vpop.permute.xlu1 %1638 }
 0x5fc   : > { %v1643_v51 = vpop.permute.xlu1 %1642 }
 0x6bb   : > { %v8178_v58 = vpop.f32.mrb[18].mxu0 }
 0x6bc   : > { %v1587_v9 = vadd.f32 1e-05, %v8178_v58  ;;  %v1581_v60 = vpop.f32.mrb[19].mxu0  ;;  %v1710_v58 = vpop.permute.xlu0 %1709 }
 0x6bd   : > { %v1582_v11 = vadd.f32 1e-05, %v1581_v60 }
 0x6be   : > { %9253 = vrsqrt.f32 %v1587_v9 }
 0x6bf   : > { %9255 = vrsqrt.f32 %v1582_v11  ;;  %v8181_v15 = vpop.f32.mrb[20].mxu0 }
 0x6c0   : > { %v1597_v61 = vadd.f32 1e-05, %v8181_v15  ;;  %v1591_v17 = vpop.f32.mrb[21].mxu0  ;;  %v1726_v60 = vpop.permute.xlu0 %1725 }
 0x6c1   : > { %v1592_v62 = vadd.f32 1e-05, %v1591_v17 }
 0x6c2   : > { %9257 = vrsqrt.f32 %v1597_v61 }
 0x6c3   : > { %9259 = vrsqrt.f32 %v1592_v62  ;;  %v8184_v63 = vpop.f32.mrb[22].mxu0 }
 0x6c4   : > { %v1607_v20 = vadd.f32 1e-05, %v8184_v63  ;;  %v1601_v0 = vpop.f32.mrb[23].mxu0 }
 0x6c5   : > { %v1602_v23 = vadd.f32 1e-05, %v1601_v0 }
 0x6c6   : > { %9261 = vrsqrt.f32 %v1607_v20 }
 0x6c7   : > { %9263 = vrsqrt.f32 %v1602_v23  ;;  %v8187_v25 = vpop.f32.mrb[24].mxu0 }
 0x6c8   : > { %v9254_v28 = vpop.eup %9253  ;;  %v1617_v30 = vadd.f32 1e-05, %v8187_v25  ;;  %v1611_v32 = vpop.f32.mrb[25].mxu0 }
 0x6c9   : > { %v9256_v22 = vpop.eup %9255  ;;  %v1653_v26 = vmul.f32 %v9254_v28, %v1631_v18  ;;  %v1612_v29 = vadd.f32 1e-05, %v1611_v32 }
 0x6ca   : > { %9265 = vrsqrt.f32 %v1617_v30  ;;  %v1652_v27 = vmul.f32 %v9256_v22, %v1629_v19 }
 0x6cb   : > { %1667 = vperm.xlu1 %9176, %v1653_v26   ;;  %9267 = vrsqrt.f32 %v1612_v29 }
 0x6cc   : > { %v9258_v43 = vpop.eup %9257  ;;  %1662 = vperm.xlu0 %9177, %v1652_v27  }
 0x6cd   : > { %v9260_v37 = vpop.eup %9259  ;;  %v1655_v33 = vmul.f32 %v9258_v43, %v1635_v4 }
 0x6ce   : > { %v1654_v47 = vmul.f32 %v9260_v37, %v1633_v35 }
 0x6d0   : > { %v9262_v38 = vpop.eup %9261  ;;  %1672 = vperm.xlu1 %9176, %v1654_v47   ;;  %1677 = vperm.xlu0 %9177, %v1655_v33  }
 0x6d1   : > { %v9264_v48 = vpop.eup %9263  ;;  %v1657_v49 = vmul.f32 %v9262_v38, %v1639_v44 }
 0x6d2   : > { %v1656_v50 = vmul.f32 %v9264_v48, %v1637_v40 }
 0x6d4   : > { %v9266_v52 = vpop.eup %9265  ;;  %1687 = vperm.xlu1 %9176, %v1657_v49   ;;  %1682 = vperm.xlu0 %9177, %v1656_v50  }
 0x6d5   : > { %v1659_v53 = vmul.f32 %v9266_v52, %v1643_v51  ;;  %v9268_v54 = vpop.eup %9267 }
 0x6d6   : > { %v1658_v59 = vmul.f32 %v9268_v54, %v1641_v57  ;;  %v9227_v54 = vld [vmem:[%s11989_s10 + $0x10] sm:$0xff]   ;;  %v9230_v57 = vld [vmem:[%s11989_s10 + $0x28] sm:$0xff]  }
 0x6d8   : > { %9178 = vset.pattern.permute.xlu1 %v9551_v6  ;;  %1697 = vperm.xlu0 %9177, %v1659_v53   ;;  %v9226_v53 = vld [vmem:[%s11989_s10 + $0x8] sm:$0xff]  }
 0x6d9   : > { %1733 = vperm.xlu1 %9178, %v9783_v13  }
 0x6dc   : > { %9181 = vset.pattern.permute.xlu0 %v9552_v55 }
 0x6dd   : > { %9179 = vset.pattern.permute.xlu1 %v12004_v1  ;;  %1777 = vperm.xlu0 %9181, %v9736_v2   ;;  %v10034_v2 = vld [vmem:[%s11983_s4 + $0x48] sm:$0xff] }
 0x6de   : > { %1692 = vperm.xlu1 %9179, %v1658_v59   ;;  %v9231_v59 = vld [vmem:[%s11989_s10 + $0x30] sm:$0xff]  }
 0x6e1   : > { %1789 = vperm.xlu0 %9181, %v9763_v8   ;;  %v10053_v8 = vld [vmem:[%s11983_s4 + $0x60] sm:$0xff] }
 0x6e2   : > { %9180 = vset.pattern.permute.xlu1 %v9551_v6  ;;  %v10029_v6 = vld [vmem:[%s11983_s4 + $0x40] sm:$0xff] }
 0x6e3   : > { %1737 = vperm.xlu1 %9180, %v9790_v14  }
 0x6e5   : > { %1797 = vperm.xlu0 %9181, %v9777_v12   ;;  %v10065_v12 = vld [vmem:[%s11983_s4 + $0x70] sm:$0xff] }
 0x6e7   : > { %9182 = vset.pattern.permute.xlu1 %v9552_v55 }
 0x6e8   : > { %1781 = vperm.xlu1 %9182, %v9755_v5   ;;  %v10046_v5 = vld [vmem:[%s11983_s4 + $0x58] sm:$0xff] }
 0x6e9   : > { %1805 = vperm.xlu0 %9181, %v9790_v14   ;;  %v1714_v14 = vpop.permute.xlu1 %1713 }
 0x6ec   : > { %1785 = vperm.xlu1 %9182, %v9742_v3   ;;  %v10041_v3 = vld [vmem:[%s11983_s4 + $0x50] sm:$0xff] }
 0x6ed   : > { %1815 = vperm.xlu0 %9181, %v10034_v2   ;;  %v1718_v7 = vpop.permute.xlu1 %1717 }
 0x6f0   : > { %1793 = vperm.xlu1 %9182, %v9771_v10   ;;  %v10058_v10 = vld [vmem:[%s11983_s4 + $0x68] sm:$0xff] }
 0x6f1   : > { %1825 = vperm.xlu0 %9181, %v10046_v5   ;;  %v1722_v9 = vpop.permute.xlu1 %1721 }
 0x6f4   : > { %1801 = vperm.xlu1 %9182, %v9783_v13   ;;  %v10070_v13 = vld [vmem:[%s11983_s4 + $0x78] sm:$0xff] }
 0x6f5   : > { %1835 = vperm.xlu0 %9181, %v10058_v10   ;;  %v1730_v11 = vpop.permute.xlu1 %1729 }
 0x6f8   : > { %1810 = vperm.xlu1 %9182, %v10029_v6  }
 0x6f9   : > { %1845 = vperm.xlu0 %9181, %v10070_v13  }
 0x6fc   : > { %1820 = vperm.xlu1 %9182, %v10041_v3  }
 0x6fd   : > { %9183 = vset.pattern.permute.xlu0 %v12004_v1 }
 0x700   : > { %1830 = vperm.xlu1 %9182, %v10053_v8  }
 0x704   : > { %1840 = vperm.xlu1 %9182, %v10065_v12  }
 0x708   : > { %9184 = vset.pattern.permute.xlu1 %v12004_v1 }
 0x74a   : > { %v1668_v15 = vpop.permute.xlu1 %1667 }
 0x74b   : > { %v1701_v61 = vmul.f32 %v1668_v15, %v9911_v21  ;;  %v1663_v17 = vpop.permute.xlu0 %1662 }
 0x74c   : > { %v1700_v18 = vmul.f32 %v1663_v17, %v9914_v24 }
 0x74d   : > { %v1741_v62 = vadd.f32 %v1714_v14, %v1701_v61 }
 0x74e   : > { %v1740_v63 = vadd.f32 %v1710_v58, %v1700_v18 }
 0x74f   : > { %v1749_v19 = vmax.f32 %v1741_v62, 0.0  ;;  %v1673_v20 = vpop.permute.xlu1 %1672  ;;  %v1678_v0 = vpop.permute.xlu0 %1677 }
 0x750   : > { %v1748_v23 = vmax.f32 %v1740_v63, 0.0  ;;  %v1702_v4 = vmul.f32 %v1673_v20, %v9924_v34  ;;  %v1703_v25 = vmul.f32 %v1678_v0, %v9921_v31 }
 0x752   : > { %v1742_v28 = vadd.f32 %v1718_v7, %v1702_v4  ;;  %v1743_v30 = vadd.f32 %v1722_v9, %v1703_v25  ;;  %v1772_v32 = vpack.c.bf16 %v1749_v19, %v1748_v23 }
 0x753   : > { %v1688_v22 = vpop.permute.xlu1 %1687  ;;  %v1683_v26 = vpop.permute.xlu0 %1682 }
 0x754   : > { %v1750_v35 = vmax.f32 %v1742_v28, 0.0  ;;  %v1751_v21 = vmax.f32 %v1743_v30, 0.0  ;;  %v1705_v29 = vmul.f32 %v1688_v22, %v9933_v36  ;;  %v1704_v24 = vmul.f32 %v1683_v26, %v9936_v39  ;;  %8188 = vmatprep.subr.bf16.mxu1 %v1772_v32 }
 0x755   : > { %8189 = vmatpush3.bf16.msra.mxu1 %v1772_v32 }
 0x756   : > { %v1745_v27 = vadd.f32 %v1730_v11, %v1705_v29  ;;  %v1744_v43 = vadd.f32 %v1726_v60, %v1704_v24  ;;  %v1773_v44 = vpack.c.bf16 %v1751_v21, %v1750_v35 }
 0x757   : > { %v1698_v40 = vpop.permute.xlu0 %1697 }
 0x758   : > { %v1753_v37 = vmax.f32 %v1745_v27, 0.0  ;;  %v1752_v34 = vmax.f32 %v1744_v43, 0.0  ;;  %v1734_v33 = vpop.permute.xlu1 %1733  ;;  %8190 = vmatprep.subr.bf16.mxu1 %v1773_v44  ;;  %v1707_v36 = vmul.f32 %v1698_v40, %v9945_v45  ;;  %v9228_v45 = vld [vmem:[%s11989_s10 + $0x18] sm:$0xff]  }
 0x759   : > { %8191 = vmatpush3.bf16.msra.mxu1 %v1773_v44 }
 0x75a   : > { %v1774_v31 = vpack.c.bf16 %v1753_v37, %v1752_v34 }
 0x75c   : > { %8192 = vmatprep.subr.bf16.mxu1 %v1774_v31  ;;  %v1778_v14 = vpop.permute.xlu0 %1777 }
 0x75d   : > { %v1693_v47 = vpop.permute.xlu1 %1692  ;;  %8193 = vmatpush3.bf16.msra.mxu1 %v1774_v31 }
 0x75e   : > { %v1706_v38 = vmul.f32 %v1693_v47, %v9948_v46  ;;  %v9229_v46 = vld [vmem:[%s11989_s10 + $0x20] sm:$0xff]  }
 0x760   : > { %v1746_v39 = vadd.f32 %v1734_v33, %v1706_v38  ;;  %v1790_v58 = vpop.permute.xlu0 %1789 }
 0x762   : > { %v1738_v48 = vpop.permute.xlu1 %1737  ;;  %v1754_v50 = vmax.f32 %v1746_v39, 0.0 }
 0x763   : > { %v1747_v49 = vadd.f32 %v1738_v48, %v1707_v36 }
 0x764   : > { %v1798_v11 = vpop.permute.xlu0 %1797 }
 0x765   : > { %v1755_v51 = vmax.f32 %v1747_v49, 0.0 }
 0x767   : > { %v1775_v52 = vpack.c.bf16 %v1755_v51, %v1754_v50  ;;  %v1782_v55 = vpop.permute.xlu1 %1781 }
 0x768   : > { %v1806_v20 = vpop.permute.xlu0 %1805 }
 0x769   : > { %8194 = vmatprep.subr.bf16.mxu1 %v1775_v52 }
 0x76a   : > { %8195 = vmatpush3.bf16.msra.mxu1 %v1775_v52 }
 0x76b   : > { %8920 = vmatprep.subr.bf16.mxu1 %v9547_v41  ;;  %v1786_v7 = vpop.permute.xlu1 %1785 }
 0x76c   : > { %v1816_v26 = vpop.permute.xlu0 %1815 }
 0x76d   : > { %8197 = vmatmul.mubr.msk.bf16.vlgmr.msra.gmra.mrb[20].mxu1 %vm1050_vm4, %v9226_v53 }
 0x76e   : > { %8200 = vmatprep.mubr.msk.bf16.mxu1 %vm1050_vm4, %v9227_v54 }
 0x76f   : > { %v1794_v9 = vpop.permute.xlu1 %1793 }
 0x770   : > { %v1826_v37 = vpop.permute.xlu0 %1825 }
 0x773   : > { %v1802_v62 = vpop.permute.xlu1 %1801 }
 0x774   : > { %v1836_v36 = vpop.permute.xlu0 %1835 }
 0x775   : > { %8201 = vmatmul.mubr.msk.bf16.gmra.mrb[24].mxu1 %vm1050_vm4, %v9228_v45 }
 0x776   : > { %8204 = vmatprep.mubr.msk.bf16.mxu1 %vm1050_vm4, %v9229_v46 }
 0x777   : > { %v1811_v25 = vpop.permute.xlu1 %1810 }
 0x778   : > { %v1846_v54 = vpop.permute.xlu0 %1845 }
 0x77b   : > { %v1821_v21 = vpop.permute.xlu1 %1820 }
 0x77d   : > { %8205 = vmatmul.mubr.msk.bf16.gmra.mrb[28].mxu1 %vm1050_vm4, %v9230_v57 }
 0x77e   : > { %8208 = vmatprep.mubr.msk.bf16.mxu1 %vm1050_vm4, %v9231_v59 }
 0x77f   : > { %v1831_v47 = vpop.permute.xlu1 %1830 }
 0x783   : > { %v1841_v51 = vpop.permute.xlu1 %1840 }
 0x785   : > { %8209 = vmatmul.mubr.msk.bf16.gmra.mrb[32].mxu1 %vm1050_vm4, %v9232_v56 }
 0x786   : > { %8272 = vmatprep.mubr.msk.f32.mxu1 %vm9548_vm3, %v9549_v42 }
 0x840   : > { %v8198_v60 = vpop.f32.mrb[20].mxu1 }
 0x841   : > { %v1946_v15 = vpop.f32.mrb[21].mxu1  ;;  %v10121_v19 = vadd.f32 %v8198_v60, %v1786_v7 }
 0x842   : > { %v10115_v61 = vadd.f32 %v1946_v15, %v1778_v14  ;;  %v8199_v17 = vpop.f32.mrb[22].mxu1 }
 0x843   : > { %v1949_v18 = vpop.f32.mrb[23].mxu1  ;;  %v10127_v0 = vadd.f32 %v8199_v17, %v1790_v58 }
 0x844   : > { %v10117_v63 = vadd.f32 %v1949_v18, %v1782_v55  ;;  %8216 = vmatprep.mubr.msk.f32.mxu0 %vm911_vm2, %v10115_v61 }
 0x846   : > { %8217 = vmatmul.mubr.msk.f32.vlgmr.msra.gmra.mrb[26].mxu0 %vm911_vm2, %v10117_v63 }
 0x847   : > { %8219 = vmatprep.mubr.msk.f32.mxu0 %vm911_vm2, %v10121_v19 }
 0x848   : > { %v8202_v23 = vpop.f32.mrb[24].mxu1 }
 0x849   : > { %v1962_v4 = vpop.f32.mrb[25].mxu1  ;;  %v10137_v35 = vadd.f32 %v8202_v23, %v1802_v62 }
 0x84a   : > { %v10129_v28 = vadd.f32 %v1962_v4, %v1794_v9  ;;  %v8203_v30 = vpop.f32.mrb[26].mxu1  ;;  %8220 = vmatmul.mubr.msk.f32.gmra.mrb[28].mxu0 %vm911_vm2, %v10127_v0 }
 0x84b   : > { %v1965_v32 = vpop.f32.mrb[27].mxu1  ;;  %v10143_v29 = vadd.f32 %v8203_v30, %v1806_v20 }
 0x84c   : > { %v10133_v22 = vadd.f32 %v1965_v32, %v1798_v11  ;;  %8222 = vmatprep.mubr.msk.f32.mxu0 %vm911_vm2, %v10129_v28 }
 0x84e   : > { %8223 = vmatmul.mubr.msk.f32.gmra.mrb[30].mxu0 %vm911_vm2, %v10133_v22 }
 0x84f   : > { %8225 = vmatprep.mubr.msk.f32.mxu0 %vm911_vm2, %v10137_v35 }
 0x850   : > { %v8206_v24 = vpop.f32.mrb[28].mxu1 }
 0x851   : > { %v1978_v27 = vpop.f32.mrb[29].mxu1  ;;  %v10153_v31 = vadd.f32 %v8206_v24, %v1821_v21 }
 0x852   : > { %v10145_v43 = vadd.f32 %v1978_v27, %v1811_v25  ;;  %v8207_v44 = vpop.f32.mrb[30].mxu1  ;;  %8226 = vmatmul.mubr.msk.f32.gmra.mrb[32].mxu0 %vm911_vm2, %v10143_v29  ;;  %v10189_v27 = vld [vmem:[%s11986_s7] sm:$0xf] }
 0x853   : > { %v1981_v34 = vpop.f32.mrb[31].mxu1  ;;  %v10159_v40 = vadd.f32 %v8207_v44, %v1826_v37  ;;  %v10197_v44 = vld [vmem:[%s11987_s8] sm:$0xff] }
 0x854   : > { %v10149_v33 = vadd.f32 %v1981_v34, %v1816_v26  ;;  %8228 = vmatprep.mubr.msk.f32.mxu0 %vm911_vm2, %v10145_v43  ;;  %v10204_v34 = vld [vmem:[%s11987_s8 + $0x8] sm:$0xff] }
 0x856   : > { %8229 = vmatmul.mubr.msk.f32.gmra.mrb[34].mxu0 %vm911_vm2, %v10149_v33 }
 0x857   : > { %8231 = vmatprep.mubr.msk.f32.mxu0 %vm911_vm2, %v10153_v31 }
 0x858   : > { %v8210_v38 = vpop.f32.mrb[32].mxu1 }
 0x859   : > { %v1994_v39 = vpop.f32.mrb[33].mxu1  ;;  %v10169_v53 = vadd.f32 %v8210_v38, %v1841_v51  ;;  %v10210_v38 = vld [vmem:[%s11987_s8 + $0x10] sm:$0xff]  ;;  %v10249_v51 = vld [vmem:[%s11987_s8 + $0x38] sm:$0xff] }
 0x85a   : > { %v10161_v48 = vadd.f32 %v1994_v39, %v1831_v47  ;;  %v8211_v49 = vpop.f32.mrb[34].mxu1  ;;  %8232 = vmatmul.mubr.msk.f32.gmra.mrb[36].mxu0 %vm911_vm2, %v10159_v40  ;;  %v10226_v39 = vld [vmem:[%s11987_s8 + $0x20] sm:$0xff] }
 0x85b   : > { %v1997_v50 = vpop.f32.mrb[35].mxu1  ;;  %v10175_v45 = vadd.f32 %v8211_v49, %v1846_v54  ;;  %v10235_v49 = vld [vmem:[%s11987_s8 + $0x28] sm:$0xff]  ;;  %v10254_v54 = vld [vmem:[%s11987_s8 + $0x40] sm:$0xff] }
 0x85c   : > { %v10165_v52 = vadd.f32 %v1997_v50, %v1836_v36  ;;  %8234 = vmatprep.mubr.msk.f32.mxu0 %vm911_vm2, %v10161_v48  ;;  %v10221_v36 = vld [vmem:[%s11987_s8 + $0x18] sm:$0xff]  ;;  %v10240_v50 = vld [vmem:[%s11987_s8 + $0x30] sm:$0xff] }
 0x85e   : > { %8235 = vmatmul.mubr.msk.f32.gmra.mrb[38].mxu0 %vm911_vm2, %v10165_v52 }
 0x85f   : > { %8237 = vmatprep.mubr.msk.f32.mxu0 %vm911_vm2, %v10169_v53 }
 0x862   : > { %8238 = vmatmul.mubr.msk.f32.gmra.mrb[40].mxu0 %vm911_vm2, %v10175_v45 }
 0x863   : > { %8277 = vmatprep.mubr.msk.f32.mxu0 %vm829_vm0, %v10197_v44 }
 0x919   : > { %v8218_v46 = vpop.f32.mrb[26].mxu0 }
 0x91a   : > { %v2123_v57 = vpop.f32.mrb[27].mxu0 }
 0x91b   : > { %v8921_v59 = vpack.c.bf16 %v8218_v46, %v2123_v57  ;;  %v10263_v46 = vld [vmem:[%s11987_s8 + $0x48] sm:$0xff]  ;;  %v10268_v57 = vld [vmem:[%s11987_s8 + $0x50] sm:$0xff] }
 0x91d   : > { %v8221_v56 = vpop.f32.mrb[28].mxu0  ;;  %8922 = vmatpush3.bf16.msra.mxu1 %v8921_v59  ;;  %v10277_v59 = vld [vmem:[%s11987_s8 + $0x58] sm:$0xff] }
 0x91e   : > { %v2133_v55 = vpop.f32.mrb[29].mxu0  ;;  %8923 = vmatprep.subr.bf16.mxu1 %v9547_v41 }
 0x91f   : > { %v8924_v14 = vpack.c.bf16 %v8221_v56, %v2133_v55  ;;  %v10282_v56 = vld [vmem:[%s11987_s8 + $0x60] sm:$0xff]  ;;  %v10291_v55 = vld [vmem:[%s11987_s8 + $0x68] sm:$0xff] }
 0x921   : > { %v8224_v7 = vpop.f32.mrb[30].mxu0  ;;  %8925 = vmatpush3.bf16.msra.mxu1 %v8924_v14  ;;  %v10296_v14 = vld [vmem:[%s11987_s8 + $0x70] sm:$0xff] }
 0x922   : > { %v2143_v58 = vpop.f32.mrb[31].mxu0  ;;  %8926 = vmatprep.subr.bf16.mxu1 %v9547_v41 }
 0x923   : > { %v8927_v9 = vpack.c.bf16 %v8224_v7, %v2143_v58  ;;  %v10305_v7 = vld [vmem:[%s11987_s8 + $0x78] sm:$0xff] }
 0x925   : > { %v8227_v60 = vpop.f32.mrb[32].mxu0  ;;  %8928 = vmatpush3.bf16.msra.mxu1 %v8927_v9 }
 0x926   : > { %v2153_v11 = vpop.f32.mrb[33].mxu0  ;;  %8929 = vmatprep.subr.bf16.mxu1 %v9547_v41 }
 0x927   : > { %v8930_v15 = vpack.c.bf16 %v8227_v60, %v2153_v11 }
 0x929   : > { %v8230_v17 = vpop.f32.mrb[34].mxu0  ;;  %8931 = vmatpush3.bf16.msra.mxu1 %v8930_v15 }
 0x92a   : > { %v2163_v18 = vpop.f32.mrb[35].mxu0  ;;  %8932 = vmatprep.subr.bf16.mxu1 %v9547_v41 }
 0x92b   : > { %v8933_v62 = vpack.c.bf16 %v8230_v17, %v2163_v18 }
 0x92d   : > { %v8233_v20 = vpop.f32.mrb[36].mxu0  ;;  %8934 = vmatpush3.bf16.msra.mxu1 %v8933_v62 }
 0x92e   : > { %v2173_v23 = vpop.f32.mrb[37].mxu0  ;;  %8935 = vmatprep.subr.bf16.mxu1 %v9547_v41 }
 0x92f   : > { %v8936_v4 = vpack.c.bf16 %v8233_v20, %v2173_v23 }
 0x931   : > { %v8236_v25 = vpop.f32.mrb[38].mxu0  ;;  %8937 = vmatpush3.bf16.msra.mxu1 %v8936_v4 }
 0x932   : > { %v2183_v30 = vpop.f32.mrb[39].mxu0  ;;  %8938 = vmatprep.subr.bf16.mxu1 %v9547_v41 }
 0x933   : > { %v8939_v32 = vpack.c.bf16 %v8236_v25, %v2183_v30 }
 0x935   : > { %v8239_v26 = vpop.f32.mrb[40].mxu0  ;;  %8940 = vmatpush3.bf16.msra.mxu1 %v8939_v32 }
 0x936   : > { %v2193_v21 = vpop.f32.mrb[41].mxu0  ;;  %8941 = vmatprep.subr.bf16.mxu1 %v9547_v41 }
 0x937   : > { %v8942_v24 = vpack.c.bf16 %v8239_v26, %v2193_v21 }
 0x939   : > { %8943 = vmatpush3.bf16.msra.mxu1 %v8942_v24 }
 0x93a   : > { %8944 = vmatprep.subr.bf16.mxu1 %v9546_v16 }
 0x93c   : > { %8273 = vmatmul.mubr.f32.vlgmr.msra.gmra.mrb[18].mxu1 %v10189_v27 }
 0x93d   : > { %8945 = vmatpush3.bf16.msra.mxu1 %v9546_v16 }
 0xa0f   : > { %v2285_v37 = vpop.f32.mrb[18].mxu1 }
 0xa10   : > { %v8274_v47 = vpop.f32.mrb[19].mxu1  ;;  %8275 = vmatprep.subr.msk.mxu0 %vm1148_vm5, %v2285_v37 }
 0xa11   : > { %8276 = vmatpush3.msk.msra.mxu0 %vm1148_vm5, %v2285_v37 }
 0xa12   : > { %8278 = vmatmul.mubr.msk.f32.vlgmr.msra.gmra.mrb[42].mxu0 %vm829_vm0, %v10204_v34  ;;  %8946 = vmatprep.subr.bf16.mxu0 %v9547_v41 }
 0xa13   : > { %8280 = vmatprep.mubr.msk.f32.mxu0 %vm829_vm0, %v10210_v38 }
 0xa16   : > { %8281 = vmatmul.mubr.msk.f32.gmra.mrb[44].mxu0 %vm829_vm0, %v10221_v36 }
 0xa17   : > { %8283 = vmatprep.mubr.msk.f32.mxu0 %vm829_vm0, %v10226_v39 }
 0xa1a   : > { %8284 = vmatmul.mubr.msk.f32.gmra.mrb[46].mxu0 %vm829_vm0, %v10235_v49 }
 0xa1b   : > { %8286 = vmatprep.mubr.msk.f32.mxu0 %vm829_vm0, %v10240_v50 }
 0xa1e   : > { %8287 = vmatmul.mubr.msk.f32.gmra.mrb[48].mxu0 %vm829_vm0, %v10249_v51 }
 0xa1f   : > { %8289 = vmatprep.mubr.msk.f32.mxu0 %vm829_vm0, %v10254_v54 }
 0xa22   : > { %8290 = vmatmul.mubr.msk.f32.gmra.mrb[50].mxu0 %vm829_vm0, %v10263_v46 }
 0xa23   : > { %8292 = vmatprep.mubr.msk.f32.mxu0 %vm829_vm0, %v10268_v57 }
 0xa26   : > { %8293 = vmatmul.mubr.msk.f32.gmra.mrb[52].mxu0 %vm829_vm0, %v10277_v59 }
 0xa27   : > { %8295 = vmatprep.mubr.msk.f32.mxu0 %vm829_vm0, %v10282_v56 }
 0xa2a   : > { %8296 = vmatmul.mubr.msk.f32.gmra.mrb[54].mxu0 %vm829_vm0, %v10291_v55 }
 0xa2b   : > { %8298 = vmatprep.mubr.msk.f32.mxu0 %vm829_vm0, %v10296_v14 }
 0xa2e   : > { %8299 = vmatmul.mubr.msk.f32.gmra.mrb[56].mxu0 %vm829_vm0, %v10305_v7 }
 0xa2f   : > { %8361 = vmatprep.mubr.msk.f32.mxu0 %vm9548_vm3, %v9549_v42 }
 0xae5   : > { %v8279_v58 = vpop.f32.mrb[42].mxu0 }
 0xae6   : > { %2492 = vperm.xlu0 %9183, %v8279_v58   ;;  %v2406_v9 = vpop.f32.mrb[43].mxu0 }
 0xae7   : > { %2487 = vperm.xlu1 %9184, %v2406_v9  }
 0xae9   : > { %v8282_v60 = vpop.f32.mrb[44].mxu0 }
 0xaea   : > { %v2416_v11 = vpop.f32.mrb[45].mxu0 }
 0xaeb   : > { %2497 = vperm.xlu1 %9184, %v2416_v11  }
 0xaed   : > { %v8285_v15 = vpop.f32.mrb[46].mxu0 }
 0xaee   : > { %v2426_v17 = vpop.f32.mrb[47].mxu0 }
 0xaef   : > { %2502 = vperm.xlu1 %9184, %v8282_v60   ;;  %2507 = vperm.xlu0 %9183, %v2426_v17  }
 0xaf1   : > { %v8288_v18 = vpop.f32.mrb[48].mxu0 }
 0xaf2   : > { %v2436_v62 = vpop.f32.mrb[49].mxu0 }
 0xaf3   : > { %2512 = vperm.xlu1 %9184, %v8285_v15   ;;  %2517 = vperm.xlu0 %9183, %v2436_v62  }
 0xaf5   : > { %v8291_v20 = vpop.f32.mrb[50].mxu0 }
 0xaf6   : > { %v2446_v23 = vpop.f32.mrb[51].mxu0 }
 0xaf7   : > { %2522 = vperm.xlu1 %9184, %v8288_v18   ;;  %2527 = vperm.xlu0 %9183, %v2446_v23  }
 0xaf9   : > { %v8294_v4 = vpop.f32.mrb[52].mxu0 }
 0xafa   : > { %v2456_v25 = vpop.f32.mrb[53].mxu0 }
 0xafb   : > { %2532 = vperm.xlu1 %9184, %v8291_v20   ;;  %2537 = vperm.xlu0 %9183, %v2456_v25  }
 0xafd   : > { %v8297_v30 = vpop.f32.mrb[54].mxu0 }
 0xafe   : > { %v2466_v32 = vpop.f32.mrb[55].mxu0 }
 0xaff   : > { %2542 = vperm.xlu1 %9184, %v8294_v4   ;;  %2547 = vperm.xlu0 %9183, %v2466_v32  }
 0xb01   : > { %v8300_v26 = vpop.f32.mrb[56].mxu0 }
 0xb02   : > { %v2476_v21 = vpop.f32.mrb[57].mxu0 }
 0xb03   : > { %2552 = vperm.xlu1 %9184, %v8297_v30   ;;  %2557 = vperm.xlu0 %9183, %v2476_v21  }
 0xb07   : > { %2562 = vperm.xlu1 %9184, %v8300_v26  }
 0xb65   : > { %v2493_v24 = vpop.permute.xlu0 %2492 }
 0xb66   : > { %v10312_v37 = vsub.f32 %v10117_v63, %v2493_v24  ;;  %v2488_v47 = vpop.permute.xlu1 %2487 }
 0xb67   : > { %v10315_v58 = vsub.f32 %v10115_v61, %v2488_v47 }
 0xb68   : > { %v2582_v60 = vmul.f32 %v10312_v37, %v10312_v37 }
 0xb69   : > { %v2581_v9 = vmul.f32 %v10315_v58, %v10315_v58 }
 0xb6a   : > { %v2498_v11 = vpop.permute.xlu1 %2497 }
 0xb6b   : > { %v10322_v15 = vsub.f32 %v10121_v19, %v2498_v11  ;;  %8305 = vmatprep.mubr.msk.f32.mxu1 %vm911_vm2, %v2581_v9 }
 0xb6c   : > { %8306 = vmatmul.mubr.msk.f32.vlgmr.msra.gmra.mrb[36].mxu1 %vm911_vm2, %v2582_v60 }
 0xb6d   : > { %v2583_v63 = vmul.f32 %v10322_v15, %v10322_v15 }
 0xb6e   : > { %v2503_v17 = vpop.permute.xlu1 %2502  ;;  %v2508_v61 = vpop.permute.xlu0 %2507 }
 0xb6f   : > { %v10329_v18 = vsub.f32 %v10127_v0, %v2503_v17  ;;  %v10332_v62 = vsub.f32 %v10129_v28, %v2508_v61  ;;  %8308 = vmatprep.mubr.msk.f32.mxu1 %vm911_vm2, %v2583_v63 }
 0xb71   : > { %v2584_v19 = vmul.f32 %v10329_v18, %v10329_v18  ;;  %v2585_v20 = vmul.f32 %v10332_v62, %v10332_v62 }
 0xb72   : > { %v2513_v23 = vpop.permute.xlu1 %2512  ;;  %v2518_v4 = vpop.permute.xlu0 %2517 }
 0xb73   : > { %v10340_v25 = vsub.f32 %v10133_v22, %v2513_v23  ;;  %v10343_v30 = vsub.f32 %v10137_v35, %v2518_v4  ;;  %8309 = vmatmul.mubr.msk.f32.gmra.mrb[38].mxu1 %vm911_vm2, %v2584_v19 }
 0xb74   : > { %8311 = vmatprep.mubr.msk.f32.mxu1 %vm911_vm2, %v2585_v20 }
 0xb75   : > { %v2586_v0 = vmul.f32 %v10340_v25, %v10340_v25  ;;  %v2587_v28 = vmul.f32 %v10343_v30, %v10343_v30 }
 0xb76   : > { %v2523_v32 = vpop.permute.xlu1 %2522  ;;  %v2528_v26 = vpop.permute.xlu0 %2527 }
 0xb77   : > { %v10352_v21 = vsub.f32 %v10143_v29, %v2523_v32  ;;  %v10355_v22 = vsub.f32 %v10145_v43, %v2528_v26  ;;  %8312 = vmatmul.mubr.msk.f32.gmra.mrb[40].mxu1 %vm911_vm2, %v2586_v0 }
 0xb78   : > { %8314 = vmatprep.mubr.msk.f32.mxu1 %vm911_vm2, %v2587_v28 }
 0xb79   : > { %v2588_v35 = vmul.f32 %v10352_v21, %v10352_v21  ;;  %v2589_v24 = vmul.f32 %v10355_v22, %v10355_v22 }
 0xb7a   : > { %v2533_v47 = vpop.permute.xlu1 %2532  ;;  %v2538_v9 = vpop.permute.xlu0 %2537 }
 0xb7b   : > { %v10364_v60 = vsub.f32 %v10149_v33, %v2533_v47  ;;  %v10367_v29 = vsub.f32 %v10153_v31, %v2538_v9  ;;  %8315 = vmatmul.mubr.msk.f32.gmra.mrb[42].mxu1 %vm911_vm2, %v2588_v35 }
 0xb7c   : > { %8317 = vmatprep.mubr.msk.f32.mxu1 %vm911_vm2, %v2589_v24 }
 0xb7d   : > { %v2590_v43 = vmul.f32 %v10364_v60, %v10364_v60  ;;  %v2591_v11 = vmul.f32 %v10367_v29, %v10367_v29 }
 0xb7e   : > { %v2543_v63 = vpop.permute.xlu1 %2542  ;;  %v2548_v17 = vpop.permute.xlu0 %2547 }
 0xb7f   : > { %v10376_v61 = vsub.f32 %v10159_v40, %v2543_v63  ;;  %v10379_v33 = vsub.f32 %v10161_v48, %v2548_v17  ;;  %8318 = vmatmul.mubr.msk.f32.gmra.mrb[44].mxu1 %vm911_vm2, %v2590_v43 }
 0xb80   : > { %8320 = vmatprep.mubr.msk.f32.mxu1 %vm911_vm2, %v2591_v11 }
 0xb81   : > { %v2592_v31 = vmul.f32 %v10376_v61, %v10376_v61  ;;  %v2593_v19 = vmul.f32 %v10379_v33, %v10379_v33 }
 0xb82   : > { %v2553_v20 = vpop.permute.xlu1 %2552  ;;  %v2558_v23 = vpop.permute.xlu0 %2557 }
 0xb83   : > { %v10388_v4 = vsub.f32 %v10165_v52, %v2553_v20  ;;  %v10391_v40 = vsub.f32 %v10169_v53, %v2558_v23  ;;  %8321 = vmatmul.mubr.msk.f32.gmra.mrb[46].mxu1 %vm911_vm2, %v2592_v31 }
 0xb84   : > { %8323 = vmatprep.mubr.msk.f32.mxu1 %vm911_vm2, %v2593_v19 }
 0xb85   : > { %v2594_v48 = vmul.f32 %v10388_v4, %v10388_v4  ;;  %v2595_v0 = vmul.f32 %v10391_v40, %v10391_v40 }
 0xb86   : > { %v2563_v28 = vpop.permute.xlu1 %2562 }
 0xb87   : > { %v10400_v32 = vsub.f32 %v10175_v45, %v2563_v28  ;;  %8324 = vmatmul.mubr.msk.f32.gmra.mrb[48].mxu1 %vm911_vm2, %v2594_v48 }
 0xb88   : > { %8326 = vmatprep.mubr.msk.f32.mxu1 %vm911_vm2, %v2595_v0 }
 0xb89   : > { %v2596_v52 = vmul.f32 %v10400_v32, %v10400_v32 }
 0xb8b   : > { %8327 = vmatmul.mubr.msk.f32.gmra.mrb[50].mxu1 %vm911_vm2, %v2596_v52 }
 0xb8c   : > { %8366 = vmatprep.mubr.msk.f32.mxu1 %vm829_vm0, %v10197_v44 }
 0xc3f   : > { %v8307_v53 = vpop.f32.mrb[36].mxu1 }
 0xc40   : > { %v2711_v26 = vpop.f32.mrb[37].mxu1 }
 0xc41   : > { %v8947_v35 = vpack.c.bf16 %v8307_v53, %v2711_v26 }
 0xc43   : > { %8948 = vmatpush3.bf16.msra.mxu0 %v8947_v35 }
 0xc44   : > { %8949 = vmatprep.subr.bf16.mxu0 %v9547_v41 }
 0xc46   : > { %v8310_v45 = vpop.f32.mrb[38].mxu1 }
 0xc47   : > { %v2721_v24 = vpop.f32.mrb[39].mxu1 }
 0xc48   : > { %v8950_v47 = vpack.c.bf16 %v8310_v45, %v2721_v24  ;;  %v10420_v24 = vld [vmem:[%s11983_s4 + $0x8] sm:$0xff] }
 0xc49   : > { %3026 = vrot.lane.b32.xlu1 %v10420_v24, %s9553_s18 }
 0xc4a   : > { %v8313_v9 = vpop.f32.mrb[40].mxu1  ;;  %8951 = vmatpush3.bf16.msra.mxu0 %v8950_v47  ;;  %v10426_v47 = vld [vmem:[%s11983_s4] sm:$0xff] }
 0xc4b   : > { %v2731_v43 = vpop.f32.mrb[41].mxu1  ;;  %8952 = vmatprep.subr.bf16.mxu0 %v9547_v41  ;;  %3024 = vrot.lane.b32.xlu0 %v10426_v47, %s9553_s18 }
 0xc4c   : > { %v8953_v11 = vpack.c.bf16 %v8313_v9, %v2731_v43  ;;  %v9554_v9 = vmov 5   ;;  %v10440_v43 = vld [vmem:[%s11983_s4 + $0x10] sm:$0xff] }
 0xc4d   : > { %9186 = vset.pattern.permute.xlu1 %v9554_v9  ;;  %9185 = vset.pattern.permute.xlu0 %v9554_v9 }
 0xc4e   : > { %v8316_v63 = vpop.f32.mrb[42].mxu1  ;;  %8954 = vmatpush3.bf16.msra.mxu0 %v8953_v11  ;;  %v10446_v11 = vld [vmem:[%s11983_s4 + $0x28] sm:$0xff] }
 0xc4f   : > { %v2741_v17 = vpop.f32.mrb[43].mxu1  ;;  %8955 = vmatprep.subr.bf16.mxu0 %v9547_v41  ;;  %3028 = vrot.lane.b32.xlu0 %v10440_v43, %s9553_s18 }
 0xc50   : > { %v8956_v44 = vpack.c.bf16 %v8316_v63, %v2741_v17  ;;  %v10452_v63 = vld [vmem:[%s11983_s4 + $0x20] sm:$0xff]  ;;  %v10458_v17 = vld [vmem:[%s11983_s4 + $0x38] sm:$0xff] }
 0xc52   : > { %v8319_v31 = vpop.f32.mrb[44].mxu1  ;;  %8957 = vmatpush3.bf16.msra.mxu0 %v8956_v44  ;;  %v10464_v44 = vld [vmem:[%s11983_s4 + $0x30] sm:$0xff] }
 0xc53   : > { %v2751_v19 = vpop.f32.mrb[45].mxu1  ;;  %8958 = vmatprep.subr.bf16.mxu0 %v9547_v41  ;;  %3032 = vrot.lane.b32.xlu0 %v10452_v63, %s9553_s18 }
 0xc54   : > { %v8959_v20 = vpack.c.bf16 %v8319_v31, %v2751_v19 }
 0xc56   : > { %v8322_v23 = vpop.f32.mrb[46].mxu1  ;;  %8960 = vmatpush3.bf16.msra.mxu0 %v8959_v20 }
 0xc57   : > { %v2761_v48 = vpop.f32.mrb[47].mxu1  ;;  %8961 = vmatprep.subr.bf16.mxu0 %v9547_v41  ;;  %3036 = vrot.lane.b32.xlu0 %v10464_v44, %s9553_s18 }
 0xc58   : > { %v8962_v0 = vpack.c.bf16 %v8322_v23, %v2761_v48 }
 0xc5a   : > { %v8325_v28 = vpop.f32.mrb[48].mxu1  ;;  %8963 = vmatpush3.bf16.msra.mxu0 %v8962_v0 }
 0xc5b   : > { %v2771_v52 = vpop.f32.mrb[49].mxu1  ;;  %8964 = vmatprep.subr.bf16.mxu0 %v9547_v41  ;;  %3040 = vrot.lane.b32.xlu0 %v10029_v6, %s9553_s18 }
 0xc5c   : > { %v8965_v53 = vpack.c.bf16 %v8325_v28, %v2771_v52 }
 0xc5e   : > { %v8328_v26 = vpop.f32.mrb[50].mxu1  ;;  %8966 = vmatpush3.bf16.msra.mxu0 %v8965_v53 }
 0xc5f   : > { %v2781_v35 = vpop.f32.mrb[51].mxu1  ;;  %8967 = vmatprep.subr.bf16.mxu0 %v9547_v41  ;;  %3044 = vrot.lane.b32.xlu0 %v10041_v3, %s9553_s18 }
 0xc60   : > { %v8968_v45 = vpack.c.bf16 %v8328_v26, %v2781_v35 }
 0xc62   : > { %8969 = vmatpush3.bf16.msra.mxu0 %v8968_v45 }
 0xc63   : > { %3048 = vrot.lane.b32.xlu0 %v10053_v8, %s9553_s18 }
 0xc65   : > { %8362 = vmatmul.mubr.f32.vlgmr.msra.gmra.mrb[58].mxu0 %v10189_v27  ;;  %v10434_v27 = vld [vmem:[%s11983_s4 + $0x18] sm:$0xff] }
 0xc66   : > { %3030 = vrot.lane.b32.xlu1 %v10434_v27, %s9553_s18 }
 0xc67   : > { %3052 = vrot.lane.b32.xlu0 %v10065_v12, %s9553_s18 }
 0xc6a   : > { %3034 = vrot.lane.b32.xlu1 %v10446_v11, %s9553_s18 }
 0xc6b   : > { %3185 = vperm.xlu0 %9185, %v10426_v47  }
 0xc6e   : > { %3038 = vrot.lane.b32.xlu1 %v10458_v17, %s9553_s18 }
 0xc6f   : > { %3201 = vperm.xlu0 %9185, %v10452_v63  }
 0xc72   : > { %3042 = vrot.lane.b32.xlu1 %v10034_v2, %s9553_s18 }
 0xc73   : > { %3217 = vperm.xlu0 %9185, %v10029_v6  }
 0xc76   : > { %3046 = vrot.lane.b32.xlu1 %v10046_v5, %s9553_s18 }
 0xc77   : > { %3233 = vperm.xlu0 %9185, %v10053_v8  }
 0xc7a   : > { %3050 = vrot.lane.b32.xlu1 %v10058_v10, %s9553_s18 }
 0xc7b   : > { %9188 = vset.pattern.permute.xlu0 %v12004_v1 }
 0xc7e   : > { %3054 = vrot.lane.b32.xlu1 %v10070_v13, %s9553_s18  ;;  %s7584_s18 = sshll.u32 %s9728_s29, 7  ;;  %s7456_s29 = sld [smem:[#allocation3 + $0x2]] }
 0xc7f   : > { %s10529_s24 = scalar_lea.vmem %s12019_s2, %s7584_s18  ;;  %s10673_s2 = scalar_lea.vmem %s11982_s3, %s7585_s22 }
 0xc80   : > { %s12020_s18 = smov 127  }
 0xc82   : > { %3189 = vperm.xlu1 %9186, %v10420_v24  }
 0xc86   : > { %3193 = vperm.xlu1 %9186, %v10440_v43  }
 0xc8a   : > { %3197 = vperm.xlu1 %9186, %v10434_v27  }
 0xc8e   : > { %3205 = vperm.xlu1 %9186, %v10446_v11  }
 0xc92   : > { %3209 = vperm.xlu1 %9186, %v10464_v44  }
 0xc96   : > { %3213 = vperm.xlu1 %9186, %v10458_v17  }
 0xc9a   : > { %3221 = vperm.xlu1 %9186, %v10034_v2  }
 0xc9e   : > { %3225 = vperm.xlu1 %9186, %v10041_v3  }
 0xca2   : > { %3229 = vperm.xlu1 %9186, %v10046_v5  }
 0xca6   : > { %3237 = vperm.xlu1 %9186, %v10058_v10  }
 0xcaa   : > { %9187 = vset.pattern.permute.xlu1 %v12004_v1 }
 0xcbb   : > { %v3027_v2 = vpop.permute.xlu1 %3026 }
 0xcbd   : > { %v3025_v5 = vpop.permute.xlu0 %3024 }
 0xd38   : > { %v2856_v6 = vpop.f32.mrb[58].mxu0 }
 0xd39   : > { %v8363_v12 = vpop.f32.mrb[59].mxu0  ;;  %8364 = vmatprep.subr.msk.mxu1 %vm1148_vm5, %v2856_v6 }
 0xd3a   : > { %8365 = vmatpush3.msk.msra.mxu1 %vm1148_vm5, %v2856_v6 }
 0xd3b   : > { %8367 = vmatmul.mubr.msk.f32.vlgmr.msra.gmra.mrb[52].mxu1 %vm829_vm0, %v10204_v34  ;;  %8970 = vmatprep.subr.bf16.mxu1 %v9546_v16  ;;  %v3031_v34 = vpop.permute.xlu1 %3030 }
 0xd3c   : > { %8369 = vmatprep.mubr.msk.f32.mxu1 %vm829_vm0, %v10210_v38  ;;  %8971 = vmatpush3.bf16.msra.mxu1 %v9546_v16 }
 0xd3f   : > { %8370 = vmatmul.mubr.msk.f32.gmra.mrb[54].mxu1 %vm829_vm0, %v10221_v36 }
 0xd40   : > { %8372 = vmatprep.mubr.msk.f32.mxu1 %vm829_vm0, %v10226_v39 }
 0xd43   : > { %8373 = vmatmul.mubr.msk.f32.gmra.mrb[56].mxu1 %vm829_vm0, %v10235_v49 }
 0xd44   : > { %8375 = vmatprep.mubr.msk.f32.mxu1 %vm829_vm0, %v10240_v50  ;;  %v3029_v50 = vpop.permute.xlu0 %3028 }
 0xd47   : > { %8376 = vmatmul.mubr.msk.f32.gmra.mrb[58].mxu1 %vm829_vm0, %v10249_v51 }
 0xd48   : > { %8378 = vmatprep.mubr.msk.f32.mxu1 %vm829_vm0, %v10254_v54 }
 0xd4b   : > { %8379 = vmatmul.mubr.msk.f32.gmra.mrb[60].mxu1 %vm829_vm0, %v10263_v46 }
 0xd4c   : > { %8381 = vmatprep.mubr.msk.f32.mxu1 %vm829_vm0, %v10268_v57  ;;  %v3035_v57 = vpop.permute.xlu1 %3034 }
 0xd4f   : > { %8382 = vmatmul.mubr.msk.f32.gmra.mrb[62].mxu1 %vm829_vm0, %v10277_v59 }
 0xd50   : > { %8384 = vmatprep.mubr.msk.f32.mxu1 %vm829_vm0, %v10282_v56  ;;  %v3039_v0 = vpop.permute.xlu1 %3038 }
 0xd53   : > { %8385 = vmatmul.mubr.msk.f32.gmra.mrb[64].mxu1 %vm829_vm0, %v10291_v55  ;;  %v3033_v55 = vpop.permute.xlu0 %3032 }
 0xd54   : > { %8387 = vmatprep.mubr.msk.f32.mxu1 %vm829_vm0, %v10296_v14 }
 0xd57   : > { %8388 = vmatmul.mubr.msk.f32.gmra.mrb[66].mxu1 %vm829_vm0, %v10305_v7  ;;  %v3037_v12 = vpop.permute.xlu0 %3036 }
 0xe0e   : > { %v8368_v3 = vpop.f32.mrb[52].mxu1 }
 0xe0f   : > { %v2935_v8 = vadd.f32 1e-05, %v8368_v3  ;;  %v2929_v10 = vpop.f32.mrb[53].mxu1 }
 0xe10   : > { %v2930_v13 = vadd.f32 1e-05, %v2929_v10 }
 0xe11   : > { %9269 = vrsqrt.f32 %v2935_v8 }
 0xe12   : > { %9271 = vrsqrt.f32 %v2930_v13  ;;  %v8371_v38 = vpop.f32.mrb[54].mxu1 }
 0xe13   : > { %v2945_v36 = vadd.f32 1e-05, %v8371_v38  ;;  %v2939_v39 = vpop.f32.mrb[55].mxu1 }
 0xe14   : > { %v2940_v49 = vadd.f32 1e-05, %v2939_v39 }
 0xe15   : > { %9273 = vrsqrt.f32 %v2945_v36 }
 0xe16   : > { %9275 = vrsqrt.f32 %v2940_v49  ;;  %v8374_v51 = vpop.f32.mrb[56].mxu1 }
 0xe17   : > { %v2955_v54 = vadd.f32 1e-05, %v8374_v51  ;;  %v2949_v46 = vpop.f32.mrb[57].mxu1 }
 0xe18   : > { %v2950_v59 = vadd.f32 1e-05, %v2949_v46 }
 0xe19   : > { %9277 = vrsqrt.f32 %v2955_v54 }
 0xe1a   : > { %9279 = vrsqrt.f32 %v2950_v59  ;;  %v8377_v56 = vpop.f32.mrb[58].mxu1 }
 0xe1b   : > { %v9270_v14 = vpop.eup %9269  ;;  %v2965_v7 = vadd.f32 1e-05, %v8377_v56  ;;  %v2959_v31 = vpop.f32.mrb[59].mxu1 }
 0xe1c   : > { %v9272_v19 = vpop.eup %9271  ;;  %v3073_v20 = vmul.f32 %v9270_v14, %v3027_v2  ;;  %v2960_v23 = vadd.f32 1e-05, %v2959_v31 }
 0xe1d   : > { %9281 = vrsqrt.f32 %v2965_v7  ;;  %v3072_v48 = vmul.f32 %v9272_v19, %v3025_v5  ;;  %v3043_v5 = vpop.permute.xlu1 %3042 }
 0xe1e   : > { %9283 = vrsqrt.f32 %v2960_v23  ;;  %3095 = vperm.xlu1 %9187, %v3073_v20   ;;  %v8380_v28 = vpop.f32.mrb[60].mxu1 }
 0xe1f   : > { %v9274_v52 = vpop.eup %9273  ;;  %v2975_v53 = vadd.f32 1e-05, %v8380_v28  ;;  %v2969_v26 = vpop.f32.mrb[61].mxu1  ;;  %3090 = vperm.xlu0 %9188, %v3072_v48  }
 0xe20   : > { %v9276_v35 = vpop.eup %9275  ;;  %v3075_v45 = vmul.f32 %v9274_v52, %v3031_v34  ;;  %v2970_v6 = vadd.f32 1e-05, %v2969_v26  ;;  %v3041_v34 = vpop.permute.xlu0 %3040 }
 0xe21   : > { %9285 = vrsqrt.f32 %v2975_v53  ;;  %v3074_v3 = vmul.f32 %v9276_v35, %v3029_v50  ;;  %v3047_v31 = vpop.permute.xlu1 %3046 }
 0xe22   : > { %9287 = vrsqrt.f32 %v2970_v6  ;;  %v8383_v8 = vpop.f32.mrb[62].mxu1 }
 0xe23   : > { %v9278_v2 = vpop.eup %9277  ;;  %v2985_v10 = vadd.f32 1e-05, %v8383_v8  ;;  %v2979_v13 = vpop.f32.mrb[63].mxu1  ;;  %3100 = vperm.xlu1 %9187, %v3074_v3   ;;  %3105 = vperm.xlu0 %9188, %v3075_v45  }
 0xe24   : > { %v9280_v38 = vpop.eup %9279  ;;  %v3077_v36 = vmul.f32 %v9278_v2, %v3035_v57  ;;  %v2980_v39 = vadd.f32 1e-05, %v2979_v13  ;;  %v3045_v28 = vpop.permute.xlu0 %3044 }
 0xe25   : > { %9289 = vrsqrt.f32 %v2985_v10  ;;  %v3076_v49 = vmul.f32 %v9280_v38, %v3033_v55 }
 0xe26   : > { %9291 = vrsqrt.f32 %v2980_v39  ;;  %v8386_v51 = vpop.f32.mrb[64].mxu1 }
 0xe27   : > { %v9282_v54 = vpop.eup %9281  ;;  %v2995_v46 = vadd.f32 1e-05, %v8386_v51  ;;  %v2989_v59 = vpop.f32.mrb[65].mxu1  ;;  %3115 = vperm.xlu1 %9187, %v3077_v36   ;;  %3110 = vperm.xlu0 %9188, %v3076_v49   ;;  %v10535_v49 = vld [vmem:[%s11983_s4 + $0x70] sm:$0xff]  ;;  %v632_v51 = vld [vmem:[%s10529_s24] sm:$0xff] }
 0xe28   : > { %v9284_v50 = vpop.eup %9283  ;;  %v3079_v56 = vmul.f32 %v9282_v54, %v3039_v0  ;;  %v2990_v14 = vadd.f32 1e-05, %v2989_v59  ;;  %v3051_v0 = vpop.permute.xlu1 %3050  ;;  %v633_v54 = vld [vmem:[%s10529_s24 + $0x8] sm:$0xff]  ;;  %v10546_v59 = vld [vmem:[%s11983_s4 + $0x78] sm:$0xff] }
 0xe29   : > { %9293 = vrsqrt.f32 %v2995_v46  ;;  %v3078_v7 = vmul.f32 %v9284_v50, %v3037_v12  ;;  %v3049_v12 = vpop.permute.xlu0 %3048  ;;  %v634_v46 = vld [vmem:[%s10529_s24 + $0x10] sm:$0xff]  ;;  %v635_v50 = vld [vmem:[%s10529_s24 + $0x18] sm:$0xff] }
 0xe2a   : > { %9295 = vrsqrt.f32 %v2990_v14  ;;  %v8389_v19 = vpop.f32.mrb[66].mxu1  ;;  %v636_v14 = vld [vmem:[%s10529_s24 + $0x20] sm:$0xff] }
 0xe2b   : > { %v9286_v57 = vpop.eup %9285  ;;  %v3005_v20 = vadd.f32 1e-05, %v8389_v19  ;;  %3120 = vperm.xlu1 %9187, %v3078_v7   ;;  %3125 = vperm.xlu0 %9188, %v3079_v56   ;;  %v2999_v55 = vpop.f32.mrb[67].mxu1  ;;  %v9555_v56 = vmov 6   ;;  %v637_v7 = vld [vmem:[%s10529_s24 + $0x28] sm:$0xff]  ;;  %v639_v19 = vld [vmem:[%s10529_s24 + $0x38] sm:$0xff] }
 0xe2c   : > { %v9288_v23 = vpop.eup %9287  ;;  %v3081_v48 = vmul.f32 %v9286_v57, %v3043_v5  ;;  %v3000_v52 = vadd.f32 1e-05, %v2999_v55  ;;  %v3055_v13 = vpop.permute.xlu1 %3054  ;;  %v641_v57 = vld [vmem:[%s10529_s24 + $0x48] sm:$0xff]  ;;  %v644_v55 = vld [vmem:[%s10529_s24 + $0x60] sm:$0xff] }
 0xe2d   : > { %9297 = vrsqrt.f32 %v3005_v20  ;;  %v3080_v53 = vmul.f32 %v9288_v23, %v3041_v34  ;;  %v3053_v39 = vpop.permute.xlu0 %3052  ;;  %v642_v20 = vld [vmem:[%s10529_s24 + $0x50] sm:$0xff]  ;;  %v645_v23 = vld [vmem:[%s10529_s24 + $0x68] sm:$0xff] }
 0xe2e   : > { %9299 = vrsqrt.f32 %v3000_v52  ;;  %v647_v52 = vld [vmem:[%s10529_s24 + $0x78] sm:$0xff] }
 0xe2f   : > { %v9290_v26 = vpop.eup %9289  ;;  %3135 = vperm.xlu1 %9187, %v3081_v48   ;;  %3130 = vperm.xlu0 %9188, %v3080_v53   ;;  %v10587_v48 = vld [vmem:[%s11983_s4 + $0x50] sm:$0xff]  ;;  %v10594_v53 = vld [vmem:[%s11983_s4 + $0x58] sm:$0xff] }
 0xe30   : > { %v9292_v35 = vpop.eup %9291  ;;  %v3083_v45 = vmul.f32 %v9290_v26, %v3047_v31  ;;  %v638_v31 = vld [vmem:[%s10529_s24 + $0x30] sm:$0xff] }
 0xe31   : > { %v3082_v6 = vmul.f32 %v9292_v35, %v3045_v28  ;;  %v10606_v35 = vld [vmem:[%s11983_s4 + $0x68] sm:$0xff] }
 0xe33   : > { %v9294_v3 = vpop.eup %9293  ;;  %3140 = vperm.xlu1 %9187, %v3082_v6   ;;  %3145 = vperm.xlu0 %9188, %v3083_v45  }
 0xe34   : > { %v9296_v8 = vpop.eup %9295  ;;  %v3085_v2 = vmul.f32 %v9294_v3, %v3051_v0  ;;  %v10600_v0 = vld [vmem:[%s11983_s4 + $0x60] sm:$0xff] }
 0xe35   : > { %v3084_v10 = vmul.f32 %v9296_v8, %v3049_v12  ;;  %v3186_v12 = vpop.permute.xlu0 %3185 }
 0xe37   : > { %v9298_v5 = vpop.eup %9297  ;;  %3155 = vperm.xlu1 %9187, %v3085_v2   ;;  %3150 = vperm.xlu0 %9188, %v3084_v10  }
 0xe38   : > { %v3087_v38 = vmul.f32 %v9298_v5, %v3055_v13  ;;  %v9300_v36 = vpop.eup %9299 }
 0xe39   : > { %v3086_v34 = vmul.f32 %v9300_v36, %v3053_v39  ;;  %v3202_v8 = vpop.permute.xlu0 %3201 }
 0xe3b   : > { %9189 = vset.pattern.permute.xlu1 %v9554_v9  ;;  %3165 = vperm.xlu0 %9188, %v3087_v38  }
 0xe3c   : > { %3241 = vperm.xlu1 %9189, %v10535_v49  }
 0xe3d   : > { %v3218_v10 = vpop.permute.xlu0 %3217 }
 0xe3f   : > { %650 = vperm.xlu0 %9188, %v632_v51  }
 0xe40   : > { %9190 = vset.pattern.permute.xlu1 %v12004_v1 }
 0xe41   : > { %3160 = vperm.xlu1 %9190, %v3086_v34   ;;  %v10613_v5 = vpop.permute.xlu0 %3233 }
 0xe43   : > { %655 = vperm.xlu0 %9188, %v633_v54  }
 0xe45   : > { %9191 = vset.pattern.permute.xlu1 %v9554_v9  ;;  %v9233_v9 = vld [vmem:[%s11990_s11] sm:$0xff]  }
 0xe46   : > { %3245 = vperm.xlu1 %9191, %v10546_v59   ;;  %8406 = vmatprep.mubr.bf16.mxu0 %v9233_v9 }
 0xe47   : > { %660 = vperm.xlu0 %9188, %v634_v46  }
 0xe4a   : > { %9192 = vset.pattern.permute.xlu1 %v9555_v56 }
 0xe4b   : > { %665 = vperm.xlu0 %9188, %v635_v50   ;;  %3305 = vperm.xlu1 %9192, %v10426_v47   ;;  %v640_v47 = vld [vmem:[%s10529_s24 + $0x40] sm:$0xff] }
 0xe4f   : > { %670 = vperm.xlu0 %9188, %v636_v14   ;;  %3309 = vperm.xlu1 %9192, %v10420_v24   ;;  %v3190_v24 = vpop.permute.xlu1 %3189 }
 0xe53   : > { %675 = vperm.xlu0 %9188, %v637_v7   ;;  %3313 = vperm.xlu1 %9192, %v10440_v43   ;;  %v643_v43 = vld [vmem:[%s10529_s24 + $0x58] sm:$0xff] }
 0xe57   : > { %680 = vperm.xlu0 %9188, %v638_v31   ;;  %3317 = vperm.xlu1 %9192, %v10434_v27   ;;  %v3194_v27 = vpop.permute.xlu1 %3193 }
 0xe5b   : > { %685 = vperm.xlu0 %9188, %v639_v19   ;;  %3321 = vperm.xlu1 %9192, %v10452_v63   ;;  %v10573_v63 = vld [vmem:[%s11983_s4 + $0x40] sm:$0xff] }
 0xe5f   : > { %690 = vperm.xlu0 %9188, %v640_v47   ;;  %3325 = vperm.xlu1 %9192, %v10446_v11   ;;  %v3198_v11 = vpop.permute.xlu1 %3197 }
 0xe63   : > { %695 = vperm.xlu0 %9188, %v641_v57   ;;  %3329 = vperm.xlu1 %9192, %v10464_v44   ;;  %v10580_v44 = vld [vmem:[%s11983_s4 + $0x48] sm:$0xff]  ;;  %v3206_v28 = vpop.permute.xlu1 %3205 }
 0xe67   : > { %700 = vperm.xlu0 %9188, %v642_v20   ;;  %3333 = vperm.xlu1 %9192, %v10458_v17   ;;  %v646_v17 = vld [vmem:[%s10529_s24 + $0x70] sm:$0xff]  ;;  %v3210_v26 = vpop.permute.xlu1 %3209 }
 0xe6b   : > { %705 = vperm.xlu0 %9188, %v643_v43   ;;  %3337 = vperm.xlu1 %9192, %v10573_v63   ;;  %v3214_v45 = vpop.permute.xlu1 %3213 }
 0xe6f   : > { %710 = vperm.xlu0 %9188, %v644_v55   ;;  %3341 = vperm.xlu1 %9192, %v10580_v44   ;;  %v3222_v6 = vpop.permute.xlu1 %3221 }
 0xe73   : > { %715 = vperm.xlu0 %9188, %v645_v23   ;;  %3345 = vperm.xlu1 %9192, %v10587_v48   ;;  %v3226_v3 = vpop.permute.xlu1 %3225 }
 0xe77   : > { %720 = vperm.xlu0 %9188, %v646_v17   ;;  %3349 = vperm.xlu1 %9192, %v10594_v53   ;;  %v3230_v2 = vpop.permute.xlu1 %3229 }
 0xe7b   : > { %725 = vperm.xlu0 %9188, %v647_v52   ;;  %3353 = vperm.xlu1 %9192, %v10600_v0   ;;  %v10611_v13 = vpop.permute.xlu1 %3237 }
 0xe7f   : > { %3357 = vperm.xlu1 %9192, %v10606_v35  }
 0xe83   : > { %3361 = vperm.xlu1 %9192, %v10535_v49  }
 0xe87   : > { %3365 = vperm.xlu1 %9192, %v10546_v59  }
 0xe9d   : > { %v3096_v38 = vpop.permute.xlu1 %3095 }
 0xe9e   : > { %v3169_v36 = vmul.f32 %v3096_v38, %v10312_v37  ;;  %v3091_v39 = vpop.permute.xlu0 %3090 }
 0xe9f   : > { %v3168_v51 = vmul.f32 %v3091_v39, %v10315_v58 }
 0xea0   : > { %v3249_v34 = vadd.f32 %v3190_v24, %v3169_v36 }
 0xea1   : > { %v3248_v54 = vadd.f32 %v3186_v12, %v3168_v51 }
 0xea2   : > { %v3265_v46 = vmax.f32 %v3249_v34, 0.0  ;;  %v3101_v50 = vpop.permute.xlu1 %3100  ;;  %v3106_v56 = vpop.permute.xlu0 %3105 }
 0xea3   : > { %v3264_v14 = vmax.f32 %v3248_v54, 0.0  ;;  %v3170_v9 = vmul.f32 %v3101_v50, %v10322_v15  ;;  %v3171_v7 = vmul.f32 %v3106_v56, %v10329_v18 }
 0xea5   : > { %v3250_v31 = vadd.f32 %v3194_v27, %v3170_v9  ;;  %v3251_v19 = vadd.f32 %v3198_v11, %v3171_v7  ;;  %v3296_v47 = vpack.c.bf16 %v3265_v46, %v3264_v14 }
 0xea6   : > { %v3116_v57 = vpop.permute.xlu1 %3115  ;;  %v3111_v20 = vpop.permute.xlu0 %3110 }
 0xea7   : > { %v3266_v43 = vmax.f32 %v3250_v31, 0.0  ;;  %v3267_v37 = vmax.f32 %v3251_v19, 0.0  ;;  %v3173_v55 = vmul.f32 %v3116_v57, %v10340_v25  ;;  %v3172_v58 = vmul.f32 %v3111_v20, %v10332_v62  ;;  %8390 = vmatprep.subr.bf16.mxu0 %v3296_v47 }
 0xea8   : > { %8391 = vmatpush3.bf16.msra.mxu0 %v3296_v47 }
 0xea9   : > { %v3253_v24 = vadd.f32 %v3206_v28, %v3173_v55  ;;  %v3252_v23 = vadd.f32 %v3202_v8, %v3172_v58  ;;  %v3297_v17 = vpack.c.bf16 %v3267_v37, %v3266_v43 }
 0xeaa   : > { %v3121_v52 = vpop.permute.xlu1 %3120  ;;  %v3126_v15 = vpop.permute.xlu0 %3125 }
 0xeab   : > { %v3269_v12 = vmax.f32 %v3253_v24, 0.0  ;;  %v3268_v18 = vmax.f32 %v3252_v23, 0.0  ;;  %v3174_v27 = vmul.f32 %v3121_v52, %v10343_v30  ;;  %v3175_v11 = vmul.f32 %v3126_v15, %v10352_v21  ;;  %8392 = vmatprep.subr.bf16.mxu0 %v3297_v17  ;;  %v9234_v52 = vld [vmem:[%s11990_s11 + $0x8] sm:$0xff]   ;;  %v9235_v15 = vld [vmem:[%s11990_s11 + $0x10] sm:$0xff]  }
 0xeac   : > { %8393 = vmatpush3.bf16.msra.mxu0 %v3297_v17 }
 0xead   : > { %v3254_v38 = vadd.f32 %v3210_v26, %v3174_v27  ;;  %v3255_v36 = vadd.f32 %v3214_v45, %v3175_v11  ;;  %v3298_v25 = vpack.c.bf16 %v3269_v12, %v3268_v18  ;;  %v9238_v12 = vld [vmem:[%s11990_s11 + $0x28] sm:$0xff]   ;;  %v9239_v18 = vld [vmem:[%s11990_s11 + $0x30] sm:$0xff]   ;;  %v9240_v27 = vld [vmem:[%s11990_s11 + $0x38] sm:$0xff]  }
 0xeae   : > { %v3136_v39 = vpop.permute.xlu1 %3135  ;;  %v3131_v62 = vpop.permute.xlu0 %3130 }
 0xeaf   : > { %v3270_v51 = vmax.f32 %v3254_v38, 0.0  ;;  %v3271_v34 = vmax.f32 %v3255_v36, 0.0  ;;  %v3177_v28 = vmul.f32 %v3136_v39, %v10364_v60  ;;  %v3176_v8 = vmul.f32 %v3131_v62, %v10355_v22  ;;  %8394 = vmatprep.subr.bf16.mxu0 %v3298_v25 }
 0xeb0   : > { %8395 = vmatpush3.bf16.msra.mxu0 %v3298_v25 }
 0xeb1   : > { %v3257_v54 = vadd.f32 %v3222_v6, %v3177_v28  ;;  %v3256_v46 = vadd.f32 %v3218_v10, %v3176_v8  ;;  %v3299_v30 = vpack.c.bf16 %v3271_v34, %v3270_v51 }
 0xeb2   : > { %v3141_v50 = vpop.permute.xlu1 %3140  ;;  %v3146_v21 = vpop.permute.xlu0 %3145 }
 0xeb3   : > { %v3273_v56 = vmax.f32 %v3257_v54, 0.0  ;;  %v3272_v14 = vmax.f32 %v3256_v46, 0.0  ;;  %v3178_v26 = vmul.f32 %v3141_v50, %v10367_v29  ;;  %v3179_v45 = vmul.f32 %v3146_v21, %v10376_v61  ;;  %8396 = vmatprep.subr.bf16.mxu0 %v3299_v30 }
 0xeb4   : > { %8397 = vmatpush3.bf16.msra.mxu0 %v3299_v30 }
 0xeb5   : > { %v3258_v9 = vadd.f32 %v3226_v3, %v3178_v26  ;;  %v3259_v7 = vadd.f32 %v3230_v2, %v3179_v45  ;;  %v3300_v60 = vpack.c.bf16 %v3273_v56, %v3272_v14 }
 0xeb6   : > { %v3156_v31 = vpop.permute.xlu1 %3155  ;;  %v3151_v22 = vpop.permute.xlu0 %3150 }
 0xeb7   : > { %v3274_v19 = vmax.f32 %v3258_v9, 0.0  ;;  %v3275_v47 = vmax.f32 %v3259_v7, 0.0  ;;  %v3181_v6 = vmul.f32 %v3156_v31, %v10388_v4  ;;  %v3180_v10 = vmul.f32 %v3151_v22, %v10379_v33  ;;  %8398 = vmatprep.subr.bf16.mxu0 %v3300_v60  ;;  %v7618_v7 = vld [vmem:[%s10673_s2 + $0x8] sm:$0xff]   ;;  %v7587_v31 = vld [vmem:[%s10673_s2] sm:$0xff]  }
 0xeb8   : > { %8399 = vmatpush3.bf16.msra.mxu0 %v3300_v60 }
 0xeb9   : > { %v3261_v57 = vadd.f32 %v10611_v13, %v3181_v6  ;;  %v3260_v29 = vadd.f32 %v10613_v5, %v3180_v10  ;;  %v3301_v61 = vpack.c.bf16 %v3275_v47, %v3274_v19  ;;  %v7592_v19 = vunpack.c.l.bf16 %v7618_v7 }
 0xeba   : > { %v3166_v55 = vpop.permute.xlu0 %3165  ;;  %v7588_v47 = vunpack.c.l.bf16 %v7587_v31  ;;  %v7593_v6 = vunpack.c.h.bf16 %v7618_v7  ;;  %v7589_v10 = vunpack.c.h.bf16 %v7587_v31  ;;  %v7622_v31 = vld [vmem:[%s10673_s2 + $0x28] sm:$0xff]  }
 0xebb   : > { %v3277_v20 = vmax.f32 %v3261_v57, 0.0  ;;  %v3276_v43 = vmax.f32 %v3260_v29, 0.0  ;;  %v3242_v3 = vpop.permute.xlu1 %3241  ;;  %8400 = vmatprep.subr.bf16.mxu0 %v3301_v61  ;;  %v3183_v33 = vmul.f32 %v3166_v55, %v10400_v32  ;;  %v9237_v32 = vld [vmem:[%s11990_s11 + $0x20] sm:$0xff]  }
 0xebc   : > { %8401 = vmatpush3.bf16.msra.mxu0 %v3301_v61 }
 0xebd   : > { %v3302_v2 = vpack.c.bf16 %v3277_v20, %v3276_v43 }
 0xebe   : > { %v651_v11 = vpop.permute.xlu0 %650 }
 0xebf   : > { %8402 = vmatprep.subr.bf16.mxu0 %v3302_v2 }
 0xec0   : > { %v3161_v37 = vpop.permute.xlu1 %3160  ;;  %8403 = vmatpush3.bf16.msra.mxu0 %v3302_v2  ;;  %v7620_v2 = vld [vmem:[%s10673_s2 + $0x18] sm:$0xff]  }
 0xec1   : > { %v3182_v4 = vmul.f32 %v3161_v37, %v10391_v40  ;;  %v9236_v40 = vld [vmem:[%s11990_s11 + $0x18] sm:$0xff]  }
 0xec2   : > { %v656_v36 = vpop.permute.xlu0 %655 }
 0xec3   : > { %v3262_v58 = vadd.f32 %v3242_v3, %v3182_v4  ;;  %v728_v3 = vadd.f32 %v7588_v47, %v651_v11  ;;  %v7601_v11 = vunpack.c.h.bf16 %v7620_v2 }
 0xec5   : > { %v3246_v24 = vpop.permute.xlu1 %3245  ;;  %v3278_v23 = vmax.f32 %v3262_v58, 0.0  ;;  %v7619_v58 = vld [vmem:[%s10673_s2 + $0x10] sm:$0xff]  }
 0xec6   : > { %v3263_v13 = vadd.f32 %v3246_v24, %v3183_v33  ;;  %v661_v39 = vpop.permute.xlu0 %660 }
 0xec7   : > { %v730_v61 = vadd.f32 %v7592_v19, %v661_v39 }
 0xec8   : > { %v3279_v5 = vmax.f32 %v3263_v13, 0.0 }
 0xeca   : > { %v3303_v17 = vpack.c.bf16 %v3279_v5, %v3278_v23  ;;  %v3306_v38 = vpop.permute.xlu1 %3305  ;;  %v666_v51 = vpop.permute.xlu0 %665  ;;  %v729_v5 = vadd.f32 %v7589_v10, %v656_v36 }
 0xecb   : > { %v731_v33 = vadd.f32 %v7593_v6, %v666_v51 }
 0xecc   : > { %8404 = vmatprep.subr.bf16.mxu0 %v3303_v17 }
 0xecd   : > { %8405 = vmatpush3.bf16.msra.mxu0 %v3303_v17 }
 0xece   : > { %8972 = vmatprep.subr.bf16.mxu0 %v9547_v41  ;;  %v3310_v25 = vpop.permute.xlu1 %3309  ;;  %v671_v28 = vpop.permute.xlu0 %670 }
 0xed0   : > { %8407 = vmatmul.mubr.bf16.vlgmr.msra.gmra.mrb[60].mxu0 %v9234_v52 }
 0xed1   : > { %8410 = vmatprep.mubr.bf16.mxu0 %v9235_v15  ;;  %v7600_v15 = vunpack.c.l.bf16 %v7620_v2 }
 0xed2   : > { %v3314_v62 = vpop.permute.xlu1 %3313  ;;  %v10657_v54 = vpop.permute.xlu0 %675 }
 0xed6   : > { %v3318_v34 = vpop.permute.xlu1 %3317  ;;  %v681_v30 = vpop.permute.xlu0 %680 }
 0xed8   : > { %8411 = vmatmul.mubr.bf16.gmra.mrb[64].mxu0 %v9236_v40 }
 0xed9   : > { %8414 = vmatprep.mubr.bf16.mxu0 %v9237_v32  ;;  %v7596_v32 = vunpack.c.l.bf16 %v7619_v58 }
 0xeda   : > { %v3322_v8 = vpop.permute.xlu1 %3321  ;;  %v686_v21 = vpop.permute.xlu0 %685 }
 0xedb   : > { %v732_v7 = vadd.f32 %v7596_v32, %v671_v28  ;;  %v735_v10 = vadd.f32 %v7601_v11, %v686_v21 }
 0xede   : > { %v10659_v46 = vpop.permute.xlu1 %3325  ;;  %v10661_v14 = vpop.permute.xlu0 %690 }
 0xee0   : > { %8415 = vmatmul.mubr.bf16.gmra.mrb[68].mxu0 %v9238_v12 }
 0xee1   : > { %8418 = vmatprep.mubr.bf16.mxu0 %v9239_v18 }
 0xee2   : > { %v3330_v50 = vpop.permute.xlu1 %3329  ;;  %v10665_v45 = vpop.permute.xlu0 %695 }
 0xee6   : > { %v3334_v56 = vpop.permute.xlu1 %3333  ;;  %v10676_v60 = vpop.permute.xlu0 %700 }
 0xee8   : > { %8419 = vmatmul.mubr.bf16.gmra.mrb[72].mxu0 %v9240_v27 }
 0xee9   : > { %8482 = vmatprep.mubr.msk.f32.mxu0 %vm9548_vm3, %v9549_v42 }
 0xeea   : > { %v10663_v26 = vpop.permute.xlu1 %3337  ;;  %v10681_v57 = vpop.permute.xlu0 %705 }
 0xeee   : > { %v10668_v9 = vpop.permute.xlu1 %3341  ;;  %v10693_v12 = vpop.permute.xlu0 %710 }
 0xef2   : > { %v10679_v22 = vpop.permute.xlu1 %3345 }
 0xef6   : > { %v10684_v37 = vpop.permute.xlu1 %3349 }
 0xefa   : > { %v10701_v36 = vpop.permute.xlu1 %3353 }
 0xfa3   : > { %v8408_v29 = vpop.f32.mrb[60].mxu0 }
 0xfa4   : > { %v3459_v20 = vadd.f32 %v8408_v29, %v3314_v62  ;;  %v3450_v43 = vpop.f32.mrb[61].mxu0  ;;  %v734_v62 = vadd.f32 %v7600_v15, %v681_v30  ;;  %v7621_v29 = vld [vmem:[%s10673_s2 + $0x20] sm:$0xff]   ;;  %v7624_v15 = vld [vmem:[%s10673_s2 + $0x38] sm:$0xff]  }
 0xfa5   : > { %v3451_v55 = vadd.f32 %v3450_v43, %v3306_v38  ;;  %v8409_v4 = vpop.f32.mrb[62].mxu0  ;;  %v7597_v38 = vunpack.c.h.bf16 %v7619_v58  ;;  %v7604_v21 = vunpack.c.l.bf16 %v7621_v29 }
 0xfa6   : > { %v10687_v24 = vadd.f32 %v3459_v20, %v730_v61  ;;  %v3462_v13 = vadd.f32 %v8409_v4, %v3318_v34  ;;  %v3453_v23 = vpop.f32.mrb[63].mxu0  ;;  %v7609_v4 = vunpack.c.h.bf16 %v7622_v31 }
 0xfa7   : > { %v10689_v17 = vadd.f32 %v3451_v55, %v728_v3  ;;  %v3454_v52 = vadd.f32 %v3453_v23, %v3310_v25  ;;  %v733_v30 = vadd.f32 %v7597_v38, %v10657_v54  ;;  %v10725_v55 = vpop.permute.xlu1 %3357 }
 0xfa8   : > { %v10691_v40 = vadd.f32 %v3462_v13, %v731_v33  ;;  %v3761_v6 = vsel %vm911_vm2, %v10687_v24, -inf  ;;  %v7605_v33 = vunpack.c.h.bf16 %v7621_v29 }
 0xfa9   : > { %v10695_v18 = vadd.f32 %v3454_v52, %v729_v5  ;;  %8426 = vmatprep.mubr.msk.f32.mxu1 %vm911_vm2, %v10689_v17  ;;  %v3755_v27 = vsel %vm911_vm2, %v10689_v17, -inf  ;;  %v736_v52 = vadd.f32 %v7604_v21, %v10661_v14 }
 0xfaa   : > { %3756 = vmax.xlane.f32.xlu0 %v3755_v27  ;;  %v3764_v54 = vsel %vm911_vm2, %v10691_v40, -inf  ;;  %v737_v14 = vadd.f32 %v7605_v33, %v10665_v45 }
 0xfab   : > { %v8412_v25 = vpop.f32.mrb[64].mxu0  ;;  %8427 = vmatmul.mubr.msk.f32.vlgmr.msra.gmra.mrb[68].mxu1 %vm911_vm2, %v10695_v18  ;;  %v3758_v39 = vsel %vm911_vm2, %v10695_v18, -inf }
 0xfac   : > { %v3475_v51 = vadd.f32 %v8412_v25, %v3330_v50  ;;  %v3466_v34 = vpop.f32.mrb[65].mxu0  ;;  %3759 = vmax.xlane.f32.xlu1 %v3758_v39  ;;  %8429 = vmatprep.mubr.msk.f32.mxu1 %vm911_vm2, %v10687_v24  ;;  %v10716_v50 = vpop.permute.xlu0 %715 }
 0xfad   : > { %v3467_v19 = vadd.f32 %v3466_v34, %v3322_v8  ;;  %v8413_v47 = vpop.f32.mrb[66].mxu0  ;;  %v7608_v8 = vunpack.c.l.bf16 %v7622_v31  ;;  %v7616_v31 = vunpack.c.l.bf16 %v7624_v15 }
 0xfae   : > { %v10713_v61 = vadd.f32 %v3475_v51, %v734_v62  ;;  %v3478_v20 = vadd.f32 %v8413_v47, %v3334_v56  ;;  %v3469_v43 = vpop.f32.mrb[67].mxu0  ;;  %3762 = vmax.xlane.f32.xlu0 %v3761_v6  ;;  %v7617_v6 = vunpack.c.h.bf16 %v7624_v15 }
 0xfaf   : > { %v10718_v3 = vadd.f32 %v3467_v19, %v732_v7  ;;  %v3470_v28 = vadd.f32 %v3469_v43, %v10659_v46  ;;  %8430 = vmatmul.mubr.msk.f32.gmra.mrb[70].mxu1 %vm911_vm2, %v10691_v40  ;;  %v738_v13 = vadd.f32 %v7608_v8, %v10676_v60  ;;  %v739_v60 = vadd.f32 %v7609_v4, %v10681_v57 }
 0xfb0   : > { %v10723_v2 = vadd.f32 %v3478_v20, %v735_v10  ;;  %v721_v32 = vpop.permute.xlu0 %720  ;;  %v3773_v25 = vsel %vm911_vm2, %v10713_v61, -inf }
 0xfb1   : > { %v10727_v56 = vadd.f32 %v3470_v28, %v733_v30  ;;  %8432 = vmatprep.mubr.msk.f32.mxu1 %vm911_vm2, %v10718_v3  ;;  %v3767_v46 = vsel %vm911_vm2, %v10718_v3, -inf  ;;  %v742_v20 = vadd.f32 %v7616_v31, %v721_v32 }
 0xfb2   : > { %3765 = vmax.xlane.f32.xlu0 %v3764_v54  ;;  %3768 = vmax.xlane.f32.xlu1 %v3767_v46  ;;  %v3776_v45 = vsel %vm911_vm2, %v10723_v2, -inf }
 0xfb3   : > { %v8416_v58 = vpop.f32.mrb[68].mxu0  ;;  %8433 = vmatmul.mubr.msk.f32.gmra.mrb[72].mxu1 %vm911_vm2, %v10727_v56  ;;  %v3770_v38 = vsel %vm911_vm2, %v10727_v56, -inf }
 0xfb4   : > { %v3491_v23 = vadd.f32 %v8416_v58, %v10679_v22  ;;  %v3482_v5 = vpop.f32.mrb[69].mxu0  ;;  %8435 = vmatprep.mubr.msk.f32.mxu1 %vm911_vm2, %v10713_v61  ;;  %v7623_v22 = vld [vmem:[%s10673_s2 + $0x30] sm:$0xff]   ;;  %v726_v10 = vpop.permute.xlu0 %725  ;;  %s7455_s2 = sld [smem:[#allocation3 + $0x1]] }
 0xfb5   : > { %v3483_v27 = vadd.f32 %v3482_v5, %v10663_v26  ;;  %v8417_v11 = vpop.f32.mrb[70].mxu0  ;;  %v3362_v26 = vpop.permute.xlu1 %3361  ;;  %v7612_v19 = vunpack.c.l.bf16 %v7623_v22  ;;  %v743_v33 = vadd.f32 %v7617_v6, %v726_v10 }
 0xfb6   : > { %v10750_v39 = vadd.f32 %v3491_v23, %v738_v13  ;;  %v3494_v62 = vadd.f32 %v8417_v11, %v10684_v37  ;;  %v3485_v51 = vpop.f32.mrb[71].mxu0  ;;  %3771 = vmax.xlane.f32.xlu0 %v3770_v38  ;;  %3774 = vmax.xlane.f32.xlu1 %v3773_v25  ;;  %v9556_v38 = vmov 7   ;;  %v10812_v25 = vld [vmem:[%s11983_s4] sm:$0xff] }
 0xfb7   : > { %v10754_v34 = vadd.f32 %v3483_v27, %v736_v52  ;;  %v3486_v7 = vadd.f32 %v3485_v51, %v10668_v9  ;;  %8436 = vmatmul.mubr.msk.f32.gmra.mrb[74].mxu1 %vm911_vm2, %v10723_v2  ;;  %v7613_v9 = vunpack.c.h.bf16 %v7623_v22  ;;  %v740_v28 = vadd.f32 %v7612_v19, %v10693_v12  ;;  %9193 = vset.pattern.permute.xlu1 %v9556_v38 }
 0xfb8   : > { %v10759_v57 = vadd.f32 %v3494_v62, %v739_v60  ;;  %v3785_v4 = vsel %vm911_vm2, %v10750_v39, -inf }
 0xfb9   : > { %v10761_v47 = vadd.f32 %v3486_v7, %v737_v14  ;;  %8438 = vmatprep.mubr.msk.f32.mxu1 %vm911_vm2, %v10754_v34  ;;  %v3779_v37 = vsel %vm911_vm2, %v10754_v34, -inf  ;;  %v3366_v8 = vpop.permute.xlu1 %3365  ;;  %v741_v5 = vadd.f32 %v7613_v9, %v10716_v50 }
 0xfba   : > { %3777 = vmax.xlane.f32.xlu0 %v3776_v45  ;;  %3780 = vmax.xlane.f32.xlu1 %v3779_v37  ;;  %v3788_v32 = vsel %vm911_vm2, %v10759_v57, -inf }
 0xfbb   : > { %v8420_v29 = vpop.f32.mrb[72].mxu0  ;;  %8439 = vmatmul.mubr.msk.f32.gmra.mrb[76].mxu1 %vm911_vm2, %v10761_v47  ;;  %v3782_v46 = vsel %vm911_vm2, %v10761_v47, -inf }
 0xfbc   : > { %v3507_v43 = vadd.f32 %v8420_v29, %v3362_v26  ;;  %v3498_v30 = vpop.f32.mrb[73].mxu0  ;;  %8441 = vmatprep.mubr.msk.f32.mxu1 %vm911_vm2, %v10750_v39 }
 0xfbd   : > { %v3499_v21 = vadd.f32 %v3498_v30, %v10701_v36  ;;  %v8421_v54 = vpop.f32.mrb[74].mxu0 }
 0xfbe   : > { %v10779_v58 = vadd.f32 %v3507_v43, %v742_v20  ;;  %v3510_v13 = vadd.f32 %v8421_v54, %v3366_v8  ;;  %v3501_v23 = vpop.f32.mrb[75].mxu0  ;;  %3783 = vmax.xlane.f32.xlu0 %v3782_v46  ;;  %3786 = vmax.xlane.f32.xlu1 %v3785_v4 }
 0xfbf   : > { %v10782_v12 = vadd.f32 %v3499_v21, %v740_v28  ;;  %v3502_v36 = vadd.f32 %v3501_v23, %v10725_v55  ;;  %8442 = vmatmul.mubr.msk.f32.gmra.mrb[78].mxu1 %vm911_vm2, %v10759_v57 }
 0xfc0   : > { %v10787_v52 = vadd.f32 %v3510_v13, %v743_v33  ;;  %v3797_v27 = vsel %vm911_vm2, %v10779_v58, -inf }
 0xfc1   : > { %v10789_v15 = vadd.f32 %v3502_v36, %v741_v5  ;;  %8444 = vmatprep.mubr.msk.f32.mxu1 %vm911_vm2, %v10782_v12  ;;  %v3791_v50 = vsel %vm911_vm2, %v10782_v12, -inf }
 0xfc2   : > { %3789 = vmax.xlane.f32.xlu0 %v3788_v32  ;;  %3792 = vmax.xlane.f32.xlu1 %v3791_v50  ;;  %v3800_v11 = vsel %vm911_vm2, %v10787_v52, -inf }
 0xfc3   : > { %8445 = vmatmul.mubr.msk.f32.gmra.mrb[80].mxu1 %vm911_vm2, %v10789_v15  ;;  %v3794_v55 = vsel %vm911_vm2, %v10789_v15, -inf }
 0xfc4   : > { %8447 = vmatprep.mubr.msk.f32.mxu1 %vm911_vm2, %v10779_v58 }
 0xfc6   : > { %3795 = vmax.xlane.f32.xlu0 %v3794_v55  ;;  %3798 = vmax.xlane.f32.xlu1 %v3797_v27 }
 0xfc7   : > { %8448 = vmatmul.mubr.msk.f32.gmra.mrb[82].mxu1 %vm911_vm2, %v10787_v52 }
 0xfca   : > { %3801 = vmax.xlane.f32.xlu0 %v3800_v11 }
 0xfd7   : > { %3838 = vperm.xlu1 %9193, %v10812_v25  }
0x1037   : > { %v3757_v60 = vpop.xlane.xlu0 %3756 }
0x1039   : > { %v3760_v51 = vpop.xlane.xlu1 %3759 }
0x103b   : > { %v3763_v22 = vpop.xlane.xlu0 %3762 }
0x103f   : > { %v3766_v62 = vpop.xlane.xlu0 %3765  ;;  %v3769_v19 = vpop.xlane.xlu1 %3768 }
0x1043   : > { %v3772_v26 = vpop.xlane.xlu0 %3771  ;;  %v3775_v20 = vpop.xlane.xlu1 %3774 }
0x1047   : > { %v3778_v29 = vpop.xlane.xlu0 %3777  ;;  %v3781_v5 = vpop.xlane.xlu1 %3780 }
0x104b   : > { %v3784_v4 = vpop.xlane.xlu0 %3783 }
0x107e   : > { %v8428_v14 = vpop.f32.mrb[68].mxu1 }
0x107f   : > { %v3723_v7 = vmul.f32 0.0625, %v8428_v14  ;;  %v3643_v31 = vpop.f32.mrb[69].mxu1 }
0x1080   : > { %v3722_v45 = vmul.f32 0.0625, %v3643_v31 }
0x1081   : > { %3740 = vst.msk [vmem:[#allocation2 + $0x8] sm:$0xff] %vm3738_vm6, %v3723_v7 }
0x1082   : > { %3805 = vst.msk [vmem:[#allocation2 + $0x8] sm:$0xff] %vm3803_vm7, %v3760_v51  ;;  %v8431_v37 = vpop.f32.mrb[70].mxu1  ;;  %v3787_v51 = vpop.xlane.xlu1 %3786 }
0x1083   : > { %3739 = vst.msk [vmem:[#allocation2] sm:$0xff] %vm3738_vm6, %v3722_v45  ;;  %v3725_v6 = vmul.f32 0.0625, %v8431_v37  ;;  %v3653_v9 = vpop.f32.mrb[71].mxu1 }
0x1084   : > { %3804 = vst.msk [vmem:[#allocation2] sm:$0xff] %vm3803_vm7, %v3757_v60  ;;  %v3724_v10 = vmul.f32 0.0625, %v3653_v9 }
0x1085   : > { %3742 = vst.msk [vmem:[#allocation2 + $0x18] sm:$0xff] %vm3738_vm6, %v3725_v6 }
0x1086   : > { %3807 = vst.msk [vmem:[#allocation2 + $0x18] sm:$0xff] %vm3803_vm7, %v3766_v62  ;;  %v8434_v43 = vpop.f32.mrb[72].mxu1 }
0x1087   : > { %3741 = vst.msk [vmem:[#allocation2 + $0x10] sm:$0xff] %vm3738_vm6, %v3724_v10  ;;  %v3727_v30 = vmul.f32 0.0625, %v8434_v43  ;;  %v3663_v28 = vpop.f32.mrb[73].mxu1 }
0x1088   : > { %3806 = vst.msk [vmem:[#allocation2 + $0x10] sm:$0xff] %vm3803_vm7, %v3763_v22  ;;  %v3726_v8 = vmul.f32 0.0625, %v3663_v28  ;;  %v3790_v22 = vpop.xlane.xlu0 %3789 }
0x1089   : > { %3744 = vst.msk [vmem:[#allocation2 + $0x28] sm:$0xff] %vm3738_vm6, %v3727_v30  ;;  %v3821_v21 = vld [vmem:[#allocation2 + $0x8] sm:$0xff]  ;;  %v3793_v30 = vpop.xlane.xlu1 %3792 }
0x108a   : > { %3809 = vst.msk [vmem:[#allocation2 + $0x28] sm:$0xff] %vm3803_vm7, %v3772_v26  ;;  %v8437_v54 = vpop.f32.mrb[74].mxu1 }
0x108b   : > { %3743 = vst.msk [vmem:[#allocation2 + $0x20] sm:$0xff] %vm3738_vm6, %v3726_v8  ;;  %v3820_v46 = vld [vmem:[#allocation2] sm:$0xff]  ;;  %v3729_v33 = vmul.f32 0.0625, %v8437_v54  ;;  %v3673_v13 = vpop.f32.mrb[75].mxu1 }
0x108c   : > { %3808 = vst.msk [vmem:[#allocation2 + $0x20] sm:$0xff] %vm3803_vm7, %v3769_v19  ;;  %v8973_v23 = vpack.c.bf16 %v3821_v21, %v3820_v46  ;;  %v3728_v36 = vmul.f32 0.0625, %v3673_v13  ;;  %v3796_v10 = vpop.xlane.xlu0 %3795 }
0x108d   : > { %3746 = vst.msk [vmem:[#allocation2 + $0x38] sm:$0xff] %vm3738_vm6, %v3729_v33  ;;  %v3823_v32 = vld [vmem:[#allocation2 + $0x18] sm:$0xff] }
0x108e   : > { %8974 = vmatpush3.bf16.msra.mxu0 %v8973_v23  ;;  %3811 = vst.msk [vmem:[#allocation2 + $0x38] sm:$0xff] %vm3803_vm7, %v3778_v29  ;;  %v8440_v50 = vpop.f32.mrb[76].mxu1 }
0x108f   : > { %3745 = vst.msk [vmem:[#allocation2 + $0x30] sm:$0xff] %vm3738_vm6, %v3728_v36  ;;  %8975 = vmatprep.subr.bf16.mxu0 %v9547_v41  ;;  %v3822_v55 = vld [vmem:[#allocation2 + $0x10] sm:$0xff]  ;;  %v3731_v27 = vmul.f32 0.0625, %v8440_v50  ;;  %v3683_v11 = vpop.f32.mrb[77].mxu1  ;;  %v3799_v36 = vpop.xlane.xlu1 %3798 }
0x1090   : > { %3810 = vst.msk [vmem:[#allocation2 + $0x30] sm:$0xff] %vm3803_vm7, %v3775_v20  ;;  %v8976_v38 = vpack.c.bf16 %v3823_v32, %v3822_v55  ;;  %v3730_v60 = vmul.f32 0.0625, %v3683_v11  ;;  %v3802_v23 = vpop.xlane.xlu0 %3801 }
0x1091   : > { %3748 = vst.msk [vmem:[#allocation2 + $0x48] sm:$0xff] %vm3738_vm6, %v3731_v27  ;;  %v3825_v62 = vld [vmem:[#allocation2 + $0x28] sm:$0xff] }
0x1092   : > { %8977 = vmatpush3.bf16.msra.mxu0 %v8976_v38  ;;  %3813 = vst.msk [vmem:[#allocation2 + $0x48] sm:$0xff] %vm3803_vm7, %v3784_v4  ;;  %v8443_v14 = vpop.f32.mrb[78].mxu1 }
0x1093   : > { %3747 = vst.msk [vmem:[#allocation2 + $0x40] sm:$0xff] %vm3738_vm6, %v3730_v60  ;;  %8978 = vmatprep.subr.bf16.mxu0 %v9547_v41  ;;  %v3824_v26 = vld [vmem:[#allocation2 + $0x20] sm:$0xff]  ;;  %v3733_v7 = vmul.f32 0.0625, %v8443_v14  ;;  %v3693_v31 = vpop.f32.mrb[79].mxu1  ;;  %v9557_v14 = vmov 8  }
0x1094   : > { %3812 = vst.msk [vmem:[#allocation2 + $0x40] sm:$0xff] %vm3803_vm7, %v3781_v5  ;;  %v8979_v19 = vpack.c.bf16 %v3825_v62, %v3824_v26  ;;  %v3732_v45 = vmul.f32 0.0625, %v3693_v31  ;;  %v3836_v62 = vld [vmem:[%s11991_s12] sm:$0xff]  ;;  %9195 = vset.pattern.permute.xlu1 %v9557_v14  ;;  %9194 = vset.pattern.permute.xlu0 %v9557_v14  ;;  %v10867_v26 = vld [vmem:[%s11983_s4 + $0x8] sm:$0xff]  ;;  %v10881_v31 = vld [vmem:[%s11983_s4 + $0x18] sm:$0xff] }
0x1095   : > { %3750 = vst.msk [vmem:[#allocation2 + $0x58] sm:$0xff] %vm3738_vm6, %v3733_v7  ;;  %v3827_v37 = vld [vmem:[#allocation2 + $0x38] sm:$0xff]  ;;  %3933 = vperm.xlu1 %9195, %v10867_v26   ;;  %3929 = vperm.xlu0 %9194, %v10812_v25   ;;  %v10874_v7 = vld [vmem:[%s11983_s4 + $0x10] sm:$0xff] }
0x1096   : > { %8980 = vmatpush3.bf16.msra.mxu0 %v8979_v19  ;;  %3815 = vst.msk [vmem:[#allocation2 + $0x58] sm:$0xff] %vm3803_vm7, %v3790_v22  ;;  %v8446_v6 = vpop.f32.mrb[80].mxu1  ;;  %v10888_v19 = vld [vmem:[%s11983_s4 + $0x20] sm:$0xff] }
0x1097   : > { %3749 = vst.msk [vmem:[#allocation2 + $0x50] sm:$0xff] %vm3738_vm6, %v3732_v45  ;;  %8981 = vmatprep.subr.bf16.mxu0 %v9547_v41  ;;  %v3826_v9 = vld [vmem:[#allocation2 + $0x30] sm:$0xff]  ;;  %v3735_v29 = vmul.f32 0.0625, %v8446_v6  ;;  %v3703_v20 = vpop.f32.mrb[81].mxu1 }
0x1098   : > { %3814 = vst.msk [vmem:[#allocation2 + $0x50] sm:$0xff] %vm3803_vm7, %v3787_v51  ;;  %v8982_v43 = vpack.c.bf16 %v3827_v37, %v3826_v9  ;;  %v3734_v28 = vmul.f32 0.0625, %v3703_v20  ;;  %v3912_v51 = vld [vmem:[%s11992_s13] sm:$0xff]  ;;  %v3919_v20 = vld [vmem:[%s11992_s13 + $0x38] sm:$0xff] }
0x1099   : > { %3752 = vst.msk [vmem:[#allocation2 + $0x68] sm:$0xff] %vm3738_vm6, %v3735_v29  ;;  %v3829_v8 = vld [vmem:[#allocation2 + $0x48] sm:$0xff]  ;;  %8487 = vmatprep.mubr.msk.f32.mxu1 %vm3992_vm8, %v3912_v51  ;;  %3937 = vperm.xlu1 %9195, %v10874_v7   ;;  %v3918_v29 = vld [vmem:[%s11992_s13 + $0x30] sm:$0xff] }
0x109a   : > { %8983 = vmatpush3.bf16.msra.mxu0 %v8982_v43  ;;  %3817 = vst.msk [vmem:[#allocation2 + $0x68] sm:$0xff] %vm3803_vm7, %v3796_v10  ;;  %v8449_v21 = vpop.f32.mrb[82].mxu1  ;;  %3965 = vperm.xlu0 %9194, %v10580_v44   ;;  %v10895_v44 = vld [vmem:[%s11983_s4 + $0x28] sm:$0xff]  ;;  %v3920_v43 = vld [vmem:[%s11992_s13 + $0x40] sm:$0xff] }
0x109b   : > { %3751 = vst.msk [vmem:[#allocation2 + $0x60] sm:$0xff] %vm3738_vm6, %v3734_v28  ;;  %8984 = vmatprep.subr.bf16.mxu0 %v9547_v41  ;;  %v3828_v54 = vld [vmem:[#allocation2 + $0x40] sm:$0xff]  ;;  %v3737_v46 = vmul.f32 0.0625, %v8449_v21  ;;  %v3713_v4 = vpop.f32.mrb[83].mxu1  ;;  %v3913_v10 = vld [vmem:[%s11992_s13 + $0x8] sm:$0xff]  ;;  %v3922_v28 = vld [vmem:[%s11992_s13 + $0x50] sm:$0xff] }
0x109c   : > { %3816 = vst.msk [vmem:[#allocation2 + $0x60] sm:$0xff] %vm3803_vm7, %v3793_v30  ;;  %v8985_v33 = vpack.c.bf16 %v3829_v8, %v3828_v54  ;;  %v3736_v13 = vmul.f32 0.0625, %v3713_v4  ;;  %v3921_v30 = vld [vmem:[%s11992_s13 + $0x48] sm:$0xff]  ;;  %v3923_v8 = vld [vmem:[%s11992_s13 + $0x58] sm:$0xff]  ;;  %v3924_v21 = vld [vmem:[%s11992_s13 + $0x60] sm:$0xff] }
0x109d   : > { %3754 = vst.msk [vmem:[#allocation2 + $0x78] sm:$0xff] %vm3738_vm6, %v3737_v46  ;;  %v3831_v5 = vld [vmem:[#allocation2 + $0x58] sm:$0xff]  ;;  %3941 = vperm.xlu1 %9195, %v10881_v31   ;;  %v3925_v54 = vld [vmem:[%s11992_s13 + $0x68] sm:$0xff]  ;;  %v3926_v46 = vld [vmem:[%s11992_s13 + $0x70] sm:$0xff] }
0x109e   : > { %8986 = vmatpush3.bf16.msra.mxu0 %v8985_v33  ;;  %3819 = vst.msk [vmem:[#allocation2 + $0x78] sm:$0xff] %vm3803_vm7, %v3802_v23  ;;  %3973 = vperm.xlu0 %9194, %v10594_v53   ;;  %v10902_v53 = vld [vmem:[%s11983_s4 + $0x30] sm:$0xff]  ;;  %v3927_v4 = vld [vmem:[%s11992_s13 + $0x78] sm:$0xff] }
0x109f   : > { %3753 = vst.msk [vmem:[#allocation2 + $0x70] sm:$0xff] %vm3738_vm6, %v3736_v13  ;;  %8987 = vmatprep.subr.bf16.mxu0 %v9547_v41  ;;  %v3830_v32 = vld [vmem:[#allocation2 + $0x50] sm:$0xff] }
0x10a0   : > { %3818 = vst.msk [vmem:[#allocation2 + $0x70] sm:$0xff] %vm3803_vm7, %v3799_v36  ;;  %v8988_v50 = vpack.c.bf16 %v3831_v5, %v3830_v32 }
0x10a1   : > { %v3833_v55 = vld [vmem:[#allocation2 + $0x68] sm:$0xff]  ;;  %3945 = vperm.xlu1 %9195, %v10888_v19  }
0x10a2   : > { %8989 = vmatpush3.bf16.msra.mxu0 %v8988_v50  ;;  %3981 = vperm.xlu0 %9194, %v10606_v35   ;;  %v10909_v35 = vld [vmem:[%s11983_s4 + $0x38] sm:$0xff] }
0x10a3   : > { %8990 = vmatprep.subr.bf16.mxu0 %v9547_v41  ;;  %v3832_v27 = vld [vmem:[#allocation2 + $0x60] sm:$0xff] }
0x10a4   : > { %v8991_v11 = vpack.c.bf16 %v3833_v55, %v3832_v27 }
0x10a5   : > { %v3835_v38 = vld [vmem:[#allocation2 + $0x78] sm:$0xff]  ;;  %3949 = vperm.xlu1 %9195, %v10895_v44  }
0x10a6   : > { %8992 = vmatpush3.bf16.msra.mxu0 %v8991_v11  ;;  %3989 = vperm.xlu0 %9194, %v10546_v59   ;;  %v3839_v59 = vpop.permute.xlu1 %3838 }
0x10a7   : > { %8993 = vmatprep.subr.bf16.mxu0 %v9547_v41  ;;  %v3834_v60 = vld [vmem:[#allocation2 + $0x70] sm:$0xff] }
0x10a8   : > { %v8994_v22 = vpack.c.bf16 %v3835_v38, %v3834_v60 }
0x10a9   : > { %3953 = vperm.xlu1 %9195, %v10902_v53  }
0x10aa   : > { %8995 = vmatpush3.bf16.msra.mxu0 %v8994_v22  ;;  %9196 = vset.pattern.permute.xlu0 %v12004_v1 }
0x10ab   : > { %8996 = vmatprep.subr.bf16.mxu0 %v9547_v41 }
0x10ad   : > { %8483 = vmatmul.mubr.f32.vlgmr.msra.gmra.mrb[76].mxu0 %v3836_v62  ;;  %3957 = vperm.xlu1 %9195, %v10909_v35  }
0x10ae   : > { %8543 = vmatprep.mubr.msk.f32.mxu0 %vm9548_vm3, %v9549_v42 }
0x10b1   : > { %3961 = vperm.xlu1 %9195, %v10573_v63   ;;  %v3914_v63 = vld [vmem:[%s11992_s13 + $0x10] sm:$0xff] }
0x10b5   : > { %3969 = vperm.xlu1 %9195, %v10587_v48   ;;  %v3916_v48 = vld [vmem:[%s11992_s13 + $0x20] sm:$0xff] }
0x10b9   : > { %3977 = vperm.xlu1 %9195, %v10600_v0   ;;  %v3917_v0 = vld [vmem:[%s11992_s13 + $0x28] sm:$0xff] }
0x10bd   : > { %3985 = vperm.xlu1 %9195, %v10535_v49   ;;  %v3915_v49 = vld [vmem:[%s11992_s13 + $0x18] sm:$0xff] }
0x10c1   : > { %9197 = vset.pattern.permute.xlu1 %v12004_v1 }
0x1114   : > { %v3934_v33 = vpop.permute.xlu1 %3933  ;;  %v3930_v55 = vpop.permute.xlu0 %3929 }
0x1118   : > { %v3938_v13 = vpop.permute.xlu1 %3937 }
0x111c   : > { %v3942_v23 = vpop.permute.xlu1 %3941 }
0x1120   : > { %v3946_v5 = vpop.permute.xlu1 %3945 }
0x1124   : > { %v3950_v36 = vpop.permute.xlu1 %3949 }
0x1128   : > { %v3954_v32 = vpop.permute.xlu1 %3953 }
0x112c   : > { %v3958_v22 = vpop.permute.xlu1 %3957 }
0x1180   : > { %v3907_v45 = vpop.f32.mrb[76].mxu0 }
0x1181   : > { %v3908_v37 = vadd.f32 %v3907_v45, %v3839_v59  ;;  %v8484_v6 = vpop.f32.mrb[77].mxu0 }
0x1182   : > { %v3966_v6 = vpop.permute.xlu0 %3965 }
0x1183   : > { %v3911_v9 = vmax.f32 %v3908_v37, 0.0 }
0x1185   : > { %8485 = vmatprep.subr.mxu1 %v3911_v9 }
0x1186   : > { %8486 = vmatpush3.msra.mxu1 %v3911_v9 }
0x1187   : > { %8488 = vmatmul.mubr.msk.f32.vlgmr.msra.gmra.mrb[84].mxu1 %vm3992_vm8, %v3913_v10  ;;  %v3962_v10 = vpop.permute.xlu1 %3961 }
0x1188   : > { %8490 = vmatprep.mubr.msk.f32.mxu1 %vm3992_vm8, %v3914_v63 }
0x118b   : > { %8491 = vmatmul.mubr.msk.f32.gmra.mrb[86].mxu1 %vm3992_vm8, %v3915_v49 }
0x118c   : > { %8493 = vmatprep.mubr.msk.f32.mxu1 %vm3992_vm8, %v3916_v48 }
0x118f   : > { %8494 = vmatmul.mubr.msk.f32.gmra.mrb[88].mxu1 %vm3992_vm8, %v3917_v0 }
0x1190   : > { %8496 = vmatprep.mubr.msk.f32.mxu1 %vm3992_vm8, %v3918_v29  ;;  %v3974_v29 = vpop.permute.xlu0 %3973 }
0x1193   : > { %8497 = vmatmul.mubr.msk.f32.gmra.mrb[90].mxu1 %vm3992_vm8, %v3919_v20 }
0x1194   : > { %8499 = vmatprep.mubr.msk.f32.mxu1 %vm3992_vm8, %v3920_v43  ;;  %v3970_v43 = vpop.permute.xlu1 %3969 }
0x1197   : > { %8500 = vmatmul.mubr.msk.f32.gmra.mrb[92].mxu1 %vm3992_vm8, %v3921_v30 }
0x1198   : > { %8502 = vmatprep.mubr.msk.f32.mxu1 %vm3992_vm8, %v3922_v28 }
0x119b   : > { %8503 = vmatmul.mubr.msk.f32.gmra.mrb[94].mxu1 %vm3992_vm8, %v3923_v8 }
0x119c   : > { %8505 = vmatprep.mubr.msk.f32.mxu1 %vm3992_vm8, %v3924_v21 }
0x119f   : > { %8506 = vmatmul.mubr.msk.f32.gmra.mrb[96].mxu1 %vm3992_vm8, %v3925_v54 }
0x11a0   : > { %8508 = vmatprep.mubr.msk.f32.mxu1 %vm3992_vm8, %v3926_v46 }
0x11a3   : > { %8509 = vmatmul.mubr.msk.f32.gmra.mrb[98].mxu1 %vm3992_vm8, %v3927_v4  ;;  %v3982_v4 = vpop.permute.xlu0 %3981 }
0x125a   : > { %v8489_v50 = vpop.f32.mrb[84].mxu1 }
0x125b   : > { %v4113_v27 = vadd.f32 %v8489_v50, %v3934_v33  ;;  %v4107_v11 = vpop.f32.mrb[85].mxu1  ;;  %v3990_v50 = vpop.permute.xlu0 %3989 }
0x125c   : > { %v4108_v38 = vadd.f32 %v4107_v11, %v3930_v55 }
0x125d   : > { %4204 = vrot.lane.b32.xlu0 %v4113_v27, %s12020_s18 }
0x125e   : > { %v8492_v60 = vpop.f32.mrb[86].mxu1  ;;  %4202 = vrot.lane.b32.xlu1 %v4108_v38, %s12020_s18 }
0x125f   : > { %v4123_v62 = vadd.f32 %v8492_v60, %v3942_v23  ;;  %v4117_v51 = vpop.f32.mrb[87].mxu1 }
0x1260   : > { %v4118_v14 = vadd.f32 %v4117_v51, %v3938_v13  ;;  %v3978_v13 = vpop.permute.xlu1 %3977 }
0x1261   : > { %4208 = vrot.lane.b32.xlu0 %v4123_v62, %s12020_s18 }
0x1262   : > { %v8495_v59 = vpop.f32.mrb[88].mxu1  ;;  %4206 = vrot.lane.b32.xlu1 %v4118_v14, %s12020_s18 }
0x1263   : > { %v4133_v45 = vadd.f32 %v8495_v59, %v3950_v36  ;;  %v4127_v37 = vpop.f32.mrb[89].mxu1 }
0x1264   : > { %v4128_v9 = vadd.f32 %v4127_v37, %v3946_v5  ;;  %v3986_v11 = vpop.permute.xlu1 %3985 }
0x1265   : > { %4212 = vrot.lane.b32.xlu0 %v4133_v45, %s12020_s18 }
0x1266   : > { %v8498_v63 = vpop.f32.mrb[90].mxu1  ;;  %4210 = vrot.lane.b32.xlu1 %v4128_v9, %s12020_s18 }
0x1267   : > { %v4143_v49 = vadd.f32 %v8498_v63, %v3958_v22  ;;  %v4137_v48 = vpop.f32.mrb[91].mxu1 }
0x1268   : > { %v4138_v0 = vadd.f32 %v4137_v48, %v3954_v32 }
0x1269   : > { %4216 = vrot.lane.b32.xlu0 %v4143_v49, %s12020_s18 }
0x126a   : > { %v8501_v20 = vpop.f32.mrb[92].mxu1  ;;  %4214 = vrot.lane.b32.xlu1 %v4138_v0, %s12020_s18 }
0x126b   : > { %v10985_v30 = vadd.f32 %v8501_v20, %v3966_v6  ;;  %v4147_v28 = vpop.f32.mrb[93].mxu1 }
0x126c   : > { %v10987_v8 = vadd.f32 %v4147_v28, %v3962_v10 }
0x126d   : > { %4220 = vrot.lane.b32.xlu0 %v10985_v30, %s12020_s18 }
0x126e   : > { %v8504_v21 = vpop.f32.mrb[94].mxu1  ;;  %4218 = vrot.lane.b32.xlu1 %v10987_v8, %s12020_s18 }
0x126f   : > { %v10993_v54 = vadd.f32 %v8504_v21, %v3974_v29  ;;  %v4157_v46 = vpop.f32.mrb[95].mxu1 }
0x1270   : > { %v10995_v33 = vadd.f32 %v4157_v46, %v3970_v43 }
0x1271   : > { %4224 = vrot.lane.b32.xlu0 %v10993_v54, %s12020_s18 }
0x1272   : > { %v8507_v23 = vpop.f32.mrb[96].mxu1  ;;  %4222 = vrot.lane.b32.xlu1 %v10995_v33, %s12020_s18 }
0x1273   : > { %v11001_v5 = vadd.f32 %v8507_v23, %v3982_v4  ;;  %v4167_v36 = vpop.f32.mrb[97].mxu1 }
0x1274   : > { %v11003_v32 = vadd.f32 %v4167_v36, %v3978_v13 }
0x1275   : > { %4228 = vrot.lane.b32.xlu0 %v11001_v5, %s12020_s18 }
0x1276   : > { %v8510_v55 = vpop.f32.mrb[98].mxu1  ;;  %4226 = vrot.lane.b32.xlu1 %v11003_v32, %s12020_s18 }
0x1277   : > { %v11009_v60 = vadd.f32 %v8510_v55, %v3990_v50  ;;  %v4177_v22 = vpop.f32.mrb[99].mxu1 }
0x1278   : > { %v11011_v51 = vadd.f32 %v4177_v22, %v3986_v11 }
0x1279   : > { %4232 = vrot.lane.b32.xlu0 %v11009_v60, %s12020_s18 }
0x127a   : > { %4230 = vrot.lane.b32.xlu1 %v11011_v51, %s12020_s18 }
0x12cf   : > { %v4205_v59 = vpop.permute.xlu0 %4204 }
0x12d0   : > { %v4251_v37 = vadd.f32 %v4205_v59, %v4113_v27  ;;  %v4203_v6 = vpop.permute.xlu1 %4202 }
0x12d1   : > { %v4250_v10 = vadd.f32 %v4203_v6, %v4108_v38 }
0x12d2   : > { %v7440_v63 = vmul.f32 -1.442695, %v4251_v37 }
0x12d3   : > { %v7439_v48 = vmul.f32 -1.442695, %v4250_v10  ;;  %v4209_v29 = vpop.permute.xlu0 %4208 }
0x12d4   : > { %9301 = vpow2.f32 %v7440_v63  ;;  %v4253_v20 = vadd.f32 %v4209_v29, %v4123_v62  ;;  %v4207_v43 = vpop.permute.xlu1 %4206 }
0x12d5   : > { %9303 = vpow2.f32 %v7439_v48  ;;  %v4252_v28 = vadd.f32 %v4207_v43, %v4118_v14 }
0x12d6   : > { %v7442_v21 = vmul.f32 -1.442695, %v4253_v20 }
0x12d7   : > { %v7441_v46 = vmul.f32 -1.442695, %v4252_v28  ;;  %v4213_v4 = vpop.permute.xlu0 %4212 }
0x12d8   : > { %9305 = vpow2.f32 %v7442_v21  ;;  %v4255_v13 = vadd.f32 %v4213_v4, %v4133_v45  ;;  %v4211_v23 = vpop.permute.xlu1 %4210 }
0x12d9   : > { %9307 = vpow2.f32 %v7441_v46  ;;  %v4254_v36 = vadd.f32 %v4211_v23, %v4128_v9 }
0x12da   : > { %v7444_v50 = vmul.f32 -1.442695, %v4255_v13 }
0x12db   : > { %v7443_v27 = vmul.f32 -1.442695, %v4254_v36  ;;  %v4217_v55 = vpop.permute.xlu0 %4216 }
0x12dc   : > { %9309 = vpow2.f32 %v7444_v50  ;;  %v4257_v38 = vadd.f32 %v4217_v55, %v4143_v49  ;;  %v4215_v11 = vpop.permute.xlu1 %4214 }
0x12dd   : > { %9311 = vpow2.f32 %v7443_v27  ;;  %v4256_v22 = vadd.f32 %v4215_v11, %v4138_v0 }
0x12de   : > { %v9302_v62 = vpop.eup %9301  ;;  %v7446_v59 = vmul.f32 -1.442695, %v4257_v38 }
0x12df   : > { %v9304_v37 = vpop.eup %9303  ;;  %v4315_v14 = vadd.f32 1.0, %v9302_v62  ;;  %v7445_v6 = vmul.f32 -1.442695, %v4256_v22  ;;  %v4221_v10 = vpop.permute.xlu0 %4220 }
0x12e0   : > { %v4314_v63 = vadd.f32 1.0, %v9304_v37  ;;  %9313 = vpow2.f32 %v7446_v59  ;;  %v4259_v45 = vadd.f32 %v4221_v10, %v10985_v30  ;;  %v4219_v48 = vpop.permute.xlu1 %4218 }
0x12e1   : > { %9315 = vrcp.f32 %v4315_v14  ;;  %v4258_v9 = vadd.f32 %v4219_v48, %v10987_v8 }
0x12e2   : > { %v9306_v29 = vpop.eup %9305  ;;  %9317 = vrcp.f32 %v4314_v63  ;;  %v7448_v49 = vmul.f32 -1.442695, %v4259_v45 }
0x12e3   : > { %v9308_v20 = vpop.eup %9307  ;;  %v4317_v43 = vadd.f32 1.0, %v9306_v29  ;;  %9319 = vpow2.f32 %v7445_v6  ;;  %v7447_v0 = vmul.f32 -1.442695, %v4258_v9  ;;  %v4225_v28 = vpop.permute.xlu0 %4224 }
0x12e4   : > { %v4316_v21 = vadd.f32 1.0, %v9308_v20  ;;  %9321 = vpow2.f32 %v7448_v49  ;;  %v4261_v46 = vadd.f32 %v4225_v28, %v10993_v54  ;;  %v4223_v4 = vpop.permute.xlu1 %4222 }
0x12e5   : > { %9323 = vrcp.f32 %v4317_v43  ;;  %v4260_v30 = vadd.f32 %v4223_v4, %v10995_v33 }
0x12e6   : > { %v9310_v13 = vpop.eup %9309  ;;  %v7450_v23 = vmul.f32 -1.442695, %v4261_v46  ;;  %9325 = vpow2.f32 %v7447_v0 }
0x12e7   : > { %v9312_v36 = vpop.eup %9311  ;;  %v7449_v8 = vmul.f32 -1.442695, %v4260_v30  ;;  %v4229_v50 = vpop.permute.xlu0 %4228  ;;  %9327 = vrcp.f32 %v4316_v21  ;;  %v4319_v27 = vadd.f32 1.0, %v9310_v13 }
0x12e8   : > { %v4318_v55 = vadd.f32 1.0, %v9312_v36  ;;  %v4263_v38 = vadd.f32 %v4229_v50, %v11001_v5  ;;  %v4227_v11 = vpop.permute.xlu1 %4226  ;;  %9329 = vpow2.f32 %v7450_v23 }
0x12e9   : > { %v4262_v22 = vadd.f32 %v4227_v11, %v11003_v32 }
0x12ea   : > { %v9314_v54 = vpop.eup %9313  ;;  %9331 = vrcp.f32 %v4318_v55  ;;  %v7452_v62 = vmul.f32 -1.442695, %v4263_v38 }
0x12eb   : > { %v9316_v59 = vpop.eup %9315  ;;  %9333 = vpow2.f32 %v7449_v8  ;;  %v7451_v33 = vmul.f32 -1.442695, %v4262_v22  ;;  %v4233_v37 = vpop.permute.xlu0 %4232  ;;  %v4321_v45 = vadd.f32 1.0, %v9314_v54 }
0x12ec   : > { %v9318_v14 = vpop.eup %9317  ;;  %9335 = vrcp.f32 %v4319_v27  ;;  %v4265_v6 = vadd.f32 %v4233_v37, %v11009_v60  ;;  %v4231_v10 = vpop.permute.xlu1 %4230  ;;  %4369 = vperm.xlu0 %9196, %v9316_v59  }
0x12ed   : > { %v9320_v63 = vpop.eup %9319  ;;  %9337 = vpow2.f32 %v7452_v62  ;;  %v4264_v5 = vadd.f32 %v4231_v10, %v11011_v51  ;;  %4364 = vperm.xlu1 %9197, %v9318_v14  }
0x12ee   : > { %v9322_v32 = vpop.eup %9321  ;;  %v4320_v48 = vadd.f32 1.0, %v9320_v63  ;;  %9339 = vpow2.f32 %v7451_v33  ;;  %v7454_v9 = vmul.f32 -1.442695, %v4265_v6 }
0x12ef   : > { %v9324_v29 = vpop.eup %9323  ;;  %v7453_v49 = vmul.f32 -1.442695, %v4264_v5  ;;  %v4323_v60 = vadd.f32 1.0, %v9322_v32 }
0x12f0   : > { %9341 = vrcp.f32 %v4320_v48  ;;  %v9326_v20 = vpop.eup %9325 }
0x12f1   : > { %9343 = vrcp.f32 %v4321_v45  ;;  %4379 = vperm.xlu1 %9197, %v9324_v29   ;;  %v9328_v43 = vpop.eup %9327  ;;  %v4322_v0 = vadd.f32 1.0, %v9326_v20 }
0x12f2   : > { %9345 = vpow2.f32 %v7454_v9  ;;  %v9330_v28 = vpop.eup %9329 }
0x12f3   : > { %9347 = vpow2.f32 %v7453_v49  ;;  %v4325_v4 = vadd.f32 1.0, %v9330_v28 }
0x12f4   : > { %v9332_v21 = vpop.eup %9331  ;;  %9349 = vrcp.f32 %v4322_v0 }
0x12f5   : > { %v9334_v51 = vpop.eup %9333  ;;  %4384 = vperm.xlu0 %9196, %v9332_v21   ;;  %4374 = vperm.xlu1 %9197, %v9328_v43   ;;  %9351 = vrcp.f32 %v4323_v60 }
0x12f6   : > { %v9336_v46 = vpop.eup %9335  ;;  %v4324_v30 = vadd.f32 1.0, %v9334_v51 }
0x12f7   : > { %v9338_v13 = vpop.eup %9337 }
0x12f8   : > { %v9340_v23 = vpop.eup %9339  ;;  %9353 = vrcp.f32 %v4324_v30  ;;  %v4327_v50 = vadd.f32 1.0, %v9338_v13 }
0x12f9   : > { %v4326_v36 = vadd.f32 1.0, %v9340_v23  ;;  %4389 = vperm.xlu1 %9197, %v9336_v46   ;;  %9355 = vrcp.f32 %v4325_v4 }
0x12fa   : > { %v9342_v8 = vpop.eup %9341 }
0x12fb   : > { %v9344_v27 = vpop.eup %9343  ;;  %9357 = vrcp.f32 %v4326_v36  ;;  %4394 = vperm.xlu0 %9196, %v9342_v8  }
0x12fc   : > { %v9346_v55 = vpop.eup %9345  ;;  %9359 = vrcp.f32 %v4327_v50 }
0x12fd   : > { %v9348_v38 = vpop.eup %9347  ;;  %4399 = vperm.xlu1 %9197, %v9344_v27   ;;  %v4329_v22 = vadd.f32 1.0, %v9346_v55 }
0x12fe   : > { %v9350_v11 = vpop.eup %9349  ;;  %v4328_v54 = vadd.f32 1.0, %v9348_v38 }
0x12ff   : > { %4404 = vperm.xlu0 %9196, %v9350_v11   ;;  %v9352_v62 = vpop.eup %9351 }
0x1300   : > { %9361 = vrcp.f32 %v4328_v54 }
0x1301   : > { %4409 = vperm.xlu1 %9197, %v9352_v62   ;;  %9363 = vrcp.f32 %v4329_v22 }
0x1302   : > { %v9354_v59 = vpop.eup %9353 }
0x1303   : > { %4414 = vperm.xlu0 %9196, %v9354_v59   ;;  %v9356_v33 = vpop.eup %9355 }
0x1305   : > { %v9358_v37 = vpop.eup %9357  ;;  %4419 = vperm.xlu1 %9197, %v9356_v33  }
0x1306   : > { %v9360_v14 = vpop.eup %9359 }
0x1307   : > { %4424 = vperm.xlu0 %9196, %v9358_v37  }
0x1309   : > { %4429 = vperm.xlu1 %9197, %v9360_v14  }
0x130a   : > { %v9362_v6 = vpop.eup %9361 }
0x130b   : > { %4434 = vperm.xlu0 %9196, %v9362_v6   ;;  %v9364_v10 = vpop.eup %9363 }
0x130d   : > { %4439 = vperm.xlu1 %9197, %v9364_v10  }
0x136b   : > { %v4370_v63 = vpop.permute.xlu0 %4369 }
0x136c   : > { %v11026_v45 = vmul.f32 %v4370_v63, %v10695_v18  ;;  %v4365_v5 = vpop.permute.xlu1 %4364 }
0x136d   : > { %v11029_v32 = vmul.f32 %v4365_v5, %v10689_v17 }
0x136f   : > { %v8997_v48 = vpack.c.bf16 %v11026_v45, %v11029_v32  ;;  %v4528_v10 = vsel %vm911_vm2, %v11029_v32, -inf }
0x1370   : > { %v4380_v9 = vpop.permute.xlu1 %4379 }
0x1371   : > { %8998 = vmatpush3.bf16.msra.mxu0 %v8997_v48  ;;  %v11035_v20 = vmul.f32 %v4380_v9, %v10691_v40 }
0x1372   : > { %8999 = vmatprep.subr.bf16.mxu0 %v9547_v41 }
0x1373   : > { %v4531_v54 = vsel %vm911_vm2, %v11035_v20, -inf }
0x1374   : > { %v4375_v29 = vpop.permute.xlu1 %4374  ;;  %v4385_v49 = vpop.permute.xlu0 %4384 }
0x1375   : > { %v11038_v43 = vmul.f32 %v4375_v29, %v10687_v24  ;;  %v11043_v60 = vmul.f32 %v4385_v49, %v10718_v3 }
0x1377   : > { %v9000_v18 = vpack.c.bf16 %v11035_v20, %v11038_v43  ;;  %v4530_v33 = vsel %vm911_vm2, %v11038_v43, -inf }
0x1378   : > { %v4390_v17 = vpop.permute.xlu1 %4389 }
0x1379   : > { %v11046_v0 = vmul.f32 %v4390_v17, %v10727_v56  ;;  %9001 = vmatpush3.bf16.msra.mxu0 %v9000_v18 }
0x137a   : > { %v4395_v28 = vpop.permute.xlu0 %4394  ;;  %9002 = vmatprep.subr.bf16.mxu0 %v9547_v41 }
0x137b   : > { %v9003_v40 = vpack.c.bf16 %v11046_v0, %v11043_v60  ;;  %v11052_v24 = vmul.f32 %v4395_v28, %v10713_v61  ;;  %v4534_v62 = vsel %vm911_vm2, %v11046_v0, -inf }
0x137c   : > { %v4400_v21 = vpop.permute.xlu1 %4399 }
0x137d   : > { %v11055_v51 = vmul.f32 %v4400_v21, %v10723_v2  ;;  %9004 = vmatpush3.bf16.msra.mxu0 %v9003_v40  ;;  %v4536_v59 = vsel %vm911_vm2, %v11052_v24, -inf }
0x137e   : > { %v4405_v3 = vpop.permute.xlu0 %4404  ;;  %9005 = vmatprep.subr.bf16.mxu0 %v9547_v41  ;;  %v4537_v5 = vmax.f32 %v4530_v33, %v4536_v59 }
0x137f   : > { %v9006_v56 = vpack.c.bf16 %v11055_v51, %v11052_v24  ;;  %v11061_v4 = vmul.f32 %v4405_v3, %v10754_v34  ;;  %v4538_v22 = vsel %vm911_vm2, %v11055_v51, -inf }
0x1380   : > { %v4410_v46 = vpop.permute.xlu1 %4409 }
0x1381   : > { %v11064_v30 = vmul.f32 %v4410_v46, %v10761_v47  ;;  %9007 = vmatpush3.bf16.msra.mxu0 %v9006_v56 }
0x1382   : > { %v4415_v61 = vpop.permute.xlu0 %4414  ;;  %9008 = vmatprep.subr.bf16.mxu0 %v9547_v41 }
0x1383   : > { %v9009_v2 = vpack.c.bf16 %v11064_v30, %v11061_v4  ;;  %v11070_v23 = vmul.f32 %v4415_v61, %v10750_v39  ;;  %v4542_v37 = vsel %vm911_vm2, %v11064_v30, -inf }
0x1384   : > { %v4420_v13 = vpop.permute.xlu1 %4419 }
0x1385   : > { %v11073_v36 = vmul.f32 %v4420_v13, %v10759_v57  ;;  %9010 = vmatpush3.bf16.msra.mxu0 %v9009_v2  ;;  %v4544_v14 = vsel %vm911_vm2, %v11070_v23, -inf }
0x1386   : > { %v4425_v34 = vpop.permute.xlu0 %4424  ;;  %9011 = vmatprep.subr.bf16.mxu0 %v9547_v41  ;;  %v4545_v18 = vmax.f32 %v4537_v5, %v4544_v14 }
0x1387   : > { %v9012_v47 = vpack.c.bf16 %v11073_v36, %v11070_v23  ;;  %v11079_v50 = vmul.f32 %v4425_v34, %v10782_v12 }
0x1388   : > { %v4430_v8 = vpop.permute.xlu1 %4429 }
0x1389   : > { %v11082_v27 = vmul.f32 %v4430_v8, %v10789_v15  ;;  %9013 = vmatpush3.bf16.msra.mxu0 %v9012_v47  ;;  %v9558_v15 = vmov 0.0078125   ;;  %v4548_v28 = vsel %vm911_vm2, %v11079_v50, -inf }
0x138a   : > { %v4435_v39 = vpop.permute.xlu0 %4434  ;;  %9014 = vmatprep.subr.bf16.mxu0 %v9547_v41 }
0x138b   : > { %v9015_v57 = vpack.c.bf16 %v11082_v27, %v11079_v50  ;;  %v11088_v38 = vmul.f32 %v4435_v39, %v10779_v58  ;;  %v9241_v58 = vld [vmem:[%s11993_s14] sm:$0xff]   ;;  %v4550_v9 = vsel %vm911_vm2, %v11082_v27, -inf  ;;  %v4566_v39 = vstv %s4565_s30  ;;  %s7267_s30 = sshll.u32 %s581_s21, 2 }
0x138c   : > { %v4440_v55 = vpop.permute.xlu1 %4439  ;;  %8562 = vmatprep.mubr.bf16.mxu1 %v9241_v58 }
0x138d   : > { %v11091_v11 = vmul.f32 %v4440_v55, %v10787_v52  ;;  %9016 = vmatpush3.bf16.msra.mxu0 %v9015_v57  ;;  %v9559_v52 = vmov 9   ;;  %v4552_v29 = vsel %vm911_vm2, %v11088_v38, -inf  ;;  %v4569_v57 = vstv %s7455_s2  ;;  %s583_s2 = scalar_lea.vmem [#allocation6], %s7267_s30 }
0x138e   : > { %9017 = vmatprep.subr.bf16.mxu0 %v9547_v41  ;;  %9198 = vset.pattern.permute.xlu0 %v9559_v52  ;;  %v4553_v3 = vmax.f32 %v4545_v18, %v4552_v29 }
0x138f   : > { %v9018_v12 = vpack.c.bf16 %v11091_v11, %v11088_v38  ;;  %9199 = vset.pattern.permute.xlu1 %v9559_v52  ;;  %4618 = vperm.xlu0 %9198, %v10812_v25   ;;  %v4546_v25 = vsel %vm911_vm2, %v11073_v36, -inf  ;;  %v4554_v6 = vsel %vm911_vm2, %v11091_v11, -inf  ;;  %v4573_v52 = vstv %s7456_s29  ;;  %s7166_s29 = sshll.u32 %s583_s2, 4  ;;  %s11939_s29 = int_to_ptr.vmem [resolvable:$true] %s7166_s29 }
0x1390   : > { %4622 = vperm.xlu1 %9199, %v10867_v26   ;;  %v4529_v26 = vsel %vm911_vm2, %v11026_v45, -inf  ;;  %s9476_s19 = scalar_lea.vmem %s11939_s29, 64 }
0x1391   : > { %9019 = vmatpush3.bf16.msra.mxu0 %v9018_v12  ;;  %v4535_v63 = vmax.f32 %v4529_v26, %v4534_v62  ;;  %v4581_v26 = vlaneseq  ;;  %p9477_p9 = scmp.ne.s32.totalorder %s11939_s29, %s9476_s19 }
0x1392   : > { %9020 = vmatprep.subr.bf16.mxu0 %v9546_v16 }
0x1393   : > { %4630 = vperm.xlu0 %9198, %v10881_v31   ;;  %v4539_v31 = vmax.f32 %v4531_v54, %v4538_v22  ;;  %v4543_v49 = vmax.f32 %v4535_v63, %v4542_v37  ;;  %p9478_p10 = pnand %p9477_p9, %p9695_p5 }
0x1394   : > { %8544 = vmatmul.mubr.f32.vlgmr.msra.gmra.mrb[78].mxu0 %v9558_v15  ;;  %4626 = vperm.xlu1 %9199, %v10874_v7   ;;  %v4532_v7 = vsel %vm911_vm2, %v11043_v60, -inf }
0x1395   : > { %9021 = vmatpush3.bf16.msra.mxu0 %v9546_v16  ;;  %v4533_v48 = vmax.f32 %v4528_v10, %v4532_v7  ;;  %v4551_v21 = vmax.f32 %v4543_v49, %v4550_v9  ;;  %v4582_v7 = vshrl.u32 %v4581_v26, 7  ;;  %p9479_p12 = pneg %p9478_p10 }
0x1397   : > { %4638 = vperm.xlu0 %9198, %v10895_v44   ;;  %v4547_v44 = vmax.f32 %v4539_v31, %v4546_v25  ;;  %v4583_v31 = vsub.s32 0, %v4582_v7 }
0x1398   : > { %4634 = vperm.xlu1 %9199, %v10888_v19   ;;  %v4540_v19 = vsel %vm911_vm2, %v11061_v4, -inf }
0x1399   : > { %v4555_v17 = vmax.f32 %v4547_v44, %v4554_v6  ;;  %v4541_v40 = vmax.f32 %v4533_v48, %v4540_v19 }
0x139b   : > { %4646 = vperm.xlu0 %9198, %v10909_v35   ;;  %v4549_v56 = vmax.f32 %v4541_v40, %v4548_v28  ;;  %v4557_v46 = vmax.f32 %v4553_v3, %v4555_v17 }
0x139c   : > { %4642 = vperm.xlu1 %9199, %v10902_v53  }
0x139d   : > { %v4556_v61 = vmax.f32 %v4549_v56, %v4551_v21 }
0x139f   : > { %9200 = vset.pattern.permute.xlu0 %v12004_v1  ;;  %v4558_v2 = vmax.f32 %v4556_v61, %v4557_v46 }
0x13a0   : > { %9201 = vset.pattern.permute.xlu1 %v12004_v1 }
0x13a1   : > { %v4559_v13 = vrot.slane %v4558_v2, 4 }
0x13a3   : > { %v4560_v34 = vmax.f32 %v4558_v2, %v4559_v13 }
0x13a5   : > { %v4561_v47 = vrot.slane %v4560_v34, 2 }
0x13a7   : > { %v4562_v35 = vmax.f32 %v4560_v34, %v4561_v47 }
0x13a9   : > { %v4563_v53 = vrot.slane %v4562_v35, 1 }
0x13ab   : > { %v4564_v8 = vmax.f32 %v4562_v35, %v4563_v53 }
0x13ad   : > { %v4570_v15 = vmul.f32 %v4569_v57, %v4564_v8 }
0x1467   : > { %v4524_v55 = vpop.f32.mrb[78].mxu0 }
0x1468   : > { %v4567_v12 = vmul.f32 %v4566_v39, %v4524_v55  ;;  %v8545_v58 = vpop.f32.mrb[79].mxu0 }
0x146a   : > { %v4571_v22 = vadd.f32 %v4570_v15, %v4567_v12 }
0x146c   : > { %v4574_v54 = vadd.f32 %v4573_v52, %v4571_v22 }
0x146e   : > { %v7457_v62 = vmul.f32 -1.442695, %v4574_v54 }
0x1470   : > { %9365 = vpow2.f32 %v7457_v62 }
0x147a   : > { %v9366_v59 = vpop.eup %9365 }
0x147b   : > { %v4578_v25 = vadd.f32 1.0, %v9366_v59 }
0x147d   : > { %9367 = vrcp.f32 %v4578_v25 }
0x1487   : > { %v9368_v33 = vpop.eup %9367 }
0x1488   : > { %v4584_v37 = vrot.slane %v9368_v33, %v4583_v31 }
0x148a   : > { %v4585_v14 = vmul.f32 %v4584_v37, %v11029_v32  ;;  %v4586_v6 = vmul.f32 %v4584_v37, %v11026_v45  ;;  %v4587_v10 = vmul.f32 %v4584_v37, %v11038_v43  ;;  %v4588_v63 = vmul.f32 %v4584_v37, %v11035_v20 }
0x148b   : > { %v4589_v48 = vmul.f32 %v4584_v37, %v11043_v60  ;;  %v4590_v19 = vmul.f32 %v4584_v37, %v11046_v0  ;;  %v4591_v29 = vmul.f32 %v4584_v37, %v11052_v24  ;;  %v4592_v32 = vmul.f32 %v4584_v37, %v11055_v51 }
0x148c   : > { %v4609_v5 = vpack.c.bf16 %v4586_v6, %v4585_v14  ;;  %v4610_v44 = vpack.c.bf16 %v4588_v63, %v4587_v10  ;;  %v4593_v43 = vmul.f32 %v4584_v37, %v11061_v4  ;;  %v4594_v20 = vmul.f32 %v4584_v37, %v11064_v30  ;;  %v11209_v63 = vld [vmem:[%s11984_s5] sm:$0xf] }
0x148d   : > { %v4611_v9 = vpack.c.bf16 %v4590_v19, %v4589_v48  ;;  %v4612_v45 = vpack.c.bf16 %v4592_v32, %v4591_v29  ;;  %v4595_v60 = vmul.f32 %v4584_v37, %v11070_v23  ;;  %v4596_v0 = vmul.f32 %v4584_v37, %v11073_v36  ;;  %v9242_v23 = vld [vmem:[%s11993_s14 + $0x8] sm:$0xff]   ;;  %v9243_v36 = vld [vmem:[%s11993_s14 + $0x10] sm:$0xff]   ;;  %v11242_v29 = vld [vmem:[%s11985_s6 + $0x18] sm:$0xff] }
0x148e   : > { %8546 = vmatprep.subr.bf16.mxu1 %v4609_v5  ;;  %v4613_v49 = vpack.c.bf16 %v4594_v20, %v4593_v43  ;;  %v4597_v24 = vmul.f32 %v4584_v37, %v11079_v50  ;;  %v4598_v51 = vmul.f32 %v4584_v37, %v11082_v27  ;;  %v4599_v4 = vmul.f32 %v4584_v37, %v11088_v38  ;;  %v9244_v50 = vld [vmem:[%s11993_s14 + $0x18] sm:$0xff]   ;;  %v4623_v27 = vpop.permute.xlu1 %4622  ;;  %v4619_v38 = vpop.permute.xlu0 %4618  ;;  %v11225_v48 = vld [vmem:[%s11985_s6 + $0x8] sm:$0xff]  ;;  %v11247_v32 = vld [vmem:[%s11985_s6 + $0x20] sm:$0xff] }
0x148f   : > { %8547 = vmatpush3.bf16.msra.mxu1 %v4609_v5  ;;  %v4614_v18 = vpack.c.bf16 %v4596_v0, %v4595_v60  ;;  %v4600_v30 = vmul.f32 %v4584_v37, %v11091_v11  ;;  %v11218_v5 = vld [vmem:[%s11985_s6] sm:$0xff]  ;;  %v11261_v43 = vld [vmem:[%s11985_s6 + $0x30] sm:$0xff]  ;;  %v11270_v20 = vld [vmem:[%s11985_s6 + $0x38] sm:$0xff] }
0x1490   : > { %8548 = vmatprep.subr.bf16.mxu1 %v4610_v44  ;;  %v4615_v17 = vpack.c.bf16 %v4598_v51, %v4597_v24 }
0x1491   : > { %v4616_v28 = vpack.c.bf16 %v4600_v30, %v4599_v4 }
0x1492   : > { %v4627_v11 = vpop.permute.xlu1 %4626  ;;  %v4631_v46 = vpop.permute.xlu0 %4630 }
0x1493   : > { %8549 = vmatpush3.bf16.msra.mxu1 %v4610_v44 }
0x1494   : > { %8550 = vmatprep.subr.bf16.mxu1 %v4611_v9 }
0x1496   : > { %v4635_v34 = vpop.permute.xlu1 %4634  ;;  %v4639_v53 = vpop.permute.xlu0 %4638 }
0x1497   : > { %8551 = vmatpush3.bf16.msra.mxu1 %v4611_v9  ;;  %v11231_v9 = vld [vmem:[%s11985_s6 + $0x10] sm:$0xff] }
0x1498   : > { %8552 = vmatprep.subr.bf16.mxu1 %v4612_v45 }
0x149a   : > { %v4643_v12 = vpop.permute.xlu1 %4642  ;;  %v4647_v52 = vpop.permute.xlu0 %4646 }
0x149b   : > { %8553 = vmatpush3.bf16.msra.mxu1 %v4612_v45  ;;  %v11256_v45 = vld [vmem:[%s11985_s6 + $0x28] sm:$0xff] }
0x149c   : > { %8554 = vmatprep.subr.bf16.mxu1 %v4613_v49 }
0x149f   : > { %8555 = vmatpush3.bf16.msra.mxu1 %v4613_v49 }
0x14a0   : > { %8556 = vmatprep.subr.bf16.mxu1 %v4614_v18 }
0x14a3   : > { %8557 = vmatpush3.bf16.msra.mxu1 %v4614_v18 }
0x14a4   : > { %8558 = vmatprep.subr.bf16.mxu1 %v4615_v17 }
0x14a7   : > { %8559 = vmatpush3.bf16.msra.mxu1 %v4615_v17 }
0x14a8   : > { %8560 = vmatprep.subr.bf16.mxu1 %v4616_v28 }
0x14ab   : > { %8561 = vmatpush3.bf16.msra.mxu1 %v4616_v28 }
0x14ac   : > { %9022 = vmatprep.subr.bf16.mxu1 %v9547_v41 }
0x14ae   : > { %8563 = vmatmul.mubr.bf16.vlgmr.msra.gmra.mrb[100].mxu1 %v9242_v23 }
0x14af   : > { %8566 = vmatprep.mubr.bf16.mxu1 %v9243_v36 }
0x14b6   : > { %8567 = vmatmul.mubr.bf16.gmra.mrb[104].mxu1 %v9244_v50 }
0x14b7   : > { %8602 = vmatprep.mubr.msk.f32.mxu1 %vm9548_vm3, %v9549_v42 }
0x1581   : > { %v8564_v40 = vpop.f32.mrb[100].mxu1 }
0x1582   : > { %v4707_v21 = vpop.f32.mrb[101].mxu1  ;;  %v11177_v13 = vadd.f32 %v8564_v40, %v4627_v11 }
0x1583   : > { %v11171_v3 = vadd.f32 %v4707_v21, %v4619_v38  ;;  %v8565_v56 = vpop.f32.mrb[102].mxu1 }
0x1584   : > { %v4710_v61 = vpop.f32.mrb[103].mxu1  ;;  %v11183_v47 = vadd.f32 %v8565_v56, %v4631_v46 }
0x1585   : > { %v11173_v2 = vadd.f32 %v4710_v61, %v4623_v27  ;;  %8574 = vmatprep.mubr.msk.f32.mxu0 %vm911_vm2, %v11171_v3 }
0x1587   : > { %8575 = vmatmul.mubr.msk.f32.vlgmr.msra.gmra.mrb[80].mxu0 %vm911_vm2, %v11173_v2 }
0x1588   : > { %8577 = vmatprep.mubr.msk.f32.mxu0 %vm911_vm2, %v11177_v13 }
0x1589   : > { %v8568_v35 = vpop.f32.mrb[104].mxu1 }
0x158a   : > { %v4723_v8 = vpop.f32.mrb[105].mxu1  ;;  %v11193_v58 = vadd.f32 %v8568_v35, %v4643_v12 }
0x158b   : > { %v11185_v39 = vadd.f32 %v4723_v8, %v4635_v34  ;;  %v8569_v57 = vpop.f32.mrb[106].mxu1  ;;  %8578 = vmatmul.mubr.msk.f32.gmra.mrb[82].mxu0 %vm911_vm2, %v11183_v47 }
0x158c   : > { %v4726_v55 = vpop.f32.mrb[107].mxu1  ;;  %v11199_v22 = vadd.f32 %v8569_v57, %v4647_v52 }
0x158d   : > { %v11189_v15 = vadd.f32 %v4726_v55, %v4639_v53  ;;  %8580 = vmatprep.mubr.msk.f32.mxu0 %vm911_vm2, %v11185_v39 }
0x158f   : > { %8581 = vmatmul.mubr.msk.f32.gmra.mrb[84].mxu0 %vm911_vm2, %v11189_v15 }
0x1590   : > { %8583 = vmatprep.mubr.msk.f32.mxu0 %vm911_vm2, %v11193_v58 }
0x1593   : > { %8584 = vmatmul.mubr.msk.f32.gmra.mrb[86].mxu0 %vm911_vm2, %v11199_v22 }
0x1594   : > { %8607 = vmatprep.mubr.msk.f32.mxu0 %vm829_vm0, %v11218_v5 }
0x165a   : > { %v8576_v54 = vpop.f32.mrb[80].mxu0 }
0x165b   : > { %v4828_v62 = vpop.f32.mrb[81].mxu0 }
0x165c   : > { %v9023_v59 = vpack.c.bf16 %v8576_v54, %v4828_v62 }
0x165e   : > { %v8579_v25 = vpop.f32.mrb[82].mxu0  ;;  %9024 = vmatpush3.bf16.msra.mxu1 %v9023_v59 }
0x165f   : > { %v4838_v26 = vpop.f32.mrb[83].mxu0  ;;  %9025 = vmatprep.subr.bf16.mxu1 %v9547_v41 }
0x1660   : > { %v9026_v7 = vpack.c.bf16 %v8579_v25, %v4838_v26 }
0x1662   : > { %v8582_v31 = vpop.f32.mrb[84].mxu0  ;;  %9027 = vmatpush3.bf16.msra.mxu1 %v9026_v7 }
0x1663   : > { %v4848_v33 = vpop.f32.mrb[85].mxu0  ;;  %9028 = vmatprep.subr.bf16.mxu1 %v9547_v41 }
0x1664   : > { %v9029_v37 = vpack.c.bf16 %v8582_v31, %v4848_v33  ;;  %v11334_v33 = vld [vmem:[%s11983_s4 + $0x8] sm:$0xff] }
0x1666   : > { %v8585_v14 = vpop.f32.mrb[86].mxu0  ;;  %9030 = vmatpush3.bf16.msra.mxu1 %v9029_v37  ;;  %v11340_v37 = vld [vmem:[%s11983_s4] sm:$0xff] }
0x1667   : > { %v4858_v6 = vpop.f32.mrb[87].mxu0  ;;  %9031 = vmatprep.subr.bf16.mxu1 %v9547_v41 }
0x1668   : > { %v9032_v10 = vpack.c.bf16 %v8585_v14, %v4858_v6  ;;  %v9561_v14 = vmov 11   ;;  %v11348_v6 = vld [vmem:[%s11983_s4 + $0x18] sm:$0xff] }
0x166a   : > { %9033 = vmatpush3.bf16.msra.mxu1 %v9032_v10  ;;  %v11354_v10 = vld [vmem:[%s11983_s4 + $0x10] sm:$0xff] }
0x166b   : > { %9034 = vmatprep.subr.bf16.mxu1 %v9546_v16 }
0x166d   : > { %8603 = vmatmul.mubr.msk.f32.vlgmr.msra.gmra.mrb[108].mxu1 %vm1050_vm4, %v11209_v63 }
0x166e   : > { %9035 = vmatpush3.bf16.msra.mxu1 %v9546_v16 }
0x1740   : > { %v4945_v44 = vpop.f32.mrb[108].mxu1 }
0x1741   : > { %v8604_v19 = vpop.f32.mrb[109].mxu1  ;;  %8605 = vmatprep.subr.msk.mxu0 %vm1148_vm5, %v4945_v44 }
0x1742   : > { %8606 = vmatpush3.msk.msra.mxu0 %vm1148_vm5, %v4945_v44  ;;  %v11372_v44 = vld [vmem:[%s11983_s4 + $0x38] sm:$0xff]  ;;  %v11378_v19 = vld [vmem:[%s11983_s4 + $0x30] sm:$0xff] }
0x1743   : > { %8608 = vmatmul.mubr.msk.f32.vlgmr.msra.gmra.mrb[88].mxu0 %vm829_vm0, %v11225_v48  ;;  %9036 = vmatprep.subr.bf16.mxu0 %v9547_v41 }
0x1744   : > { %8610 = vmatprep.mubr.msk.f32.mxu0 %vm829_vm0, %v11231_v9 }
0x1747   : > { %8611 = vmatmul.mubr.msk.f32.gmra.mrb[90].mxu0 %vm829_vm0, %v11242_v29 }
0x1748   : > { %8613 = vmatprep.mubr.msk.f32.mxu0 %vm829_vm0, %v11247_v32 }
0x174b   : > { %8614 = vmatmul.mubr.msk.f32.gmra.mrb[92].mxu0 %vm829_vm0, %v11256_v45 }
0x174c   : > { %8616 = vmatprep.mubr.msk.f32.mxu0 %vm829_vm0, %v11261_v43 }
0x174f   : > { %8617 = vmatmul.mubr.msk.f32.gmra.mrb[94].mxu0 %vm829_vm0, %v11270_v20 }
0x1750   : > { %8651 = vmatprep.mubr.msk.f32.mxu0 %vm9548_vm3, %v9549_v42 }
0x1816   : > { %v8609_v49 = vpop.f32.mrb[88].mxu0 }
0x1817   : > { %5088 = vperm.xlu0 %9200, %v8609_v49   ;;  %v5042_v60 = vpop.f32.mrb[89].mxu0 }
0x1818   : > { %5083 = vperm.xlu1 %9201, %v5042_v60  }
0x181a   : > { %v8612_v0 = vpop.f32.mrb[90].mxu0 }
0x181b   : > { %v5052_v18 = vpop.f32.mrb[91].mxu0 }
0x181c   : > { %5093 = vperm.xlu1 %9201, %v5052_v18  }
0x181e   : > { %v8615_v24 = vpop.f32.mrb[92].mxu0 }
0x181f   : > { %v5062_v51 = vpop.f32.mrb[93].mxu0 }
0x1820   : > { %5098 = vperm.xlu1 %9201, %v8612_v0   ;;  %5103 = vperm.xlu0 %9200, %v5062_v51  }
0x1822   : > { %v8618_v17 = vpop.f32.mrb[94].mxu0 }
0x1823   : > { %v5072_v4 = vpop.f32.mrb[95].mxu0 }
0x1824   : > { %5108 = vperm.xlu1 %9201, %v8615_v24   ;;  %5113 = vperm.xlu0 %9200, %v5072_v4  }
0x1828   : > { %5118 = vperm.xlu1 %9201, %v8618_v17   ;;  %5452 = vrot.lane.b32.xlu0 %v11340_v37, %s9560_s23 }
0x1829   : > { %9202 = vset.pattern.permute.xlu0 %v9561_v14 }
0x182c   : > { %5454 = vrot.lane.b32.xlu1 %v11334_v33, %s9560_s23  ;;  %5456 = vrot.lane.b32.xlu0 %v11354_v10, %s9560_s23 }
0x182d   : > { %9203 = vset.pattern.permute.xlu1 %v9561_v14 }
0x1830   : > { %5458 = vrot.lane.b32.xlu1 %v11348_v6, %s9560_s23 }
0x1896   : > { %v5089_v30 = vpop.permute.xlu0 %5088 }
0x1897   : > { %v11277_v28 = vsub.f32 %v11173_v2, %v5089_v30  ;;  %v5084_v23 = vpop.permute.xlu1 %5083 }
0x1898   : > { %v11280_v36 = vsub.f32 %v11171_v3, %v5084_v23 }
0x1899   : > { %v5130_v27 = vmul.f32 %v11277_v28, %v11277_v28 }
0x189a   : > { %v5129_v50 = vmul.f32 %v11280_v36, %v11280_v36 }
0x189b   : > { %v5094_v38 = vpop.permute.xlu1 %5093 }
0x189c   : > { %v11287_v11 = vsub.f32 %v11177_v13, %v5094_v38  ;;  %8623 = vmatprep.mubr.msk.f32.mxu1 %vm911_vm2, %v5129_v50 }
0x189d   : > { %8624 = vmatmul.mubr.msk.f32.vlgmr.msra.gmra.mrb[110].mxu1 %vm911_vm2, %v5130_v27 }
0x189e   : > { %v5131_v40 = vmul.f32 %v11287_v11, %v11287_v11 }
0x189f   : > { %v5099_v21 = vpop.permute.xlu1 %5098  ;;  %v5104_v3 = vpop.permute.xlu0 %5103 }
0x18a0   : > { %v11294_v56 = vsub.f32 %v11183_v47, %v5099_v21  ;;  %v11297_v46 = vsub.f32 %v11185_v39, %v5104_v3  ;;  %8626 = vmatprep.mubr.msk.f32.mxu1 %vm911_vm2, %v5131_v40 }
0x18a2   : > { %v5132_v61 = vmul.f32 %v11294_v56, %v11294_v56  ;;  %v5133_v2 = vmul.f32 %v11297_v46, %v11297_v46 }
0x18a3   : > { %v5109_v13 = vpop.permute.xlu1 %5108  ;;  %v5114_v34 = vpop.permute.xlu0 %5113 }
0x18a4   : > { %v11305_v35 = vsub.f32 %v11189_v15, %v5109_v13  ;;  %v11308_v53 = vsub.f32 %v11193_v58, %v5114_v34  ;;  %8627 = vmatmul.mubr.msk.f32.gmra.mrb[112].mxu1 %vm911_vm2, %v5132_v61 }
0x18a5   : > { %8629 = vmatprep.mubr.msk.f32.mxu1 %vm911_vm2, %v5133_v2 }
0x18a6   : > { %v5134_v47 = vmul.f32 %v11305_v35, %v11305_v35  ;;  %v5135_v8 = vmul.f32 %v11308_v53, %v11308_v53 }
0x18a7   : > { %v5119_v39 = vpop.permute.xlu1 %5118  ;;  %v5453_v4 = vpop.permute.xlu0 %5452 }
0x18a8   : > { %v11317_v57 = vsub.f32 %v11199_v22, %v5119_v39  ;;  %8630 = vmatmul.mubr.msk.f32.gmra.mrb[114].mxu1 %vm911_vm2, %v5134_v47 }
0x18a9   : > { %8632 = vmatprep.mubr.msk.f32.mxu1 %vm911_vm2, %v5135_v8 }
0x18aa   : > { %v5136_v55 = vmul.f32 %v11317_v57, %v11317_v57 }
0x18ab   : > { %v5455_v17 = vpop.permute.xlu1 %5454  ;;  %v5457_v61 = vpop.permute.xlu0 %5456 }
0x18ac   : > { %8633 = vmatmul.mubr.msk.f32.gmra.mrb[116].mxu1 %vm911_vm2, %v5136_v55 }
0x18ad   : > { %8656 = vmatprep.mubr.msk.f32.mxu1 %vm829_vm0, %v11218_v5  ;;  %v11366_v5 = vld [vmem:[%s11983_s4 + $0x20] sm:$0xff] }
0x18ae   : > { %5460 = vrot.lane.b32.xlu0 %v11366_v5, %s9560_s23 }
0x18b2   : > { %5464 = vrot.lane.b32.xlu0 %v11378_v19, %s9560_s23 }
0x18b6   : > { %5533 = vperm.xlu0 %9202, %v11340_v37  }
0x18ba   : > { %5549 = vperm.xlu0 %9202, %v11366_v5  }
0x18be   : > { %9205 = vset.pattern.permute.xlu0 %v12004_v1 }
0x1970   : > { %v8625_v12 = vpop.f32.mrb[110].mxu1 }
0x1971   : > { %v5227_v15 = vpop.f32.mrb[111].mxu1 }
0x1972   : > { %v9037_v58 = vpack.c.bf16 %v8625_v12, %v5227_v15  ;;  %v5461_v12 = vpop.permute.xlu0 %5460 }
0x1974   : > { %9038 = vmatpush3.bf16.msra.mxu0 %v9037_v58 }
0x1975   : > { %9039 = vmatprep.subr.bf16.mxu0 %v9547_v41 }
0x1977   : > { %v8628_v52 = vpop.f32.mrb[112].mxu1 }
0x1978   : > { %v5237_v22 = vpop.f32.mrb[113].mxu1 }
0x1979   : > { %v9040_v54 = vpack.c.bf16 %v8628_v52, %v5237_v22 }
0x197b   : > { %v8631_v62 = vpop.f32.mrb[114].mxu1  ;;  %9041 = vmatpush3.bf16.msra.mxu0 %v9040_v54 }
0x197c   : > { %v5247_v59 = vpop.f32.mrb[115].mxu1  ;;  %9042 = vmatprep.subr.bf16.mxu0 %v9547_v41 }
0x197d   : > { %v9043_v25 = vpack.c.bf16 %v8631_v62, %v5247_v59 }
0x197f   : > { %v8634_v26 = vpop.f32.mrb[116].mxu1  ;;  %9044 = vmatpush3.bf16.msra.mxu0 %v9043_v25 }
0x1980   : > { %v5257_v7 = vpop.f32.mrb[117].mxu1  ;;  %9045 = vmatprep.subr.bf16.mxu0 %v9547_v41 }
0x1981   : > { %v9046_v31 = vpack.c.bf16 %v8634_v26, %v5257_v7  ;;  %v5465_v26 = vpop.permute.xlu0 %5464 }
0x1983   : > { %9047 = vmatpush3.bf16.msra.mxu0 %v9046_v31  ;;  %v9245_v31 = vld [vmem:[%s11994_s15] sm:$0xff]  }
0x1986   : > { %8652 = vmatmul.mubr.msk.f32.vlgmr.msra.gmra.mrb[96].mxu0 %vm1050_vm4, %v11209_v63  ;;  %v11360_v63 = vld [vmem:[%s11983_s4 + $0x28] sm:$0xff] }
0x1987   : > { %5462 = vrot.lane.b32.xlu1 %v11360_v63, %s9560_s23  ;;  %8676 = vmatprep.mubr.msk.bf16.mxu0 %vm1050_vm4, %v9245_v31 }
0x198b   : > { %5466 = vrot.lane.b32.xlu1 %v11372_v44, %s9560_s23  ;;  %s9563_s23 = smov 115  }
0x198f   : > { %5537 = vperm.xlu1 %9203, %v11334_v33  }
0x1993   : > { %5541 = vperm.xlu1 %9203, %v11354_v10  }
0x1997   : > { %5545 = vperm.xlu1 %9203, %v11348_v6  }
0x199b   : > { %5553 = vperm.xlu1 %9203, %v11360_v63  }
0x199f   : > { %9204 = vset.pattern.permute.xlu1 %v12004_v1 }
0x1a59   : > { %v5332_v49 = vpop.f32.mrb[96].mxu0 }
0x1a5a   : > { %v8653_v60 = vpop.f32.mrb[97].mxu0  ;;  %8654 = vmatprep.subr.msk.mxu1 %vm1148_vm5, %v5332_v49 }
0x1a5b   : > { %8655 = vmatpush3.msk.msra.mxu1 %vm1148_vm5, %v5332_v49  ;;  %v9562_v49 = vmov 12   ;;  %v11433_v60 = vld [vmem:[%s11983_s4 + $0x48] sm:$0xff] }
0x1a5c   : > { %8657 = vmatmul.mubr.msk.f32.vlgmr.msra.gmra.mrb[118].mxu1 %vm829_vm0, %v11225_v48  ;;  %9048 = vmatprep.subr.bf16.mxu1 %v9546_v16 }
0x1a5d   : > { %8659 = vmatprep.mubr.msk.f32.mxu1 %vm829_vm0, %v11231_v9  ;;  %9049 = vmatpush3.bf16.msra.mxu1 %v9546_v16 }
0x1a60   : > { %8660 = vmatmul.mubr.msk.f32.gmra.mrb[120].mxu1 %vm829_vm0, %v11242_v29 }
0x1a61   : > { %8662 = vmatprep.mubr.msk.f32.mxu1 %vm829_vm0, %v11247_v32 }
0x1a64   : > { %8663 = vmatmul.mubr.msk.f32.gmra.mrb[122].mxu1 %vm829_vm0, %v11256_v45 }
0x1a65   : > { %8665 = vmatprep.mubr.msk.f32.mxu1 %vm829_vm0, %v11261_v43 }
0x1a68   : > { %8666 = vmatmul.mubr.msk.f32.gmra.mrb[124].mxu1 %vm829_vm0, %v11270_v20  ;;  %v5459_v20 = vpop.permute.xlu1 %5458 }
0x1a6c   : > { %v5463_v47 = vpop.permute.xlu1 %5462 }
0x1a70   : > { %v5467_v54 = vpop.permute.xlu1 %5466 }
0x1b2f   : > { %v8658_v48 = vpop.f32.mrb[118].mxu1 }
0x1b30   : > { %v5411_v0 = vadd.f32 1e-05, %v8658_v48  ;;  %v5405_v9 = vpop.f32.mrb[119].mxu1  ;;  %v11439_v48 = vld [vmem:[%s11983_s4 + $0x50] sm:$0xff] }
0x1b31   : > { %v5406_v18 = vadd.f32 1e-05, %v5405_v9  ;;  %v11451_v9 = vld [vmem:[%s11983_s4 + $0x60] sm:$0xff] }
0x1b32   : > { %9369 = vrsqrt.f32 %v5411_v0  ;;  %v11445_v0 = vld [vmem:[%s11983_s4 + $0x58] sm:$0xff] }
0x1b33   : > { %9371 = vrsqrt.f32 %v5406_v18  ;;  %v8661_v24 = vpop.f32.mrb[120].mxu1  ;;  %v11457_v18 = vld [vmem:[%s11983_s4 + $0x68] sm:$0xff] }
0x1b34   : > { %v5421_v29 = vadd.f32 1e-05, %v8661_v24  ;;  %v5415_v51 = vpop.f32.mrb[121].mxu1  ;;  %v11463_v24 = vld [vmem:[%s11983_s4 + $0x70] sm:$0xff] }
0x1b35   : > { %v5416_v32 = vadd.f32 1e-05, %v5415_v51  ;;  %v5538_v51 = vpop.permute.xlu1 %5537 }
0x1b36   : > { %9373 = vrsqrt.f32 %v5421_v29  ;;  %v11469_v29 = vld [vmem:[%s11983_s4 + $0x78] sm:$0xff] }
0x1b37   : > { %9375 = vrsqrt.f32 %v5416_v32  ;;  %v8664_v45 = vpop.f32.mrb[122].mxu1  ;;  %v5534_v32 = vpop.permute.xlu0 %5533 }
0x1b38   : > { %v5431_v30 = vadd.f32 1e-05, %v8664_v45  ;;  %v5425_v43 = vpop.f32.mrb[123].mxu1 }
0x1b39   : > { %v5426_v23 = vadd.f32 1e-05, %v5425_v43 }
0x1b3a   : > { %9377 = vrsqrt.f32 %v5431_v30 }
0x1b3b   : > { %9379 = vrsqrt.f32 %v5426_v23  ;;  %v8667_v50 = vpop.f32.mrb[124].mxu1 }
0x1b3c   : > { %v9370_v27 = vpop.eup %9369  ;;  %v5441_v38 = vadd.f32 1e-05, %v8667_v50  ;;  %v5435_v40 = vpop.f32.mrb[125].mxu1 }
0x1b3d   : > { %v9372_v21 = vpop.eup %9371  ;;  %v5477_v3 = vmul.f32 %v9370_v27, %v5455_v17  ;;  %v5436_v2 = vadd.f32 1e-05, %v5435_v40  ;;  %v5542_v17 = vpop.permute.xlu1 %5541 }
0x1b3e   : > { %9381 = vrsqrt.f32 %v5441_v38  ;;  %v5476_v13 = vmul.f32 %v9372_v21, %v5453_v4  ;;  %v5550_v4 = vpop.permute.xlu0 %5549 }
0x1b3f   : > { %5491 = vperm.xlu1 %9204, %v5477_v3   ;;  %9383 = vrsqrt.f32 %v5436_v2 }
0x1b40   : > { %v9374_v34 = vpop.eup %9373  ;;  %5486 = vperm.xlu0 %9205, %v5476_v13  }
0x1b41   : > { %v9376_v8 = vpop.eup %9375  ;;  %v5479_v39 = vmul.f32 %v9374_v34, %v5459_v20  ;;  %v5546_v45 = vpop.permute.xlu1 %5545 }
0x1b42   : > { %v5478_v55 = vmul.f32 %v9376_v8, %v5457_v61 }
0x1b44   : > { %v9378_v15 = vpop.eup %9377  ;;  %5496 = vperm.xlu1 %9204, %v5478_v55   ;;  %5501 = vperm.xlu0 %9205, %v5479_v39  }
0x1b45   : > { %v9380_v58 = vpop.eup %9379  ;;  %v5481_v52 = vmul.f32 %v9378_v15, %v5463_v47  ;;  %v5554_v30 = vpop.permute.xlu1 %5553 }
0x1b46   : > { %v5480_v22 = vmul.f32 %v9380_v58, %v5461_v12 }
0x1b48   : > { %v9382_v62 = vpop.eup %9381  ;;  %5511 = vperm.xlu1 %9204, %v5481_v52   ;;  %5506 = vperm.xlu0 %9205, %v5480_v22  }
0x1b49   : > { %v5483_v59 = vmul.f32 %v9382_v62, %v5467_v54  ;;  %v9384_v25 = vpop.eup %9383 }
0x1b4a   : > { %v5482_v7 = vmul.f32 %v9384_v25, %v5465_v26 }
0x1b4c   : > { %9206 = vset.pattern.permute.xlu1 %v9561_v14  ;;  %5521 = vperm.xlu0 %9205, %v5483_v59  }
0x1b4d   : > { %5557 = vperm.xlu1 %9206, %v11378_v19  }
0x1b50   : > { %9209 = vset.pattern.permute.xlu0 %v9562_v49 }
0x1b51   : > { %9207 = vset.pattern.permute.xlu1 %v12004_v1  ;;  %5601 = vperm.xlu0 %9209, %v11340_v37  }
0x1b52   : > { %5516 = vperm.xlu1 %9207, %v5482_v7  }
0x1b55   : > { %5613 = vperm.xlu0 %9209, %v11348_v6  }
0x1b56   : > { %9208 = vset.pattern.permute.xlu1 %v9561_v14  ;;  %v11427_v14 = vld [vmem:[%s11983_s4 + $0x40] sm:$0xff] }
0x1b57   : > { %5561 = vperm.xlu1 %9208, %v11372_v44  }
0x1b59   : > { %5621 = vperm.xlu0 %9209, %v11360_v63  }
0x1b5b   : > { %9210 = vset.pattern.permute.xlu1 %v9562_v49 }
0x1b5c   : > { %5605 = vperm.xlu1 %9210, %v11334_v33  }
0x1b5d   : > { %5629 = vperm.xlu0 %9209, %v11372_v44  }
0x1b60   : > { %5609 = vperm.xlu1 %9210, %v11354_v10  }
0x1b61   : > { %5637 = vperm.xlu0 %9209, %v11433_v60  }
0x1b64   : > { %5617 = vperm.xlu1 %9210, %v11366_v5  }
0x1b65   : > { %5645 = vperm.xlu0 %9209, %v11445_v0  }
0x1b68   : > { %5625 = vperm.xlu1 %9210, %v11378_v19  }
0x1b69   : > { %5653 = vperm.xlu0 %9209, %v11457_v18  }
0x1b6c   : > { %5633 = vperm.xlu1 %9210, %v11427_v14  }
0x1b6d   : > { %5661 = vperm.xlu0 %9209, %v11469_v29  }
0x1b70   : > { %5641 = vperm.xlu1 %9210, %v11439_v48  }
0x1b71   : > { %9211 = vset.pattern.permute.xlu0 %v12004_v1 }
0x1b74   : > { %5649 = vperm.xlu1 %9210, %v11451_v9  }
0x1b78   : > { %5657 = vperm.xlu1 %9210, %v11463_v24  }
0x1b7c   : > { %9212 = vset.pattern.permute.xlu1 %v12004_v1 }
0x1bbe   : > { %v5492_v43 = vpop.permute.xlu1 %5491 }
0x1bbf   : > { %v5525_v23 = vmul.f32 %v5492_v43, %v11277_v28  ;;  %v5487_v20 = vpop.permute.xlu0 %5486  ;;  %v9252_v43 = vld [vmem:[%s11994_s15 + $0x38] sm:$0xff]  }
0x1bc0   : > { %v5524_v50 = vmul.f32 %v5487_v20, %v11280_v36 }
0x1bc1   : > { %v5565_v27 = vadd.f32 %v5538_v51, %v5525_v23 }
0x1bc2   : > { %v5564_v38 = vadd.f32 %v5534_v32, %v5524_v50  ;;  %v9246_v32 = vld [vmem:[%s11994_s15 + $0x8] sm:$0xff]  }
0x1bc3   : > { %v5573_v40 = vmax.f32 %v5565_v27, 0.0  ;;  %v5497_v21 = vpop.permute.xlu1 %5496  ;;  %v5502_v3 = vpop.permute.xlu0 %5501 }
0x1bc4   : > { %v5572_v61 = vmax.f32 %v5564_v38, 0.0  ;;  %v5526_v2 = vmul.f32 %v5497_v21, %v11287_v11  ;;  %v5527_v13 = vmul.f32 %v5502_v3, %v11294_v56 }
0x1bc6   : > { %v5566_v34 = vadd.f32 %v5542_v17, %v5526_v2  ;;  %v5567_v47 = vadd.f32 %v5546_v45, %v5527_v13  ;;  %v5596_v8 = vpack.c.bf16 %v5573_v40, %v5572_v61  ;;  %v9247_v45 = vld [vmem:[%s11994_s15 + $0x10] sm:$0xff]  }
0x1bc7   : > { %v5512_v39 = vpop.permute.xlu1 %5511  ;;  %v5507_v55 = vpop.permute.xlu0 %5506 }
0x1bc8   : > { %v5574_v12 = vmax.f32 %v5566_v34, 0.0  ;;  %v5575_v28 = vmax.f32 %v5567_v47, 0.0  ;;  %v5529_v15 = vmul.f32 %v5512_v39, %v11305_v35  ;;  %v5528_v36 = vmul.f32 %v5507_v55, %v11297_v46  ;;  %8668 = vmatprep.subr.bf16.mxu0 %v5596_v8 }
0x1bc9   : > { %8669 = vmatpush3.bf16.msra.mxu0 %v5596_v8 }
0x1bca   : > { %v5569_v58 = vadd.f32 %v5554_v30, %v5529_v15  ;;  %v5568_v52 = vadd.f32 %v5550_v4, %v5528_v36  ;;  %v5597_v22 = vpack.c.bf16 %v5575_v28, %v5574_v12  ;;  %v9250_v4 = vld [vmem:[%s11994_s15 + $0x28] sm:$0xff]   ;;  %v9251_v30 = vld [vmem:[%s11994_s15 + $0x30] sm:$0xff]  }
0x1bcb   : > { %v5522_v25 = vpop.permute.xlu0 %5521 }
0x1bcc   : > { %v5577_v54 = vmax.f32 %v5569_v58, 0.0  ;;  %v5576_v11 = vmax.f32 %v5568_v52, 0.0  ;;  %v5558_v62 = vpop.permute.xlu1 %5557  ;;  %8670 = vmatprep.subr.bf16.mxu0 %v5597_v22  ;;  %v5531_v35 = vmul.f32 %v5522_v25, %v11317_v57  ;;  %v9249_v57 = vld [vmem:[%s11994_s15 + $0x20] sm:$0xff]  }
0x1bcd   : > { %8671 = vmatpush3.bf16.msra.mxu0 %v5597_v22 }
0x1bce   : > { %v5598_v56 = vpack.c.bf16 %v5577_v54, %v5576_v11 }
0x1bd0   : > { %8672 = vmatprep.subr.bf16.mxu0 %v5598_v56  ;;  %v5602_v20 = vpop.permute.xlu0 %5601 }
0x1bd1   : > { %v5517_v59 = vpop.permute.xlu1 %5516  ;;  %8673 = vmatpush3.bf16.msra.mxu0 %v5598_v56 }
0x1bd2   : > { %v5530_v26 = vmul.f32 %v5517_v59, %v11308_v53  ;;  %v9248_v53 = vld [vmem:[%s11994_s15 + $0x18] sm:$0xff]  }
0x1bd4   : > { %v5570_v46 = vadd.f32 %v5558_v62, %v5530_v26  ;;  %v5614_v27 = vpop.permute.xlu0 %5613 }
0x1bd6   : > { %v5562_v7 = vpop.permute.xlu1 %5561  ;;  %v5578_v49 = vmax.f32 %v5570_v46, 0.0 }
0x1bd7   : > { %v5571_v31 = vadd.f32 %v5562_v7, %v5531_v35 }
0x1bd8   : > { %v5622_v21 = vpop.permute.xlu0 %5621 }
0x1bd9   : > { %v5579_v51 = vmax.f32 %v5571_v31, 0.0 }
0x1bdb   : > { %v5599_v17 = vpack.c.bf16 %v5579_v51, %v5578_v49  ;;  %v5606_v23 = vpop.permute.xlu1 %5605 }
0x1bdc   : > { %v5630_v39 = vpop.permute.xlu0 %5629 }
0x1bdd   : > { %8674 = vmatprep.subr.bf16.mxu0 %v5599_v17 }
0x1bde   : > { %8675 = vmatpush3.bf16.msra.mxu0 %v5599_v17 }
0x1bdf   : > { %9050 = vmatprep.subr.bf16.mxu0 %v9547_v41  ;;  %v5610_v50 = vpop.permute.xlu1 %5609 }
0x1be0   : > { %v5638_v54 = vpop.permute.xlu0 %5637 }
0x1be1   : > { %8677 = vmatmul.mubr.msk.bf16.vlgmr.msra.gmra.mrb[100].mxu0 %vm1050_vm4, %v9246_v32 }
0x1be2   : > { %8680 = vmatprep.mubr.msk.bf16.mxu0 %vm1050_vm4, %v9247_v45 }
0x1be3   : > { %v5618_v38 = vpop.permute.xlu1 %5617 }
0x1be4   : > { %v5646_v46 = vpop.permute.xlu0 %5645 }
0x1be7   : > { %v5626_v34 = vpop.permute.xlu1 %5625 }
0x1be8   : > { %v5654_v45 = vpop.permute.xlu0 %5653 }
0x1be9   : > { %8681 = vmatmul.mubr.msk.bf16.gmra.mrb[104].mxu0 %vm1050_vm4, %v9248_v53 }
0x1bea   : > { %8684 = vmatprep.mubr.msk.bf16.mxu0 %vm1050_vm4, %v9249_v57 }
0x1beb   : > { %v5634_v15 = vpop.permute.xlu1 %5633 }
0x1bef   : > { %v5642_v62 = vpop.permute.xlu1 %5641 }
0x1bf1   : > { %8685 = vmatmul.mubr.msk.bf16.gmra.mrb[108].mxu0 %vm1050_vm4, %v9250_v4 }
0x1bf2   : > { %8688 = vmatprep.mubr.msk.bf16.mxu0 %vm1050_vm4, %v9251_v30 }
0x1bf3   : > { %v5650_v51 = vpop.permute.xlu1 %5649 }
0x1bf9   : > { %8689 = vmatmul.mubr.msk.bf16.gmra.mrb[112].mxu0 %vm1050_vm4, %v9252_v43  ;;  %v5658_v43 = vpop.permute.xlu1 %5657 }
0x1bfa   : > { %8752 = vmatprep.mubr.msk.f32.mxu0 %vm9548_vm3, %v9549_v42 }
0x1cb4   : > { %v8678_v40 = vpop.f32.mrb[100].mxu0 }
0x1cb5   : > { %v5762_v3 = vpop.f32.mrb[101].mxu0  ;;  %v11519_v8 = vadd.f32 %v8678_v40, %v5610_v50  ;;  %v5662_v50 = vpop.permute.xlu0 %5661 }
0x1cb6   : > { %v11513_v61 = vadd.f32 %v5762_v3, %v5602_v20  ;;  %v8679_v2 = vpop.f32.mrb[102].mxu0 }
0x1cb7   : > { %v5765_v13 = vpop.f32.mrb[103].mxu0  ;;  %v11525_v55 = vadd.f32 %v8679_v2, %v5614_v27 }
0x1cb8   : > { %v11515_v47 = vadd.f32 %v5765_v13, %v5606_v23  ;;  %8696 = vmatprep.mubr.msk.f32.mxu1 %vm911_vm2, %v11513_v61 }
0x1cba   : > { %8697 = vmatmul.mubr.msk.f32.vlgmr.msra.gmra.mrb[126].mxu1 %vm911_vm2, %v11515_v47 }
0x1cbb   : > { %8699 = vmatprep.mubr.msk.f32.mxu1 %vm911_vm2, %v11519_v8 }
0x1cbc   : > { %v8682_v12 = vpop.f32.mrb[104].mxu0 }
0x1cbd   : > { %v5778_v28 = vpop.f32.mrb[105].mxu0  ;;  %v11535_v11 = vadd.f32 %v8682_v12, %v5626_v34 }
0x1cbe   : > { %v11527_v36 = vadd.f32 %v5778_v28, %v5618_v38  ;;  %v8683_v58 = vpop.f32.mrb[106].mxu0  ;;  %8700 = vmatmul.mubr.msk.f32.gmra.mrb[128].mxu1 %vm911_vm2, %v11525_v55 }
0x1cbf   : > { %v5781_v52 = vpop.f32.mrb[107].mxu0  ;;  %v11541_v56 = vadd.f32 %v8683_v58, %v5630_v39 }
0x1cc0   : > { %v11531_v22 = vadd.f32 %v5781_v52, %v5622_v21  ;;  %8702 = vmatprep.mubr.msk.f32.mxu1 %vm911_vm2, %v11527_v36 }
0x1cc2   : > { %8703 = vmatmul.mubr.msk.f32.gmra.mrb[130].mxu1 %vm911_vm2, %v11531_v22 }
0x1cc3   : > { %8705 = vmatprep.mubr.msk.f32.mxu1 %vm911_vm2, %v11535_v11 }
0x1cc4   : > { %v8686_v59 = vpop.f32.mrb[108].mxu0 }
0x1cc5   : > { %v5794_v25 = vpop.f32.mrb[109].mxu0  ;;  %v11551_v49 = vadd.f32 %v8686_v59, %v5642_v62 }
0x1cc6   : > { %v11543_v26 = vadd.f32 %v5794_v25, %v5634_v15  ;;  %v8687_v35 = vpop.f32.mrb[110].mxu0  ;;  %8706 = vmatmul.mubr.msk.f32.gmra.mrb[132].mxu1 %vm911_vm2, %v11541_v56 }
0x1cc7   : > { %v5797_v7 = vpop.f32.mrb[111].mxu0  ;;  %v11557_v17 = vadd.f32 %v8687_v35, %v5646_v46 }
0x1cc8   : > { %v11547_v31 = vadd.f32 %v5797_v7, %v5638_v54  ;;  %8708 = vmatprep.mubr.msk.f32.mxu1 %vm911_vm2, %v11543_v26 }
0x1cca   : > { %8709 = vmatmul.mubr.msk.f32.gmra.mrb[134].mxu1 %vm911_vm2, %v11547_v31 }
0x1ccb   : > { %8711 = vmatprep.mubr.msk.f32.mxu1 %vm911_vm2, %v11551_v49 }
0x1ccc   : > { %v8690_v32 = vpop.f32.mrb[112].mxu0 }
0x1ccd   : > { %v5810_v53 = vpop.f32.mrb[113].mxu0  ;;  %v11567_v20 = vadd.f32 %v8690_v32, %v5658_v43 }
0x1cce   : > { %v11559_v57 = vadd.f32 %v5810_v53, %v5650_v51  ;;  %v8691_v4 = vpop.f32.mrb[114].mxu0  ;;  %8712 = vmatmul.mubr.msk.f32.gmra.mrb[136].mxu1 %vm911_vm2, %v11557_v17 }
0x1ccf   : > { %v5813_v30 = vpop.f32.mrb[115].mxu0  ;;  %v11573_v27 = vadd.f32 %v8691_v4, %v5662_v50  ;;  %v11587_v4 = vld [vmem:[%s11986_s7] sm:$0xf]  ;;  %v11602_v50 = vld [vmem:[%s11987_s8 + $0x8] sm:$0xff] }
0x1cd0   : > { %v11563_v23 = vadd.f32 %v5813_v30, %v5654_v45  ;;  %8714 = vmatprep.mubr.msk.f32.mxu1 %vm911_vm2, %v11559_v57  ;;  %v11595_v30 = vld [vmem:[%s11987_s8] sm:$0xff] }
0x1cd2   : > { %8715 = vmatmul.mubr.msk.f32.gmra.mrb[138].mxu1 %vm911_vm2, %v11563_v23 }
0x1cd3   : > { %8717 = vmatprep.mubr.msk.f32.mxu1 %vm911_vm2, %v11567_v20 }
0x1cd6   : > { %8718 = vmatmul.mubr.msk.f32.gmra.mrb[140].mxu1 %vm911_vm2, %v11573_v27 }
0x1cd7   : > { %8757 = vmatprep.mubr.msk.f32.mxu1 %vm829_vm0, %v11595_v30 }
0x1d8d   : > { %v8698_v38 = vpop.f32.mrb[126].mxu1 }
0x1d8e   : > { %v5939_v40 = vpop.f32.mrb[127].mxu1 }
0x1d8f   : > { %v9051_v21 = vpack.c.bf16 %v8698_v38, %v5939_v40  ;;  %v11619_v40 = vld [vmem:[%s11987_s8 + $0x18] sm:$0xff] }
0x1d91   : > { %v8701_v3 = vpop.f32.mrb[128].mxu1  ;;  %9052 = vmatpush3.bf16.msra.mxu0 %v9051_v21  ;;  %v11624_v21 = vld [vmem:[%s11987_s8 + $0x20] sm:$0xff] }
0x1d92   : > { %v5949_v2 = vpop.f32.mrb[129].mxu1  ;;  %9053 = vmatprep.subr.bf16.mxu0 %v9547_v41 }
0x1d93   : > { %v9054_v13 = vpack.c.bf16 %v8701_v3, %v5949_v2  ;;  %v11633_v3 = vld [vmem:[%s11987_s8 + $0x28] sm:$0xff]  ;;  %v11638_v2 = vld [vmem:[%s11987_s8 + $0x30] sm:$0xff] }
0x1d95   : > { %v8704_v34 = vpop.f32.mrb[130].mxu1  ;;  %9055 = vmatpush3.bf16.msra.mxu0 %v9054_v13  ;;  %v11647_v13 = vld [vmem:[%s11987_s8 + $0x38] sm:$0xff] }
0x1d96   : > { %v5959_v39 = vpop.f32.mrb[131].mxu1  ;;  %9056 = vmatprep.subr.bf16.mxu0 %v9547_v41 }
0x1d97   : > { %v9057_v12 = vpack.c.bf16 %v8704_v34, %v5959_v39  ;;  %v11652_v34 = vld [vmem:[%s11987_s8 + $0x40] sm:$0xff]  ;;  %v11661_v39 = vld [vmem:[%s11987_s8 + $0x48] sm:$0xff] }
0x1d99   : > { %v8707_v28 = vpop.f32.mrb[132].mxu1  ;;  %9058 = vmatpush3.bf16.msra.mxu0 %v9057_v12  ;;  %v11666_v12 = vld [vmem:[%s11987_s8 + $0x50] sm:$0xff] }
0x1d9a   : > { %v5969_v15 = vpop.f32.mrb[133].mxu1  ;;  %9059 = vmatprep.subr.bf16.mxu0 %v9547_v41 }
0x1d9b   : > { %v9060_v58 = vpack.c.bf16 %v8707_v28, %v5969_v15  ;;  %v11675_v28 = vld [vmem:[%s11987_s8 + $0x58] sm:$0xff]  ;;  %v11680_v15 = vld [vmem:[%s11987_s8 + $0x60] sm:$0xff] }
0x1d9d   : > { %v8710_v52 = vpop.f32.mrb[134].mxu1  ;;  %9061 = vmatpush3.bf16.msra.mxu0 %v9060_v58  ;;  %v11689_v58 = vld [vmem:[%s11987_s8 + $0x68] sm:$0xff] }
0x1d9e   : > { %v5979_v54 = vpop.f32.mrb[135].mxu1  ;;  %9062 = vmatprep.subr.bf16.mxu0 %v9547_v41 }
0x1d9f   : > { %v9063_v62 = vpack.c.bf16 %v8710_v52, %v5979_v54  ;;  %v11694_v52 = vld [vmem:[%s11987_s8 + $0x70] sm:$0xff]  ;;  %v11703_v54 = vld [vmem:[%s11987_s8 + $0x78] sm:$0xff] }
0x1da1   : > { %v8713_v59 = vpop.f32.mrb[136].mxu1  ;;  %9064 = vmatpush3.bf16.msra.mxu0 %v9063_v62 }
0x1da2   : > { %v5989_v25 = vpop.f32.mrb[137].mxu1  ;;  %9065 = vmatprep.subr.bf16.mxu0 %v9547_v41 }
0x1da3   : > { %v9066_v35 = vpack.c.bf16 %v8713_v59, %v5989_v25 }
0x1da5   : > { %v8716_v46 = vpop.f32.mrb[138].mxu1  ;;  %9067 = vmatpush3.bf16.msra.mxu0 %v9066_v35 }
0x1da6   : > { %v5999_v7 = vpop.f32.mrb[139].mxu1  ;;  %9068 = vmatprep.subr.bf16.mxu0 %v9547_v41 }
0x1da7   : > { %v9069_v51 = vpack.c.bf16 %v8716_v46, %v5999_v7 }
0x1da9   : > { %v8719_v32 = vpop.f32.mrb[140].mxu1  ;;  %9070 = vmatpush3.bf16.msra.mxu0 %v9069_v51 }
0x1daa   : > { %v6009_v45 = vpop.f32.mrb[141].mxu1  ;;  %9071 = vmatprep.subr.bf16.mxu0 %v9547_v41 }
0x1dab   : > { %v9072_v53 = vpack.c.bf16 %v8719_v32, %v6009_v45 }
0x1dad   : > { %9073 = vmatpush3.bf16.msra.mxu0 %v9072_v53 }
0x1dae   : > { %9074 = vmatprep.subr.bf16.mxu0 %v9546_v16 }
0x1db0   : > { %8753 = vmatmul.mubr.f32.vlgmr.msra.gmra.mrb[98].mxu0 %v11587_v4 }
0x1db1   : > { %9075 = vmatpush3.bf16.msra.mxu0 %v9546_v16  ;;  %v11608_v16 = vld [vmem:[%s11987_s8 + $0x10] sm:$0xff] }
0x1e83   : > { %v6101_v43 = vpop.f32.mrb[98].mxu0 }
0x1e84   : > { %v8754_v38 = vpop.f32.mrb[99].mxu0  ;;  %8755 = vmatprep.subr.msk.mxu1 %vm1148_vm5, %v6101_v43 }
0x1e85   : > { %8756 = vmatpush3.msk.msra.mxu1 %vm1148_vm5, %v6101_v43 }
0x1e86   : > { %8758 = vmatmul.mubr.msk.f32.vlgmr.msra.gmra.mrb[142].mxu1 %vm829_vm0, %v11602_v50  ;;  %9076 = vmatprep.subr.bf16.mxu1 %v9547_v41 }
0x1e87   : > { %8760 = vmatprep.mubr.msk.f32.mxu1 %vm829_vm0, %v11608_v16 }
0x1e8a   : > { %8761 = vmatmul.mubr.msk.f32.gmra.mrb[144].mxu1 %vm829_vm0, %v11619_v40 }
0x1e8b   : > { %8763 = vmatprep.mubr.msk.f32.mxu1 %vm829_vm0, %v11624_v21 }
0x1e8e   : > { %8764 = vmatmul.mubr.msk.f32.gmra.mrb[146].mxu1 %vm829_vm0, %v11633_v3 }
0x1e8f   : > { %8766 = vmatprep.mubr.msk.f32.mxu1 %vm829_vm0, %v11638_v2 }
0x1e92   : > { %8767 = vmatmul.mubr.msk.f32.gmra.mrb[148].mxu1 %vm829_vm0, %v11647_v13 }
0x1e93   : > { %8769 = vmatprep.mubr.msk.f32.mxu1 %vm829_vm0, %v11652_v34 }
0x1e96   : > { %8770 = vmatmul.mubr.msk.f32.gmra.mrb[150].mxu1 %vm829_vm0, %v11661_v39 }
0x1e97   : > { %8772 = vmatprep.mubr.msk.f32.mxu1 %vm829_vm0, %v11666_v12 }
0x1e9a   : > { %8773 = vmatmul.mubr.msk.f32.gmra.mrb[152].mxu1 %vm829_vm0, %v11675_v28 }
0x1e9b   : > { %8775 = vmatprep.mubr.msk.f32.mxu1 %vm829_vm0, %v11680_v15 }
0x1e9e   : > { %8776 = vmatmul.mubr.msk.f32.gmra.mrb[154].mxu1 %vm829_vm0, %v11689_v58 }
0x1e9f   : > { %8778 = vmatprep.mubr.msk.f32.mxu1 %vm829_vm0, %v11694_v52 }
0x1ea2   : > { %8779 = vmatmul.mubr.msk.f32.gmra.mrb[156].mxu1 %vm829_vm0, %v11703_v54 }
0x1ea3   : > { %8841 = vmatprep.mubr.msk.f32.mxu1 %vm9548_vm3, %v9549_v42 }
0x1f59   : > { %v8759_v62 = vpop.f32.mrb[142].mxu1 }
0x1f5a   : > { %6308 = vperm.xlu0 %9211, %v8759_v62   ;;  %v6222_v59 = vpop.f32.mrb[143].mxu1 }
0x1f5b   : > { %6303 = vperm.xlu1 %9212, %v6222_v59  }
0x1f5d   : > { %v8762_v25 = vpop.f32.mrb[144].mxu1 }
0x1f5e   : > { %v6232_v35 = vpop.f32.mrb[145].mxu1 }
0x1f5f   : > { %6313 = vperm.xlu1 %9212, %v6232_v35  }
0x1f61   : > { %v8765_v46 = vpop.f32.mrb[146].mxu1 }
0x1f62   : > { %v6242_v7 = vpop.f32.mrb[147].mxu1 }
0x1f63   : > { %6318 = vperm.xlu1 %9212, %v8762_v25   ;;  %6323 = vperm.xlu0 %9211, %v6242_v7  }
0x1f65   : > { %v8768_v51 = vpop.f32.mrb[148].mxu1 }
0x1f66   : > { %v6252_v32 = vpop.f32.mrb[149].mxu1 }
0x1f67   : > { %6328 = vperm.xlu1 %9212, %v8765_v46   ;;  %6333 = vperm.xlu0 %9211, %v6252_v32  }
0x1f69   : > { %v8771_v45 = vpop.f32.mrb[150].mxu1 }
0x1f6a   : > { %v6262_v53 = vpop.f32.mrb[151].mxu1 }
0x1f6b   : > { %6338 = vperm.xlu1 %9212, %v8768_v51   ;;  %6343 = vperm.xlu0 %9211, %v6262_v53  }
0x1f6d   : > { %v8774_v43 = vpop.f32.mrb[152].mxu1 }
0x1f6e   : > { %v6272_v38 = vpop.f32.mrb[153].mxu1 }
0x1f6f   : > { %6348 = vperm.xlu1 %9212, %v8771_v45   ;;  %6353 = vperm.xlu0 %9211, %v6272_v38  }
0x1f71   : > { %v8777_v62 = vpop.f32.mrb[154].mxu1 }
0x1f72   : > { %v6282_v59 = vpop.f32.mrb[155].mxu1 }
0x1f73   : > { %6358 = vperm.xlu1 %9212, %v8774_v43   ;;  %6363 = vperm.xlu0 %9211, %v6282_v59  }
0x1f75   : > { %v8780_v35 = vpop.f32.mrb[156].mxu1 }
0x1f76   : > { %v6292_v1 = vpop.f32.mrb[157].mxu1 }
0x1f77   : > { %6368 = vperm.xlu1 %9212, %v8777_v62   ;;  %6373 = vperm.xlu0 %9211, %v6292_v1  }
0x1f7b   : > { %6378 = vperm.xlu1 %9212, %v8780_v35   ;;  %6840 = vrot.lane.b32.xlu0 %v11340_v37, %s9563_s23 }
0x1f7f   : > { %6842 = vrot.lane.b32.xlu1 %v11334_v33, %s9563_s23  ;;  %6844 = vrot.lane.b32.xlu0 %v11354_v10, %s9563_s23 }
0x1f83   : > { %6846 = vrot.lane.b32.xlu1 %v11348_v6, %s9563_s23  ;;  %6848 = vrot.lane.b32.xlu0 %v11366_v5, %s9563_s23 }
0x1f87   : > { %6850 = vrot.lane.b32.xlu1 %v11360_v63, %s9563_s23  ;;  %6852 = vrot.lane.b32.xlu0 %v11378_v19, %s9563_s23 }
0x1f8b   : > { %6854 = vrot.lane.b32.xlu1 %v11372_v44, %s9563_s23  ;;  %6856 = vrot.lane.b32.xlu0 %v11427_v14, %s9563_s23 }
0x1f8f   : > { %6858 = vrot.lane.b32.xlu1 %v11433_v60, %s9563_s23  ;;  %6860 = vrot.lane.b32.xlu0 %v11439_v48, %s9563_s23 }
0x1f93   : > { %6862 = vrot.lane.b32.xlu1 %v11445_v0, %s9563_s23  ;;  %6864 = vrot.lane.b32.xlu0 %v11451_v9, %s9563_s23 }
0x1f97   : > { %6866 = vrot.lane.b32.xlu1 %v11457_v18, %s9563_s23  ;;  %6868 = vrot.lane.b32.xlu0 %v11463_v24, %s9563_s23 }
0x1f9b   : > { %6870 = vrot.lane.b32.xlu1 %v11469_v29, %s9563_s23  ;;  %s7581_s23 = sshll.u32 %s9678_s28, 6  ;;  %s7153_s28 = scalar_lea.sflag [#allocation4], %s581_s21 }
0x1f9c   : > { %s11937_s24 = scalar_lea.hbm %s11996_s17, %s7581_s23 }
0x1fd9   : > { %v6309_v25 = vpop.permute.xlu0 %6308 }
0x1fda   : > { %v11710_v46 = vsub.f32 %v11515_v47, %v6309_v25  ;;  %v6304_v7 = vpop.permute.xlu1 %6303 }
0x1fdb   : > { %v11713_v51 = vsub.f32 %v11513_v61, %v6304_v7 }
0x1fdc   : > { %v6398_v45 = vmul.f32 %v11710_v46, %v11710_v46 }
0x1fdd   : > { %v6397_v32 = vmul.f32 %v11713_v51, %v11713_v51 }
0x1fde   : > { %v6314_v53 = vpop.permute.xlu1 %6313 }
0x1fdf   : > { %v11720_v43 = vsub.f32 %v11519_v8, %v6314_v53  ;;  %8785 = vmatprep.mubr.msk.f32.mxu0 %vm911_vm2, %v6397_v32 }
0x1fe0   : > { %8786 = vmatmul.mubr.msk.f32.vlgmr.msra.gmra.mrb[116].mxu0 %vm911_vm2, %v6398_v45 }
0x1fe1   : > { %v6399_v1 = vmul.f32 %v11720_v43, %v11720_v43 }
0x1fe2   : > { %v6319_v47 = vpop.permute.xlu1 %6318  ;;  %v6324_v61 = vpop.permute.xlu0 %6323 }
0x1fe3   : > { %v11727_v38 = vsub.f32 %v11525_v55, %v6319_v47  ;;  %v11730_v62 = vsub.f32 %v11527_v36, %v6324_v61  ;;  %8788 = vmatprep.mubr.msk.f32.mxu0 %vm911_vm2, %v6399_v1 }
0x1fe5   : > { %v6400_v8 = vmul.f32 %v11727_v38, %v11727_v38  ;;  %v6401_v59 = vmul.f32 %v11730_v62, %v11730_v62 }
0x1fe6   : > { %v6329_v35 = vpop.permute.xlu1 %6328  ;;  %v6334_v25 = vpop.permute.xlu0 %6333 }
0x1fe7   : > { %v11738_v7 = vsub.f32 %v11531_v22, %v6329_v35  ;;  %v11741_v32 = vsub.f32 %v11535_v11, %v6334_v25  ;;  %8789 = vmatmul.mubr.msk.f32.gmra.mrb[118].mxu0 %vm911_vm2, %v6400_v8 }
0x1fe8   : > { %8791 = vmatprep.mubr.msk.f32.mxu0 %vm911_vm2, %v6401_v59 }
0x1fe9   : > { %v6402_v55 = vmul.f32 %v11738_v7, %v11738_v7  ;;  %v6403_v36 = vmul.f32 %v11741_v32, %v11741_v32 }
0x1fea   : > { %v6339_v45 = vpop.permute.xlu1 %6338  ;;  %v6344_v53 = vpop.permute.xlu0 %6343 }
0x1feb   : > { %v11750_v1 = vsub.f32 %v11541_v56, %v6339_v45  ;;  %v11753_v22 = vsub.f32 %v11543_v26, %v6344_v53  ;;  %8792 = vmatmul.mubr.msk.f32.gmra.mrb[120].mxu0 %vm911_vm2, %v6402_v55 }
0x1fec   : > { %8794 = vmatprep.mubr.msk.f32.mxu0 %vm911_vm2, %v6403_v36 }
0x1fed   : > { %v6404_v11 = vmul.f32 %v11750_v1, %v11750_v1  ;;  %v6405_v47 = vmul.f32 %v11753_v22, %v11753_v22 }
0x1fee   : > { %v6349_v61 = vpop.permute.xlu1 %6348  ;;  %v6354_v8 = vpop.permute.xlu0 %6353 }
0x1fef   : > { %v11762_v59 = vsub.f32 %v11547_v31, %v6349_v61  ;;  %v11765_v56 = vsub.f32 %v11551_v49, %v6354_v8  ;;  %8795 = vmatmul.mubr.msk.f32.gmra.mrb[122].mxu0 %vm911_vm2, %v6404_v11 }
0x1ff0   : > { %8797 = vmatprep.mubr.msk.f32.mxu0 %vm911_vm2, %v6405_v47 }
0x1ff1   : > { %v6406_v26 = vmul.f32 %v11762_v59, %v11762_v59  ;;  %v6407_v35 = vmul.f32 %v11765_v56, %v11765_v56 }
0x1ff2   : > { %v6359_v25 = vpop.permute.xlu1 %6358  ;;  %v6364_v55 = vpop.permute.xlu0 %6363 }
0x1ff3   : > { %v11774_v36 = vsub.f32 %v11557_v17, %v6359_v25  ;;  %v11777_v31 = vsub.f32 %v11559_v57, %v6364_v55  ;;  %8798 = vmatmul.mubr.msk.f32.gmra.mrb[124].mxu0 %vm911_vm2, %v6406_v26 }
0x1ff4   : > { %8800 = vmatprep.mubr.msk.f32.mxu0 %vm911_vm2, %v6407_v35 }
0x1ff5   : > { %v6408_v49 = vmul.f32 %v11774_v36, %v11774_v36  ;;  %v6409_v45 = vmul.f32 %v11777_v31, %v11777_v31 }
0x1ff6   : > { %v6369_v53 = vpop.permute.xlu1 %6368  ;;  %v6374_v11 = vpop.permute.xlu0 %6373 }
0x1ff7   : > { %v11786_v47 = vsub.f32 %v11563_v23, %v6369_v53  ;;  %v11789_v17 = vsub.f32 %v11567_v20, %v6374_v11  ;;  %8801 = vmatmul.mubr.msk.f32.gmra.mrb[126].mxu0 %vm911_vm2, %v6408_v49 }
0x1ff8   : > { %8803 = vmatprep.mubr.msk.f32.mxu0 %vm911_vm2, %v6409_v45 }
0x1ff9   : > { %v6410_v57 = vmul.f32 %v11786_v47, %v11786_v47  ;;  %v6411_v61 = vmul.f32 %v11789_v17, %v11789_v17 }
0x1ffa   : > { %v6379_v8 = vpop.permute.xlu1 %6378 }
0x1ffb   : > { %v11798_v26 = vsub.f32 %v11573_v27, %v6379_v8  ;;  %8804 = vmatmul.mubr.msk.f32.gmra.mrb[128].mxu0 %vm911_vm2, %v6410_v57 }
0x1ffc   : > { %8806 = vmatprep.mubr.msk.f32.mxu0 %vm911_vm2, %v6411_v61 }
0x1ffd   : > { %v6412_v23 = vmul.f32 %v11798_v26, %v11798_v26 }
0x1fff   : > { %8807 = vmatmul.mubr.msk.f32.gmra.mrb[130].mxu0 %vm911_vm2, %v6412_v23 }
0x2000   : > { %8846 = vmatprep.mubr.msk.f32.mxu0 %vm829_vm0, %v11595_v30 }
0x20b3   : > { %v8787_v20 = vpop.f32.mrb[116].mxu0 }
0x20b4   : > { %v6527_v35 = vpop.f32.mrb[117].mxu0 }
0x20b5   : > { %v9077_v25 = vpack.c.bf16 %v8787_v20, %v6527_v35 }
0x20b7   : > { %9078 = vmatpush3.bf16.msra.mxu1 %v9077_v25 }
0x20b8   : > { %9079 = vmatprep.subr.bf16.mxu1 %v9547_v41 }
0x20ba   : > { %v8790_v27 = vpop.f32.mrb[118].mxu0 }
0x20bb   : > { %v6537_v55 = vpop.f32.mrb[119].mxu0 }
0x20bc   : > { %v9080_v49 = vpack.c.bf16 %v8790_v27, %v6537_v55 }
0x20be   : > { %v8793_v45 = vpop.f32.mrb[120].mxu0  ;;  %9081 = vmatpush3.bf16.msra.mxu1 %v9080_v49 }
0x20bf   : > { %v6547_v53 = vpop.f32.mrb[121].mxu0  ;;  %9082 = vmatprep.subr.bf16.mxu1 %v9547_v41 }
0x20c0   : > { %v9083_v11 = vpack.c.bf16 %v8793_v45, %v6547_v53 }
0x20c2   : > { %v8796_v57 = vpop.f32.mrb[122].mxu0  ;;  %9084 = vmatpush3.bf16.msra.mxu1 %v9083_v11 }
0x20c3   : > { %v6557_v61 = vpop.f32.mrb[123].mxu0  ;;  %9085 = vmatprep.subr.bf16.mxu1 %v9547_v41 }
0x20c4   : > { %v9086_v30 = vpack.c.bf16 %v8796_v57, %v6557_v61  ;;  %v9564_v61 = vmov 14  }
0x20c5   : > { %9214 = vset.pattern.permute.xlu1 %v9564_v61  ;;  %9213 = vset.pattern.permute.xlu0 %v9564_v61 }
0x20c6   : > { %v8799_v8 = vpop.f32.mrb[124].mxu0  ;;  %9087 = vmatpush3.bf16.msra.mxu1 %v9086_v30  ;;  %7005 = vperm.xlu1 %9214, %v11334_v33  }
0x20c7   : > { %v6567_v23 = vpop.f32.mrb[125].mxu0  ;;  %9088 = vmatprep.subr.bf16.mxu1 %v9547_v41  ;;  %7001 = vperm.xlu0 %9213, %v11340_v37  }
0x20c8   : > { %v9089_v20 = vpack.c.bf16 %v8799_v8, %v6567_v23 }
0x20ca   : > { %v8802_v35 = vpop.f32.mrb[126].mxu0  ;;  %9090 = vmatpush3.bf16.msra.mxu1 %v9089_v20  ;;  %7009 = vperm.xlu1 %9214, %v11354_v10  }
0x20cb   : > { %v6577_v25 = vpop.f32.mrb[127].mxu0  ;;  %9091 = vmatprep.subr.bf16.mxu1 %v9547_v41  ;;  %7017 = vperm.xlu0 %9213, %v11366_v5  }
0x20cc   : > { %v9092_v27 = vpack.c.bf16 %v8802_v35, %v6577_v25 }
0x20ce   : > { %v8805_v55 = vpop.f32.mrb[128].mxu0  ;;  %9093 = vmatpush3.bf16.msra.mxu1 %v9092_v27  ;;  %7013 = vperm.xlu1 %9214, %v11348_v6   ;;  %v6843_v6 = vpop.permute.xlu1 %6842 }
0x20cf   : > { %v6587_v49 = vpop.f32.mrb[129].mxu0  ;;  %9094 = vmatprep.subr.bf16.mxu1 %v9547_v41  ;;  %7033 = vperm.xlu0 %9213, %v11427_v14  }
0x20d0   : > { %v9095_v45 = vpack.c.bf16 %v8805_v55, %v6587_v49 }
0x20d2   : > { %v8808_v53 = vpop.f32.mrb[130].mxu0  ;;  %9096 = vmatpush3.bf16.msra.mxu1 %v9095_v45  ;;  %7021 = vperm.xlu1 %9214, %v11360_v63   ;;  %v6841_v63 = vpop.permute.xlu0 %6840 }
0x20d3   : > { %v6597_v11 = vpop.f32.mrb[131].mxu0  ;;  %9097 = vmatprep.subr.bf16.mxu1 %v9547_v41  ;;  %7049 = vperm.xlu0 %9213, %v11451_v9   ;;  %v12021_v41 = vmov 0   ;;  %v6847_v14 = vpop.permute.xlu1 %6846 }
0x20d4   : > { %v9098_v57 = vpack.c.bf16 %v8808_v53, %v6597_v11 }
0x20d6   : > { %9099 = vmatpush3.bf16.msra.mxu1 %v9098_v57  ;;  %7025 = vperm.xlu1 %9214, %v11378_v19  }
0x20d7   : > { %8870 = vmatprep.subr.bf16.mxu1 %v9549_v42  ;;  %9216 = vset.pattern.permute.xlu0 %v12021_v41 }
0x20d9   : > { %8842 = vmatmul.mubr.f32.vlgmr.msra.gmra.mrb[158].mxu1 %v11587_v4 }
0x20da   : > { %8886 = vmatprep.mubr.msk.bf16.mxu1 %vm9548_vm3, %v9549_v42  ;;  %7029 = vperm.xlu1 %9214, %v11372_v44  }
0x20de   : > { %7037 = vperm.xlu1 %9214, %v11433_v60  }
0x20e2   : > { %7041 = vperm.xlu1 %9214, %v11439_v48  }
0x20e6   : > { %7045 = vperm.xlu1 %9214, %v11445_v0  }
0x20ea   : > { %7053 = vperm.xlu1 %9214, %v11457_v18   ;;  %v6845_v18 = vpop.permute.xlu0 %6844 }
0x20ee   : > { %9215 = vset.pattern.permute.xlu1 %v12021_v41 }
0x21ac   : > { %v6672_v33 = vpop.f32.mrb[158].mxu1 }
0x21ad   : > { %v8843_v37 = vpop.f32.mrb[159].mxu1  ;;  %8844 = vmatprep.subr.msk.mxu0 %vm1148_vm5, %v6672_v33 }
0x21ae   : > { %8845 = vmatpush3.msk.msra.mxu0 %vm1148_vm5, %v6672_v33 }
0x21af   : > { %8847 = vmatmul.mubr.msk.f32.vlgmr.msra.gmra.mrb[132].mxu0 %vm829_vm0, %v11602_v50  ;;  %v6851_v50 = vpop.permute.xlu1 %6850 }
0x21b0   : > { %8849 = vmatprep.mubr.msk.f32.mxu0 %vm829_vm0, %v11608_v16 }
0x21b3   : > { %8850 = vmatmul.mubr.msk.f32.gmra.mrb[134].mxu0 %vm829_vm0, %v11619_v40 }
0x21b4   : > { %8852 = vmatprep.mubr.msk.f32.mxu0 %vm829_vm0, %v11624_v21  ;;  %v6849_v21 = vpop.permute.xlu0 %6848 }
0x21b7   : > { %8853 = vmatmul.mubr.msk.f32.gmra.mrb[136].mxu0 %vm829_vm0, %v11633_v3 }
0x21b8   : > { %8855 = vmatprep.mubr.msk.f32.mxu0 %vm829_vm0, %v11638_v2  ;;  %v6853_v35 = vpop.permute.xlu0 %6852 }
0x21bb   : > { %8856 = vmatmul.mubr.msk.f32.gmra.mrb[138].mxu0 %vm829_vm0, %v11647_v13 }
0x21bc   : > { %8858 = vmatprep.mubr.msk.f32.mxu0 %vm829_vm0, %v11652_v34 }
0x21bf   : > { %8859 = vmatmul.mubr.msk.f32.gmra.mrb[140].mxu0 %vm829_vm0, %v11661_v39 }
0x21c0   : > { %8861 = vmatprep.mubr.msk.f32.mxu0 %vm829_vm0, %v11666_v12 }
0x21c3   : > { %8862 = vmatmul.mubr.msk.f32.gmra.mrb[142].mxu0 %vm829_vm0, %v11675_v28 }
0x21c4   : > { %8864 = vmatprep.mubr.msk.f32.mxu0 %vm829_vm0, %v11680_v15  ;;  %v6855_v15 = vpop.permute.xlu1 %6854 }
0x21c7   : > { %8865 = vmatmul.mubr.msk.f32.gmra.mrb[144].mxu0 %vm829_vm0, %v11689_v58 }
0x21c8   : > { %8867 = vmatprep.mubr.msk.f32.mxu0 %vm829_vm0, %v11694_v52  ;;  %v6859_v53 = vpop.permute.xlu1 %6858 }
0x21cb   : > { %8868 = vmatmul.mubr.msk.f32.gmra.mrb[146].mxu0 %vm829_vm0, %v11703_v54 }
0x2282   : > { %v8848_v10 = vpop.f32.mrb[132].mxu0 }
0x2283   : > { %v6751_v5 = vadd.f32 1e-05, %v8848_v10  ;;  %v6745_v44 = vpop.f32.mrb[133].mxu0  ;;  %v6857_v10 = vpop.permute.xlu0 %6856 }
0x2284   : > { %v6746_v19 = vadd.f32 1e-05, %v6745_v44 }
0x2285   : > { %9385 = vrsqrt.f32 %v6751_v5 }
0x2286   : > { %9387 = vrsqrt.f32 %v6746_v19  ;;  %v8851_v60 = vpop.f32.mrb[134].mxu0 }
0x2287   : > { %v6761_v48 = vadd.f32 1e-05, %v8851_v60  ;;  %v6755_v0 = vpop.f32.mrb[135].mxu0 }
0x2288   : > { %v6756_v9 = vadd.f32 1e-05, %v6755_v0  ;;  %v6863_v0 = vpop.permute.xlu1 %6862 }
0x2289   : > { %9389 = vrsqrt.f32 %v6761_v48 }
0x228a   : > { %9391 = vrsqrt.f32 %v6756_v9  ;;  %v8854_v24 = vpop.f32.mrb[136].mxu0 }
0x228b   : > { %v6771_v29 = vadd.f32 1e-05, %v8854_v24  ;;  %v6765_v4 = vpop.f32.mrb[137].mxu0 }
0x228c   : > { %v6766_v16 = vadd.f32 1e-05, %v6765_v4 }
0x228d   : > { %9393 = vrsqrt.f32 %v6771_v29 }
0x228e   : > { %9395 = vrsqrt.f32 %v6766_v16  ;;  %v8857_v40 = vpop.f32.mrb[138].mxu0  ;;  %v6861_v16 = vpop.permute.xlu0 %6860 }
0x228f   : > { %v9386_v3 = vpop.eup %9385  ;;  %v6781_v2 = vadd.f32 1e-05, %v8857_v40  ;;  %v6775_v13 = vpop.f32.mrb[139].mxu0 }
0x2290   : > { %v9388_v34 = vpop.eup %9387  ;;  %v6889_v39 = vmul.f32 %v9386_v3, %v6843_v6  ;;  %v6776_v12 = vadd.f32 1e-05, %v6775_v13 }
0x2291   : > { %9397 = vrsqrt.f32 %v6781_v2  ;;  %v6888_v28 = vmul.f32 %v9388_v34, %v6841_v63  ;;  %v6867_v2 = vpop.permute.xlu1 %6866 }
0x2292   : > { %9399 = vrsqrt.f32 %v6776_v12  ;;  %6911 = vperm.xlu1 %9215, %v6889_v39   ;;  %v8860_v58 = vpop.f32.mrb[140].mxu0  ;;  %v6865_v12 = vpop.permute.xlu0 %6864 }
0x2293   : > { %v9390_v52 = vpop.eup %9389  ;;  %v6791_v54 = vadd.f32 1e-05, %v8860_v58  ;;  %v6785_v30 = vpop.f32.mrb[141].mxu0  ;;  %6906 = vperm.xlu0 %9216, %v6888_v28  }
0x2294   : > { %v9392_v8 = vpop.eup %9391  ;;  %v6786_v23 = vadd.f32 1e-05, %v6785_v30  ;;  %v6891_v20 = vmul.f32 %v9390_v52, %v6847_v14 }
0x2295   : > { %9401 = vrsqrt.f32 %v6791_v54  ;;  %v6890_v25 = vmul.f32 %v9392_v8, %v6845_v18  ;;  %v6871_v54 = vpop.permute.xlu1 %6870 }
0x2296   : > { %9403 = vrsqrt.f32 %v6786_v23  ;;  %v8863_v27 = vpop.f32.mrb[142].mxu0 }
0x2297   : > { %v9394_v55 = vpop.eup %9393  ;;  %v6801_v49 = vadd.f32 1e-05, %v8863_v27  ;;  %v6795_v45 = vpop.f32.mrb[143].mxu0  ;;  %6916 = vperm.xlu1 %9215, %v6890_v25   ;;  %6921 = vperm.xlu0 %9216, %v6891_v20   ;;  %v9458_v27 = vld [vmem:[%s11983_s4 + $0x78] sm:$0xff] }
0x2298   : > { %v9396_v11 = vpop.eup %9395  ;;  %v6796_v57 = vadd.f32 1e-05, %v6795_v45  ;;  %v6893_v33 = vmul.f32 %v9394_v55, %v6851_v50  ;;  %v6869_v20 = vpop.permute.xlu0 %6868  ;;  %v9565_v55 = vmov 15  }
0x2299   : > { %9405 = vrsqrt.f32 %v6801_v49  ;;  %v6892_v37 = vmul.f32 %v9396_v11, %v6849_v21  ;;  %v9459_v49 = vld [vmem:[%s11983_s4] sm:$0xff]  ;;  %v7006_v45 = vpop.permute.xlu1 %7005 }
0x229a   : > { %9407 = vrsqrt.f32 %v6796_v57  ;;  %v8866_v6 = vpop.f32.mrb[144].mxu0 }
0x229b   : > { %v9398_v63 = vpop.eup %9397  ;;  %v6811_v5 = vadd.f32 1e-05, %v8866_v6  ;;  %v6805_v44 = vpop.f32.mrb[145].mxu0  ;;  %6931 = vperm.xlu1 %9215, %v6893_v33   ;;  %6926 = vperm.xlu0 %9216, %v6892_v37  }
0x229c   : > { %v9400_v19 = vpop.eup %9399  ;;  %v6806_v14 = vadd.f32 1e-05, %v6805_v44  ;;  %v6895_v60 = vmul.f32 %v9398_v63, %v6855_v15 }
0x229d   : > { %9409 = vrsqrt.f32 %v6811_v5  ;;  %v6894_v48 = vmul.f32 %v9400_v19, %v6853_v35  ;;  %v9457_v35 = vld [vmem:[%s11983_s4 + $0x70] sm:$0xff] }
0x229e   : > { %9411 = vrsqrt.f32 %v6806_v14  ;;  %v8869_v9 = vpop.f32.mrb[146].mxu0 }
0x229f   : > { %v9402_v18 = vpop.eup %9401  ;;  %v6821_v24 = vadd.f32 1e-05, %v8869_v9  ;;  %6936 = vperm.xlu1 %9215, %v6894_v48   ;;  %6941 = vperm.xlu0 %9216, %v6895_v60   ;;  %v6815_v29 = vpop.f32.mrb[147].mxu0 }
0x22a0   : > { %v9404_v4 = vpop.eup %9403  ;;  %v6897_v50 = vmul.f32 %v9402_v18, %v6859_v53  ;;  %v6816_v40 = vadd.f32 1e-05, %v6815_v29  ;;  %v7010_v53 = vpop.permute.xlu1 %7009 }
0x22a1   : > { %9413 = vrsqrt.f32 %v6821_v24  ;;  %v6896_v21 = vmul.f32 %v9404_v4, %v6857_v10 }
0x22a2   : > { %9415 = vrsqrt.f32 %v6816_v40 }
0x22a3   : > { %v9406_v3 = vpop.eup %9405  ;;  %6951 = vperm.xlu1 %9215, %v6897_v50   ;;  %6946 = vperm.xlu0 %9216, %v6896_v21  }
0x22a4   : > { %v9408_v13 = vpop.eup %9407  ;;  %v6899_v34 = vmul.f32 %v9406_v3, %v6863_v0  ;;  %v7014_v11 = vpop.permute.xlu1 %7013 }
0x22a5   : > { %v6898_v39 = vmul.f32 %v9408_v13, %v6861_v16 }
0x22a7   : > { %v9410_v28 = vpop.eup %9409  ;;  %6956 = vperm.xlu1 %9215, %v6898_v39   ;;  %6961 = vperm.xlu0 %9216, %v6899_v34  }
0x22a8   : > { %v9412_v15 = vpop.eup %9411  ;;  %v6901_v58 = vmul.f32 %v9410_v28, %v6867_v2  ;;  %v7022_v57 = vpop.permute.xlu1 %7021 }
0x22a9   : > { %v6900_v52 = vmul.f32 %v9412_v15, %v6865_v12 }
0x22ab   : > { %v9414_v30 = vpop.eup %9413  ;;  %6971 = vperm.xlu1 %9215, %v6901_v58   ;;  %6966 = vperm.xlu0 %9216, %v6900_v52  }
0x22ac   : > { %v6903_v8 = vmul.f32 %v9414_v30, %v6871_v54  ;;  %v9416_v23 = vpop.eup %9415 }
0x22ad   : > { %v6902_v25 = vmul.f32 %v9416_v23, %v6869_v20 }
0x22af   : > { %9217 = vset.pattern.permute.xlu1 %v9564_v61  ;;  %6981 = vperm.xlu0 %9216, %v6903_v8  }
0x22b0   : > { %7057 = vperm.xlu1 %9217, %v9457_v35  }
0x22b3   : > { %9220 = vset.pattern.permute.xlu0 %v9565_v55 }
0x22b4   : > { %9218 = vset.pattern.permute.xlu1 %v12021_v41  ;;  %7106 = vperm.xlu0 %9220, %v9459_v49   ;;  %v7026_v41 = vpop.permute.xlu1 %7025 }
0x22b5   : > { %6976 = vperm.xlu1 %9218, %v6902_v25  }
0x22b8   : > { %v7030_v33 = vpop.permute.xlu1 %7029 }
0x22b9   : > { %9219 = vset.pattern.permute.xlu1 %v9564_v61  ;;  %v7002_v61 = vpop.permute.xlu0 %7001 }
0x22ba   : > { %7061 = vperm.xlu1 %9219, %v9458_v27  }
0x22bc   : > { %v7038_v37 = vpop.permute.xlu1 %7037 }
0x22bd   : > { %v7018_v10 = vpop.permute.xlu0 %7017 }
0x22c0   : > { %v11896_v6 = vpop.permute.xlu1 %7041 }
0x22c1   : > { %v7034_v5 = vpop.permute.xlu0 %7033 }
0x22c4   : > { %v7046_v63 = vpop.permute.xlu1 %7045 }
0x22c5   : > { %v11900_v19 = vpop.permute.xlu0 %7049 }
0x22c8   : > { %v11898_v44 = vpop.permute.xlu1 %7053 }
0x2311   : > { %v6912_v14 = vpop.permute.xlu1 %6911 }
0x2312   : > { %v6985_v60 = vmul.f32 %v6912_v14, %v11710_v46  ;;  %v6907_v48 = vpop.permute.xlu0 %6906 }
0x2313   : > { %v6984_v0 = vmul.f32 %v6907_v48, %v11713_v51 }
0x2314   : > { %v7065_v9 = vadd.f32 %v7006_v45, %v6985_v60 }
0x2315   : > { %v7064_v18 = vadd.f32 %v7002_v61, %v6984_v0 }
0x2316   : > { %v7081_v24 = vmax.f32 %v7065_v9, 0.0  ;;  %v6917_v29 = vpop.permute.xlu1 %6916  ;;  %v6922_v4 = vpop.permute.xlu0 %6921 }
0x2317   : > { %v7080_v50 = vmax.f32 %v7064_v18, 0.0  ;;  %v6986_v16 = vmul.f32 %v6917_v29, %v11720_v43  ;;  %v6987_v40 = vmul.f32 %v6922_v4, %v11727_v38 }
0x2319   : > { %v7097_v21 = vpack.c.bf16 %v7081_v24, %v7080_v50  ;;  %v7066_v3 = vadd.f32 %v7010_v53, %v6986_v16  ;;  %v7067_v2 = vadd.f32 %v7014_v11, %v6987_v40 }
0x231a   : > { %v6932_v13 = vpop.permute.xlu1 %6931  ;;  %v6927_v34 = vpop.permute.xlu0 %6926 }
0x231b   : > { %v7082_v39 = vmax.f32 %v7066_v3, 0.0  ;;  %v7083_v46 = vmax.f32 %v7067_v2, 0.0  ;;  %v6989_v12 = vmul.f32 %v6932_v13, %v11738_v7  ;;  %v6988_v51 = vmul.f32 %v6927_v34, %v11730_v62  ;;  %8871 = vmatpush3.bf16.msra.mxu1 %v7097_v21  ;;  %v7096_v3 = vld [vmem:[%s11995_s16] sm:$0x3] }
0x231c   : > { %8872 = vmatprep.subr.bf16.mxu1 %v9549_v42  ;;  %v9460_v34 = vld [vmem:[%s9747_s0] sm:$0xf]  ;;  %s9566_s0 = smov [#allocation6]  }
0x231d   : > { %v7098_v28 = vpack.c.bf16 %v7083_v46, %v7082_v39  ;;  %v7069_v15 = vadd.f32 %v7022_v57, %v6989_v12  ;;  %v7068_v58 = vadd.f32 %v7018_v10, %v6988_v51  ;;  %s9480_s18 = sshll.u32 %s9566_s0, 4  ;;  %s9481_s18 = int_to_ptr.vmem [resolvable:$false] %s9480_s18 }
0x231e   : > { %v6937_v43 = vpop.permute.xlu1 %6936  ;;  %v6942_v52 = vpop.permute.xlu0 %6941  ;;  %s9482_s22 = scalar_lea.vmem %s9481_s18, 128  ;;  %p9483_p13 = scmp.lt.s32.totalorder %s11939_s29, %s9481_s18 }
0x231f   : > { %v7085_v38 = vmax.f32 %v7069_v15, 0.0  ;;  %v7084_v54 = vmax.f32 %v7068_v58, 0.0  ;;  %v6990_v30 = vmul.f32 %v6937_v43, %v11741_v32  ;;  %v6991_v8 = vmul.f32 %v6942_v52, %v11750_v1  ;;  %8873 = vmatpush3.bf16.msra.mxu1 %v7098_v28  ;;  %p9484_p0 = scmp.lt.s32.totalorder %s9482_s22, %s9476_s19 }
0x2320   : > { %8874 = vmatprep.subr.bf16.mxu1 %v9549_v42 }
0x2321   : > { %v7099_v7 = vpack.c.bf16 %v7085_v38, %v7084_v54  ;;  %v7070_v23 = vadd.f32 %v7026_v41, %v6990_v30  ;;  %v7071_v62 = vadd.f32 %v7030_v33, %v6991_v8  ;;  %p9485_p1 = por %p9484_p0, %p9483_p13 }
0x2322   : > { %v6952_v20 = vpop.permute.xlu1 %6951  ;;  %v6947_v35 = vpop.permute.xlu0 %6946 }
0x2323   : > { %v7086_v25 = vmax.f32 %v7070_v23, 0.0  ;;  %v7087_v27 = vmax.f32 %v7071_v62, 0.0  ;;  %v6993_v55 = vmul.f32 %v6952_v20, %v11762_v59  ;;  %v6992_v49 = vmul.f32 %v6947_v35, %v11753_v22  ;;  %8875 = vmatpush3.bf16.msra.mxu1 %v7099_v7  ;;  %p9486_p2 = pnand %p9485_p1, %p9479_p12 }
0x2324   : > { %8876 = vmatprep.subr.bf16.mxu1 %v9549_v42 }
0x2325   : > { %v7100_v32 = vpack.c.bf16 %v7087_v27, %v7086_v25  ;;  %v7073_v45 = vadd.f32 %v7038_v37, %v6993_v55  ;;  %v7072_v1 = vadd.f32 %v7034_v5, %v6992_v49 }
0x2326   : > { %v6957_v53 = vpop.permute.xlu1 %6956  ;;  %v6962_v11 = vpop.permute.xlu0 %6961 }
0x2327   : > { %v7089_v57 = vmax.f32 %v7073_v45, 0.0  ;;  %v7088_v61 = vmax.f32 %v7072_v1, 0.0  ;;  %v6994_v41 = vmul.f32 %v6957_v53, %v11765_v56  ;;  %v6995_v33 = vmul.f32 %v6962_v11, %v11774_v36  ;;  %8877 = vmatpush3.bf16.msra.mxu1 %v7100_v32 }
0x2328   : > { %8878 = vmatprep.subr.bf16.mxu1 %v9549_v42 }
0x2329   : > { %v7101_v59 = vpack.c.bf16 %v7089_v57, %v7088_v61  ;;  %v7074_v22 = vadd.f32 %v11896_v6, %v6994_v41  ;;  %v7075_v10 = vadd.f32 %v7046_v63, %v6995_v33 }
0x232a   : > { %v6972_v14 = vpop.permute.xlu1 %6971  ;;  %v6967_v60 = vpop.permute.xlu0 %6966 }
0x232b   : > { %v7090_v48 = vmax.f32 %v7074_v22, 0.0  ;;  %v7091_v37 = vmax.f32 %v7075_v10, 0.0  ;;  %v6997_v5 = vmul.f32 %v6972_v14, %v11786_v47  ;;  %v6996_v0 = vmul.f32 %v6967_v60, %v11777_v31  ;;  %8879 = vmatpush3.bf16.msra.mxu1 %v7101_v59 }
0x232c   : > { %8880 = vmatprep.subr.bf16.mxu1 %v9549_v42 }
0x232d   : > { %v7102_v56 = vpack.c.bf16 %v7091_v37, %v7090_v48  ;;  %v7077_v36 = vadd.f32 %v11898_v44, %v6997_v5  ;;  %v7076_v9 = vadd.f32 %v11900_v19, %v6996_v0 }
0x232e   : > { %v6982_v31 = vpop.permute.xlu0 %6981 }
0x232f   : > { %v7093_v18 = vmax.f32 %v7077_v36, 0.0  ;;  %v7092_v24 = vmax.f32 %v7076_v9, 0.0  ;;  %8881 = vmatpush3.bf16.msra.mxu1 %v7102_v56  ;;  %v7058_v6 = vpop.permute.xlu1 %7057  ;;  %v6999_v44 = vmul.f32 %v6982_v31, %v11798_v26 }
0x2330   : > { %8882 = vmatprep.subr.bf16.mxu1 %v9549_v42 }
0x2331   : > { %v7103_v63 = vpack.c.bf16 %v7093_v18, %v7092_v24 }
0x2333   : > { %8883 = vmatpush3.bf16.msra.mxu1 %v7103_v63 }
0x2334   : > { %v6977_v47 = vpop.permute.xlu1 %6976  ;;  %8884 = vmatprep.subr.bf16.mxu1 %v9549_v42  ;;  %v7107_v42 = vpop.permute.xlu0 %7106 }
0x2335   : > { %v6998_v29 = vmul.f32 %v6977_v47, %v11789_v17 }
0x2337   : > { %v7078_v4 = vadd.f32 %v7058_v6, %v6998_v29 }
0x2339   : > { %v7062_v19 = vpop.permute.xlu1 %7061  ;;  %v7094_v16 = vmax.f32 %v7078_v4, 0.0 }
0x233a   : > { %v7079_v50 = vadd.f32 %v7062_v19, %v6999_v44 }
0x233c   : > { %v7095_v40 = vmax.f32 %v7079_v50, 0.0 }
0x233e   : > { %v7104_v21 = vpack.c.bf16 %v7095_v40, %v7094_v16 }
0x2340   : > { %8885 = vmatpush3.bf16.msra.mxu1 %v7104_v21 }
0x2343   : > { %8887 = vmatmul.mubr.bf16.vlgmr.msra.gmra.mrb[160].mxu1 %v7096_v3 }
0x2416   : > { %v7143_v2 = vpop.f32.mrb[160].mxu1 }
0x2417   : > { %v8888_v17 = vpop.f32.mrb[161].mxu1  ;;  %v7144_v26 = vadd.f32 %v7143_v2, %v7107_v42 }
0x2418   : > { %v7146_v13 = vpop.f32.mrb[162].mxu1 }
0x2419   : > { %v7149_v39 = vadd.f32 %v9460_v34, %v7144_v26  ;;  %v8889_v46 = vpop.f32.mrb[163].mxu1 }
0x241b   : > { %7151 = vst.msk [vmem:[%s583_s2] sm:$0xf] %vm7150_vm9, %v7149_v39 }
0x241c   : > { %9489 = shalt.err (!%p9486_p2)
}
0x241d   : > { %s9490_s21 = scalar_lea.hbm %s11937_s24, 64  ;;  %s9494_s2 = scalar_lea.hbm %s11996_s17, 128 }
0x241e   : > { %p9491_p3 = scmp.ne.s32.totalorder %s11937_s24, %s9490_s21  ;;  %p9495_p8 = scmp.lt.u32.totalorder %s11937_s24, %s11996_s17 }
0x241f   : > { %p9496_p11 = scmp.lt.u32.totalorder %s9494_s2, %s9490_s21  ;;  %p9498_p10 = scmp.lt.u32.totalorder %s9490_s21, %s11937_s24 }
0x2420   : > { %p9492_p4 = pnand %p9491_p3, %p9695_p5 }
0x2421   : > { %p9497_p9 = por %p9496_p11, %p9495_p8 }
0x2422   : > { %p9493_p7 = pneg %p9492_p4 }
0x2423   : > { %p9499_p12 = por %p9498_p10, %p9497_p9 }
0x2425   : > { %p9500_p13 = pnand %p9499_p12, %p9493_p7 }
0x2427   : > { %9503 = shalt.err (!%p9500_p13)
}
0x2428   : > { %9105 = dma.vmem_to_hbm [thread:$0]  (%p9695_p5), %s11939_s29, 64, %s11937_s24, %s7153_s28  }
0x2429 PF: > { %s12022_s19 = sld [smem:[#allocation9_spill]]  ;;  %p9117_p0 = scmp.ge.s32.totalorder %s9542_s27, 2 }
0x242b   : > { %p9112_p1 = pnand %p9117_p0, %p9699_p6 }
0x242f   : > { %s7178_s18 = sand.u32 1, %s12022_s19  }
0x2430   : > { %s7179_s22 = scalar_lea.sflag [#allocation4], %s7178_s18 }
0x2431   : > { %9525 = dma.done.wait (!%p9112_p1), %s7179_s22, 64  }
0x2432   : > { %9527 = vsyncadd (!%p9112_p1), %s7179_s22, 4294967232  ;;  %s12024_s27 = sld [smem:[#allocation11_spill]]  ;;  %s12025_s21 = sld [smem:[#allocation10_spill]] }
0x2433   : > { %s12026_s26 = sld [smem:[#allocation12_spill]]  ;;  %s12027_s24 = smov %s9534_s25 }
0x2438   : > { %p28_p2 = scmp.ge.s32.totalorder %s12024_s27, 4   ;;  %s12028_s25 = smov %s12025_s21 }
0x243a   :  { %30 = sbr.rel (!%p28_p2) target bundleno = 8 (0x8), region = 134 }
0x2441   :  { %7184 = vsyncpa [#allocation4], 1 }
0x2442   :  { %7186 = vsyncpa [#allocation4 + $0x1], 1 }
0x2443   :  { %7187 = vsyncpa [#allocation5], 1 }
0x2444   :  { %7189 = vsyncpa [#allocation5 + $0x1], 1 }

</bundles_post_ra>
